<compile_context>
chip_gen: v5e
topology: v5e:2x2
jax: 0.10.0
libtpu: 0.0.40
codegen_flags: <defaults>
</compile_context>

<pallas_src>
import math
from functools import partial

import jax
import jax.numpy as jnp
import numpy as np
from jax import lax
from jax.experimental import pallas as pl
from jax.experimental.pallas import tpu as pltpu


_LN_EPS = 1e-5  # matches PyTorch nn.LayerNorm default


def _layernorm(x, gamma, beta, eps=_LN_EPS):
    mu = jnp.mean(x, axis=-1, keepdims=True)
    var = jnp.mean(jnp.square(x - mu), axis=-1, keepdims=True)
    return (x - mu) * lax.rsqrt(var + eps) * gamma + beta


# ------------------------------ fused kernel --------------------------------

def _fused_transformer_kernel(
        x_ref, pe_ref, we_ref, be_ref,
        wq_ref, bq_ref, wk_ref, bk_ref, wv_ref, bv_ref,
        wo_ref, bo_ref, g1_ref, beta1_ref,
        w1_ref, b1_ref, w2_ref, b2_ref, g2_ref, beta2_ref,
        o_ref, *, num_layers, nhead, d_model, scale_embed, scale_attn):
    """One batch element per grid step: x (S, F) -> h (S, d_model)."""
    f32 = jnp.float32
    bf16 = jnp.bfloat16

    # ---- embedding + positional encoding -----------------------------------
    h = jnp.dot(x_ref[...].astype(bf16), we_ref[...],
                preferred_element_type=f32)
    h = (h + be_ref[...]) * scale_embed + pe_ref[...]            # (S, d) f32
    S = h.shape[0]

    # Static unroll over layers (2): fully visible to the LLO scheduler; all
    # layer weights stay VMEM-resident for the whole kernel (< 1 MiB total).
    for l in range(num_layers):
        # --------------------- multi-head self-attention --------------------
        hb3 = jnp.broadcast_to(h.astype(bf16), (nhead, S, d_model))  # (H,S,d)
        dn_proj = (((2,), (1,)), ((0,), (0,)))   # contract d, batch over heads
        q = lax.dot_general(hb3, wq_ref[l], dn_proj,
                            preferred_element_type=f32) + bq_ref[l]   # (H,S,dh)
        k = lax.dot_general(hb3, wk_ref[l], dn_proj,
                            preferred_element_type=f32) + bk_ref[l]
        v = lax.dot_general(hb3, wv_ref[l], dn_proj,
                            preferred_element_type=f32) + bv_ref[l]

        # scores: 'hqd,hkd->hqk'
        s = lax.dot_general(q.astype(bf16), k.astype(bf16),
                            (((2,), (2,)), ((0,), (0,))),
                            preferred_element_type=f32) * scale_attn  # (H,S,S)
        m = jnp.max(s, axis=-1, keepdims=True)
        p = jnp.exp(s - m)
        p = p * pl.reciprocal(jnp.sum(p, axis=-1, keepdims=True), approx=True)

        # attention output: 'hqk,hkd->hqd'
        a = lax.dot_general(p.astype(bf16), v.astype(bf16),
                            (((2,), (1,)), ((0,), (0,))),
                            preferred_element_type=f32)              # (H,S,dh)
        # out projection per head then sum over heads == concat(heads) @ Wo
        oh = lax.dot_general(a.astype(bf16), wo_ref[l],
                             (((2,), (1,)), ((0,), (0,))),
                             preferred_element_type=f32)              # (H,S,d)
        attn = jnp.sum(oh, axis=0) + bo_ref[l]                        # (S, d)
        h = _layernorm(h + attn, g1_ref[l], beta1_ref[l])

        # ----------------------------- FFN -----------------------------------
        ff = jnp.dot(h.astype(bf16), w1_ref[l],
                     preferred_element_type=f32) + b1_ref[l]          # (S, dff)
        ff = jnp.maximum(ff, 0.0)
        ff = jnp.dot(ff.astype(bf16), w2_ref[l],
                     preferred_element_type=f32) + b2_ref[l]          # (S, d)
        h = _layernorm(h + ff, g2_ref[l], beta2_ref[l])

    o_ref[...] = h


# ------------------------------ kernel wrapper -------------------------------

def _full_spec(a):
    # Whole (small) array resident every grid step; constant block index so the
    # pipeline never re-DMAs it.
    return pl.BlockSpec(a.shape, lambda b: (0,) * a.ndim)


def pallas_transformer_encode(x, kp, pe_s, *, d_model, nhead, num_layers):
    """x: (B, S, F) -> encoder output h: (B, S, d_model)."""
    B, S, F = x.shape
    weights = (pe_s, kp["We"], kp["be"],
               kp["WQ"], kp["bQ"], kp["WK"], kp["bK"], kp["WV"], kp["bV"],
               kp["WO"], kp["bO"], kp["g1"], kp["beta1"],
               kp["W1"], kp["b1"], kp["W2"], kp["b2"], kp["g2"], kp["beta2"])
    kern = partial(_fused_transformer_kernel,
                   num_layers=num_layers, nhead=nhead, d_model=d_model,
                   scale_embed=math.sqrt(d_model),
                   scale_attn=1.0 / math.sqrt(d_model // nhead))
    return pl.pallas_call(
        kern,
        out_shape=jax.ShapeDtypeStruct((B, S, d_model), jnp.float32),
        grid=(B,),
        in_specs=[pl.BlockSpec((None, S, F), lambda b: (b, 0, 0))]
                 + [_full_spec(w) for w in weights],
        out_specs=pl.BlockSpec((None, S, d_model), lambda b: (b, 0, 0)),
        compiler_params=pltpu.CompilerParams(
            dimension_semantics=("parallel",),
            # Re-derived for v7x's 64 MiB physical VMEM (usage here is ~2 MiB).
            vmem_limit_bytes=48 * 1024 * 1024),
    )(x, *weights)


# ------------------------------ model definition -----------------------------

def make_positional_encoding(d_model, max_len=5000):
    pe = np.zeros((max_len, d_model), dtype=np.float32)
    position = np.arange(0, max_len, dtype=np.float32)[:, None]
    div_term = np.exp(np.arange(0, d_model, 2, dtype=np.float32)
                      * (-math.log(10000.0) / d_model))
    pe[:, 0::2] = np.sin(position * div_term)
    pe[:, 1::2] = np.cos(position * div_term)
    return jnp.asarray(pe)


def init_params(key, input_size, d_model, nhead, num_layers, output_size,
                dim_feedforward=2048):
    """Canonical f32 parameters (PyTorch layout, weights pre-transposed)."""
    def uniform(k, shape, scale=0.1):
        return jax.random.uniform(k, shape, jnp.float32, -scale, scale)

    keys = iter(jax.random.split(key, 4 + 8 * num_layers))
    params = {
        "d_model": d_model,
        "nhead": nhead,
        "We_t": uniform(next(keys), (input_size, d_model)),       # embedding.weight.T
        "be": uniform(next(keys), (1, d_model)),
        "pe": make_positional_encoding(d_model),
        "Wfc_t": uniform(next(keys), (d_model, output_size)),     # fc.weight.T
        "bfc": jnp.zeros((1, output_size), jnp.float32),
        "layers": [],
    }
    for _ in range(num_layers):
        params["layers"].append({
            "Win_t": uniform(next(keys), (d_model, 3 * d_model)),  # in_proj.T
            "bin": uniform(next(keys), (1, 3 * d_model)),
            "Wo_t": uniform(next(keys), (d_model, d_model)),       # out_proj.T
            "bo": uniform(next(keys), (1, d_model)),
            "W1_t": uniform(next(keys), (d_model, dim_feedforward)),
            "b1": uniform(next(keys), (1, dim_feedforward)),
            "W2_t": uniform(next(keys), (dim_feedforward, d_model)),
            "b2": uniform(next(keys), (1, d_model)),
            "g1": jnp.ones((1, d_model), jnp.float32),
            "beta1": jnp.zeros((1, d_model), jnp.float32),
            "g2": jnp.ones((1, d_model), jnp.float32),
            "beta2": jnp.zeros((1, d_model), jnp.float32),
        })
    return params


def prepare_kernel_params(params):
    """Host-side layout prep: per-head weight tensors stacked over layers,
    matmul weights cast to bf16 (biases / LayerNorm params stay f32)."""
    d, H = params["d_model"], params["nhead"]
    dh = d // H
    layers = params["layers"]
    bf16 = jnp.bfloat16

    def head_w(win_t, lo):   # (d, d) column block -> (H, d, dh)
        return win_t[:, lo:lo + d].reshape(d, H, dh).transpose(1, 0, 2)

    def head_b(bin_, lo):    # (d,) slice -> (H, 1, dh)
        return bin_[0, lo:lo + d].reshape(H, 1, dh)

    def stack(name):
        return jnp.stack([L[name] for L in layers])

    return {
        "We": params["We_t"].astype(bf16),
        "be": params["be"],
        "WQ": jnp.stack([head_w(L["Win_t"], 0) for L in layers]).astype(bf16),
        "WK": jnp.stack([head_w(L["Win_t"], d) for L in layers]).astype(bf16),
        "WV": jnp.stack([head_w(L["Win_t"], 2 * d) for L in layers]).astype(bf16),
        "bQ": jnp.stack([head_b(L["bin"], 0) for L in layers]),
        "bK": jnp.stack([head_b(L["bin"], d) for L in layers]),
        "bV": jnp.stack([head_b(L["bin"], 2 * d) for L in layers]),
        "WO": jnp.stack([L["Wo_t"].reshape(H, dh, d) for L in layers]).astype(bf16),
        "bO": stack("bo"),
        "g1": stack("g1"), "beta1": stack("beta1"),
        "W1": stack("W1_t").astype(bf16), "b1": stack("b1"),
        "W2": stack("W2_t").astype(bf16), "b2": stack("b2"),
        "g2": stack("g2"), "beta2": stack("beta2"),
    }


def transformer_forward(params, kparams, x):
    """Pallas implementation of TransformerPredictor.forward (eval mode)."""
    B, S, F = x.shape
    d, H = params["d_model"], params["nhead"]
    pe_s = params["pe"][:S]                                   # (S, d)
    h = pallas_transformer_encode(x, kparams, pe_s, d_model=d, nhead=H,
                                  num_layers=len(params["layers"]))
    last = h[:, -1, :]                                        # (B, d)
    # dropout == identity at inference; final (B,d)@(d,1) projection in JAX.
    return last @ params["Wfc_t"] + params["bfc"]


# ------------------------------ pure-JAX reference ---------------------------

def reference_forward(params, x, bf16_matmuls=True):
    """Reference in plain JAX; bf16_matmuls=True mirrors the kernel's mixed
    precision (bf16 operands, f32 accumulation), False is the exact-f32 module."""
    B, S, F = x.shape
    d, H = params["d_model"], params["nhead"]
    dh = d // H
    cast = (lambda t: t.astype(jnp.bfloat16)) if bf16_matmuls else (lambda t: t)

    def mm(a, b):
        return jnp.dot(cast(a), cast(b), preferred_element_type=jnp.float32)

    h = (mm(x, params["We_t"]) + params["be"]) * math.sqrt(d) + params["pe"][:S][None]
    for L in params["layers"]:
        qkv = mm(h, L["Win_t"]) + L["bin"]
        q, k, v = jnp.split(qkv, 3, axis=-1)
        heads = lambda t: t.reshape(B, S, H, dh).transpose(0, 2, 1, 3)
        s = jnp.einsum("bhqd,bhkd->bhqk", cast(heads(q)), cast(heads(k)),
                       preferred_element_type=jnp.float32) / math.sqrt(dh)
        p = jax.nn.softmax(s, axis=-1)
        a = jnp.einsum("bhqk,bhkd->bhqd", cast(p), cast(heads(v)),
                       preferred_element_type=jnp.float32).transpose(0, 2, 1, 3)
        a = mm(a.reshape(B, S, d), L["Wo_t"]) + L["bo"]
        h = _layernorm(h + a, L["g1"], L["beta1"])
        ff = jnp.maximum(mm(h, L["W1_t"]) + L["b1"], 0.0)
        ff = mm(ff, L["W2_t"]) + L["b2"]
        h = _layernorm(h + ff, L["g2"], L["beta2"])
    return h[:, -1, :] @ params["Wfc_t"] + params["bfc"]


# ----------------------------------- main -------------------------------------

if __name__ == "__main__":
    # Small shapes consistent with the module's forward.
    B, S = 2, 8
    input_size, d_model, nhead, num_layers, output_size = 8, 32, 4, 2, 1

    key = jax.random.PRNGKey(0)
    k_param, k_x = jax.random.split(key)
    params = init_params(k_param, input_size, d_model, nhead, num_layers,
                         output_size)
    kparams = prepare_kernel_params(params)
    x = jax.random.normal(k_x, (B, S, input_size), jnp.float32)

    out = jax.block_until_ready(transformer_forward(params, kparams, x))
    ref_mixed = jax.block_until_ready(reference_forward(params, x, True))
    ref_f32 = jax.block_until_ready(reference_forward(params, x, False))

    # Main check: against a reference with the same bf16/f32 mixed precision.
    np.testing.assert_allclose(np.asarray(out), np.asarray(ref_mixed),
                               rtol=5e-3, atol=5e-3)
    # Sanity check: against the exact-f32 PyTorch-semantics reference.
    np.testing.assert_allclose(np.asarray(out), np.asarray(ref_f32),
                               rtol=5e-2, atol=5e-2)
    assert out.shape == (B, output_size)
    print("KERNEL_OK")
</pallas_src>

<mosaic_0001>
module attributes {stable_mosaic.version = 11 : i64} {
  func.func @_fused_transformer_kernel(%arg0: i32, %arg1: memref<1x8x8xf32, #tpu.memory_space<vmem>>, %arg2: memref<8x32xf32, #tpu.memory_space<vmem>>, %arg3: memref<8x32xbf16, #tpu.memory_space<vmem>>, %arg4: memref<1x32xf32, #tpu.memory_space<vmem>>, %arg5: memref<2x4x32x8xbf16, #tpu.memory_space<vmem>>, %arg6: memref<2x4x1x8xf32, #tpu.memory_space<vmem>>, %arg7: memref<2x4x32x8xbf16, #tpu.memory_space<vmem>>, %arg8: memref<2x4x1x8xf32, #tpu.memory_space<vmem>>, %arg9: memref<2x4x32x8xbf16, #tpu.memory_space<vmem>>, %arg10: memref<2x4x1x8xf32, #tpu.memory_space<vmem>>, %arg11: memref<2x4x8x32xbf16, #tpu.memory_space<vmem>>, %arg12: memref<2x1x32xf32, #tpu.memory_space<vmem>>, %arg13: memref<2x1x32xf32, #tpu.memory_space<vmem>>, %arg14: memref<2x1x32xf32, #tpu.memory_space<vmem>>, %arg15: memref<2x32x2048xbf16, #tpu.memory_space<vmem>>, %arg16: memref<2x1x2048xf32, #tpu.memory_space<vmem>>, %arg17: memref<2x2048x32xbf16, #tpu.memory_space<vmem>>, %arg18: memref<2x1x32xf32, #tpu.memory_space<vmem>>, %arg19: memref<2x1x32xf32, #tpu.memory_space<vmem>>, %arg20: memref<2x1x32xf32, #tpu.memory_space<vmem>>, %arg21: memref<1x8x32xf32, #tpu.memory_space<vmem>>) attributes {dimension_semantics = [#tpu.dimension_semantics<parallel>], iteration_bounds = array<i64: 2>, scalar_prefetch = 0 : i64, scratch_operands = 0 : i64, tpu.core_type = #tpu.core_type<tc>, window_params = [{transform_indices = @transform_0, window_bounds = array<i64: 1, 8, 8>}, {pipeline_mode = #tpu.pipeline_mode<synchronous>, transform_indices = @transform_1, window_bounds = array<i64: 8, 32>}, {pipeline_mode = #tpu.pipeline_mode<synchronous>, transform_indices = @transform_2, window_bounds = array<i64: 8, 32>}, {pipeline_mode = #tpu.pipeline_mode<synchronous>, transform_indices = @transform_3, window_bounds = array<i64: 1, 32>}, {pipeline_mode = #tpu.pipeline_mode<synchronous>, transform_indices = @transform_4, window_bounds = array<i64: 2, 4, 32, 8>}, {pipeline_mode = #tpu.pipeline_mode<synchronous>, transform_indices = @transform_5, window_bounds = array<i64: 2, 4, 1, 8>}, {pipeline_mode = #tpu.pipeline_mode<synchronous>, transform_indices = @transform_6, window_bounds = array<i64: 2, 4, 32, 8>}, {pipeline_mode = #tpu.pipeline_mode<synchronous>, transform_indices = @transform_7, window_bounds = array<i64: 2, 4, 1, 8>}, {pipeline_mode = #tpu.pipeline_mode<synchronous>, transform_indices = @transform_8, window_bounds = array<i64: 2, 4, 32, 8>}, {pipeline_mode = #tpu.pipeline_mode<synchronous>, transform_indices = @transform_9, window_bounds = array<i64: 2, 4, 1, 8>}, {pipeline_mode = #tpu.pipeline_mode<synchronous>, transform_indices = @transform_10, window_bounds = array<i64: 2, 4, 8, 32>}, {pipeline_mode = #tpu.pipeline_mode<synchronous>, transform_indices = @transform_11, window_bounds = array<i64: 2, 1, 32>}, {pipeline_mode = #tpu.pipeline_mode<synchronous>, transform_indices = @transform_12, window_bounds = array<i64: 2, 1, 32>}, {pipeline_mode = #tpu.pipeline_mode<synchronous>, transform_indices = @transform_13, window_bounds = array<i64: 2, 1, 32>}, {pipeline_mode = #tpu.pipeline_mode<synchronous>, transform_indices = @transform_14, window_bounds = array<i64: 2, 32, 2048>}, {pipeline_mode = #tpu.pipeline_mode<synchronous>, transform_indices = @transform_15, window_bounds = array<i64: 2, 1, 2048>}, {pipeline_mode = #tpu.pipeline_mode<synchronous>, transform_indices = @transform_16, window_bounds = array<i64: 2, 2048, 32>}, {pipeline_mode = #tpu.pipeline_mode<synchronous>, transform_indices = @transform_17, window_bounds = array<i64: 2, 1, 32>}, {pipeline_mode = #tpu.pipeline_mode<synchronous>, transform_indices = @transform_18, window_bounds = array<i64: 2, 1, 32>}, {pipeline_mode = #tpu.pipeline_mode<synchronous>, transform_indices = @transform_19, window_bounds = array<i64: 2, 1, 32>}, {transform_indices = @transform_20, window_bounds = array<i64: 1, 8, 32>}]} {
    %c0 = arith.constant 0 : index
    %c0_0 = arith.constant 0 : index
    %c0_1 = arith.constant 0 : index
    %0 = vector.load %arg1[%c0, %c0_0, %c0_1] : memref<1x8x8xf32, #tpu.memory_space<vmem>>, vector<1x8x8xf32>
    %1 = vector.shape_cast %0 : vector<1x8x8xf32> to vector<8x8xf32>
    %2 = arith.truncf %1 : vector<8x8xf32> to vector<8x8xbf16>
    %c0_2 = arith.constant 0 : index
    %c0_3 = arith.constant 0 : index
    %3 = vector.load %arg3[%c0_2, %c0_3] : memref<8x32xbf16, #tpu.memory_space<vmem>>, vector<8x32xbf16>
    %cst = arith.constant dense<0.000000e+00> : vector<8x32xf32>
    %4 = tpu.matmul %2, %3, %cst {dimension_numbers = #tpu.dot_dimension_numbers<[1], [0], [0], [1], [0, 0, 1, 1], [], []>} : vector<8x8xbf16>, vector<8x32xbf16>, vector<8x32xf32> -> vector<8x32xf32>
    %c0_4 = arith.constant 0 : index
    %c0_5 = arith.constant 0 : index
    %5 = vector.load %arg4[%c0_4, %c0_5] : memref<1x32xf32, #tpu.memory_space<vmem>>, vector<1x32xf32>
    %6 = vector.broadcast %5 : vector<1x32xf32> to vector<8x32xf32>
    %7 = arith.addf %4, %6 : vector<8x32xf32>
    %cst_6 = arith.constant 5.65685415 : f32
    %8 = vector.broadcast %cst_6 : f32 to vector<8x32xf32>
    %9 = arith.mulf %7, %8 : vector<8x32xf32>
    %c0_7 = arith.constant 0 : index
    %c0_8 = arith.constant 0 : index
    %10 = vector.load %arg2[%c0_7, %c0_8] : memref<8x32xf32, #tpu.memory_space<vmem>>, vector<8x32xf32>
    %11 = arith.addf %9, %10 : vector<8x32xf32>
    %12 = arith.truncf %11 : vector<8x32xf32> to vector<8x32xbf16>
    %13 = vector.shape_cast %12 : vector<8x32xbf16> to vector<1x8x32xbf16>
    %14 = vector.broadcast %13 : vector<1x8x32xbf16> to vector<4x8x32xbf16>
    %c0_9 = arith.constant 0 : index
    %c0_10 = arith.constant 0 : index
    %c0_11 = arith.constant 0 : index
    %c0_12 = arith.constant 0 : index
    %15 = vector.load %arg5[%c0_9, %c0_10, %c0_11, %c0_12] : memref<2x4x32x8xbf16, #tpu.memory_space<vmem>>, vector<1x4x32x8xbf16>
    %16 = vector.shape_cast %15 : vector<1x4x32x8xbf16> to vector<4x32x8xbf16>
    %cst_13 = arith.constant dense<0.000000e+00> : vector<4x8x8xf32>
    %17 = tpu.matmul %14, %16, %cst_13 {dimension_numbers = #tpu.dot_dimension_numbers<[2], [1], [1], [2], [0, 0, 0, 1, 1, 2], [0], [0]>} : vector<4x8x32xbf16>, vector<4x32x8xbf16>, vector<4x8x8xf32> -> vector<4x8x8xf32>
    %c0_14 = arith.constant 0 : index
    %c0_15 = arith.constant 0 : index
    %c0_16 = arith.constant 0 : index
    %c0_17 = arith.constant 0 : index
    %18 = vector.load %arg6[%c0_14, %c0_15, %c0_16, %c0_17] : memref<2x4x1x8xf32, #tpu.memory_space<vmem>>, vector<1x4x1x8xf32>
    %19 = vector.shape_cast %18 : vector<1x4x1x8xf32> to vector<4x1x8xf32>
    %20 = vector.broadcast %19 : vector<4x1x8xf32> to vector<4x8x8xf32>
    %21 = arith.addf %17, %20 : vector<4x8x8xf32>
    %c0_18 = arith.constant 0 : index
    %c0_19 = arith.constant 0 : index
    %c0_20 = arith.constant 0 : index
    %c0_21 = arith.constant 0 : index
    %22 = vector.load %arg7[%c0_18, %c0_19, %c0_20, %c0_21] : memref<2x4x32x8xbf16, #tpu.memory_space<vmem>>, vector<1x4x32x8xbf16>
    %23 = vector.shape_cast %22 : vector<1x4x32x8xbf16> to vector<4x32x8xbf16>
    %cst_22 = arith.constant dense<0.000000e+00> : vector<4x8x8xf32>
    %24 = tpu.matmul %14, %23, %cst_22 {dimension_numbers = #tpu.dot_dimension_numbers<[2], [1], [1], [2], [0, 0, 0, 1, 1, 2], [0], [0]>} : vector<4x8x32xbf16>, vector<4x32x8xbf16>, vector<4x8x8xf32> -> vector<4x8x8xf32>
    %c0_23 = arith.constant 0 : index
    %c0_24 = arith.constant 0 : index
    %c0_25 = arith.constant 0 : index
    %c0_26 = arith.constant 0 : index
    %25 = vector.load %arg8[%c0_23, %c0_24, %c0_25, %c0_26] : memref<2x4x1x8xf32, #tpu.memory_space<vmem>>, vector<1x4x1x8xf32>
    %26 = vector.shape_cast %25 : vector<1x4x1x8xf32> to vector<4x1x8xf32>
    %27 = vector.broadcast %26 : vector<4x1x8xf32> to vector<4x8x8xf32>
    %28 = arith.addf %24, %27 : vector<4x8x8xf32>
    %c0_27 = arith.constant 0 : index
    %c0_28 = arith.constant 0 : index
    %c0_29 = arith.constant 0 : index
    %c0_30 = arith.constant 0 : index
    %29 = vector.load %arg9[%c0_27, %c0_28, %c0_29, %c0_30] : memref<2x4x32x8xbf16, #tpu.memory_space<vmem>>, vector<1x4x32x8xbf16>
    %30 = vector.shape_cast %29 : vector<1x4x32x8xbf16> to vector<4x32x8xbf16>
    %cst_31 = arith.constant dense<0.000000e+00> : vector<4x8x8xf32>
    %31 = tpu.matmul %14, %30, %cst_31 {dimension_numbers = #tpu.dot_dimension_numbers<[2], [1], [1], [2], [0, 0, 0, 1, 1, 2], [0], [0]>} : vector<4x8x32xbf16>, vector<4x32x8xbf16>, vector<4x8x8xf32> -> vector<4x8x8xf32>
    %c0_32 = arith.constant 0 : index
    %c0_33 = arith.constant 0 : index
    %c0_34 = arith.constant 0 : index
    %c0_35 = arith.constant 0 : index
    %32 = vector.load %arg10[%c0_32, %c0_33, %c0_34, %c0_35] : memref<2x4x1x8xf32, #tpu.memory_space<vmem>>, vector<1x4x1x8xf32>
    %33 = vector.shape_cast %32 : vector<1x4x1x8xf32> to vector<4x1x8xf32>
    %34 = vector.broadcast %33 : vector<4x1x8xf32> to vector<4x8x8xf32>
    %35 = arith.addf %31, %34 : vector<4x8x8xf32>
    %36 = arith.truncf %21 : vector<4x8x8xf32> to vector<4x8x8xbf16>
    %37 = arith.truncf %28 : vector<4x8x8xf32> to vector<4x8x8xbf16>
    %cst_36 = arith.constant dense<0.000000e+00> : vector<4x8x8xf32>
    %38 = tpu.matmul %36, %37, %cst_36 {dimension_numbers = #tpu.dot_dimension_numbers<[2], [2], [1], [1], [0, 0, 0, 1, 1, 1], [0], [0]>} : vector<4x8x8xbf16>, vector<4x8x8xbf16>, vector<4x8x8xf32> -> vector<4x8x8xf32>
    %cst_37 = arith.constant 0.353553385 : f32
    %39 = vector.broadcast %cst_37 : f32 to vector<4x8x8xf32>
    %40 = arith.mulf %38, %39 : vector<4x8x8xf32>
    %cst_38 = arith.constant dense<0xFF800000> : vector<4x8xf32>
    %41 = vector.multi_reduction <maximumf>, %40, %cst_38 [2] : vector<4x8x8xf32> to vector<4x8xf32>
    %42 = vector.shape_cast %41 : vector<4x8xf32> to vector<4x8x1xf32>
    %43 = vector.broadcast %42 : vector<4x8x1xf32> to vector<4x8x8xf32>
    %44 = arith.subf %40, %43 : vector<4x8x8xf32>
    %45 = math.exp %44 : vector<4x8x8xf32>
    %cst_39 = arith.constant dense<0.000000e+00> : vector<4x8xf32>
    %46 = vector.multi_reduction <add>, %45, %cst_39 [2] : vector<4x8x8xf32> to vector<4x8xf32>
    %47 = vector.shape_cast %46 : vector<4x8xf32> to vector<4x8x1xf32>
    %48 = tpu.reciprocal %47 {approx = true} : vector<4x8x1xf32> -> vector<4x8x1xf32>
    %49 = vector.broadcast %48 : vector<4x8x1xf32> to vector<4x8x8xf32>
    %50 = arith.mulf %45, %49 : vector<4x8x8xf32>
    %51 = arith.truncf %50 : vector<4x8x8xf32> to vector<4x8x8xbf16>
    %52 = arith.truncf %35 : vector<4x8x8xf32> to vector<4x8x8xbf16>
    %cst_40 = arith.constant dense<0.000000e+00> : vector<4x8x8xf32>
    %53 = tpu.matmul %51, %52, %cst_40 {dimension_numbers = #tpu.dot_dimension_numbers<[2], [1], [1], [2], [0, 0, 0, 1, 1, 2], [0], [0]>} : vector<4x8x8xbf16>, vector<4x8x8xbf16>, vector<4x8x8xf32> -> vector<4x8x8xf32>
    %54 = arith.truncf %53 : vector<4x8x8xf32> to vector<4x8x8xbf16>
    %c0_41 = arith.constant 0 : index
    %c0_42 = arith.constant 0 : index
    %c0_43 = arith.constant 0 : index
    %c0_44 = arith.constant 0 : index
    %55 = vector.load %arg11[%c0_41, %c0_42, %c0_43, %c0_44] : memref<2x4x8x32xbf16, #tpu.memory_space<vmem>>, vector<1x4x8x32xbf16>
    %56 = vector.shape_cast %55 : vector<1x4x8x32xbf16> to vector<4x8x32xbf16>
    %cst_45 = arith.constant dense<0.000000e+00> : vector<4x8x32xf32>
    %57 = tpu.matmul %54, %56, %cst_45 {dimension_numbers = #tpu.dot_dimension_numbers<[2], [1], [1], [2], [0, 0, 0, 1, 1, 2], [0], [0]>} : vector<4x8x8xbf16>, vector<4x8x32xbf16>, vector<4x8x32xf32> -> vector<4x8x32xf32>
    %cst_46 = arith.constant dense<0.000000e+00> : vector<8x32xf32>
    %58 = vector.multi_reduction <add>, %57, %cst_46 [0] : vector<4x8x32xf32> to vector<8x32xf32>
    %c0_47 = arith.constant 0 : index
    %c0_48 = arith.constant 0 : index
    %c0_49 = arith.constant 0 : index
    %59 = vector.load %arg12[%c0_47, %c0_48, %c0_49] : memref<2x1x32xf32, #tpu.memory_space<vmem>>, vector<1x1x32xf32>
    %60 = vector.shape_cast %59 : vector<1x1x32xf32> to vector<1x32xf32>
    %61 = vector.broadcast %60 : vector<1x32xf32> to vector<8x32xf32>
    %62 = arith.addf %58, %61 : vector<8x32xf32>
    %63 = arith.addf %11, %62 : vector<8x32xf32>
    %c0_50 = arith.constant 0 : index
    %c0_51 = arith.constant 0 : index
    %c0_52 = arith.constant 0 : index
    %64 = vector.load %arg13[%c0_50, %c0_51, %c0_52] : memref<2x1x32xf32, #tpu.memory_space<vmem>>, vector<1x1x32xf32>
    %65 = vector.shape_cast %64 : vector<1x1x32xf32> to vector<1x32xf32>
    %c0_53 = arith.constant 0 : index
    %c0_54 = arith.constant 0 : index
    %c0_55 = arith.constant 0 : index
    %66 = vector.load %arg14[%c0_53, %c0_54, %c0_55] : memref<2x1x32xf32, #tpu.memory_space<vmem>>, vector<1x1x32xf32>
    %67 = vector.shape_cast %66 : vector<1x1x32xf32> to vector<1x32xf32>
    %cst_56 = arith.constant dense<0.000000e+00> : vector<8xf32>
    %68 = vector.multi_reduction <add>, %63, %cst_56 [1] : vector<8x32xf32> to vector<8xf32>
    %69 = vector.shape_cast %68 : vector<8xf32> to vector<8x1xf32>
    %cst_57 = arith.constant 3.200000e+01 : f32
    %70 = vector.broadcast %cst_57 : f32 to vector<8x1xf32>
    %71 = arith.divf %69, %70 : vector<8x1xf32>
    %72 = vector.broadcast %71 : vector<8x1xf32> to vector<8x32xf32>
    %73 = arith.subf %63, %72 : vector<8x32xf32>
    %74 = arith.mulf %73, %73 : vector<8x32xf32>
    %cst_58 = arith.constant dense<0.000000e+00> : vector<8xf32>
    %75 = vector.multi_reduction <add>, %74, %cst_58 [1] : vector<8x32xf32> to vector<8xf32>
    %76 = vector.shape_cast %75 : vector<8xf32> to vector<8x1xf32>
    %cst_59 = arith.constant 3.200000e+01 : f32
    %77 = vector.broadcast %cst_59 : f32 to vector<8x1xf32>
    %78 = arith.divf %76, %77 : vector<8x1xf32>
    %79 = vector.broadcast %71 : vector<8x1xf32> to vector<8x32xf32>
    %80 = arith.subf %63, %79 : vector<8x32xf32>
    %cst_60 = arith.constant 9.99999974E-6 : f32
    %81 = vector.broadcast %cst_60 : f32 to vector<8x1xf32>
    %82 = arith.addf %78, %81 : vector<8x1xf32>
    %83 = math.rsqrt %82 : vector<8x1xf32>
    %84 = vector.broadcast %83 : vector<8x1xf32> to vector<8x32xf32>
    %85 = arith.mulf %80, %84 : vector<8x32xf32>
    %86 = vector.broadcast %65 : vector<1x32xf32> to vector<8x32xf32>
    %87 = arith.mulf %85, %86 : vector<8x32xf32>
    %88 = vector.broadcast %67 : vector<1x32xf32> to vector<8x32xf32>
    %89 = arith.addf %87, %88 : vector<8x32xf32>
    %90 = arith.truncf %89 : vector<8x32xf32> to vector<8x32xbf16>
    %c0_61 = arith.constant 0 : index
    %c0_62 = arith.constant 0 : index
    %c0_63 = arith.constant 0 : index
    %91 = vector.load %arg15[%c0_61, %c0_62, %c0_63] : memref<2x32x2048xbf16, #tpu.memory_space<vmem>>, vector<1x32x2048xbf16>
    %92 = vector.shape_cast %91 : vector<1x32x2048xbf16> to vector<32x2048xbf16>
    %cst_64 = arith.constant dense<0.000000e+00> : vector<8x2048xf32>
    %93 = tpu.matmul %90, %92, %cst_64 {dimension_numbers = #tpu.dot_dimension_numbers<[1], [0], [0], [1], [0, 0, 1, 1], [], []>} : vector<8x32xbf16>, vector<32x2048xbf16>, vector<8x2048xf32> -> vector<8x2048xf32>
    %c0_65 = arith.constant 0 : index
    %c0_66 = arith.constant 0 : index
    %c0_67 = arith.constant 0 : index
    %94 = vector.load %arg16[%c0_65, %c0_66, %c0_67] : memref<2x1x2048xf32, #tpu.memory_space<vmem>>, vector<1x1x2048xf32>
    %95 = vector.shape_cast %94 : vector<1x1x2048xf32> to vector<1x2048xf32>
    %96 = vector.broadcast %95 : vector<1x2048xf32> to vector<8x2048xf32>
    %97 = arith.addf %93, %96 : vector<8x2048xf32>
    %cst_68 = arith.constant 0.000000e+00 : f32
    %98 = vector.broadcast %cst_68 : f32 to vector<8x2048xf32>
    %99 = arith.maximumf %97, %98 : vector<8x2048xf32>
    %100 = arith.truncf %99 : vector<8x2048xf32> to vector<8x2048xbf16>
    %c0_69 = arith.constant 0 : index
    %c0_70 = arith.constant 0 : index
    %c0_71 = arith.constant 0 : index
    %101 = vector.load %arg17[%c0_69, %c0_70, %c0_71] : memref<2x2048x32xbf16, #tpu.memory_space<vmem>>, vector<1x2048x32xbf16>
    %102 = vector.shape_cast %101 : vector<1x2048x32xbf16> to vector<2048x32xbf16>
    %cst_72 = arith.constant dense<0.000000e+00> : vector<8x32xf32>
    %103 = tpu.matmul %100, %102, %cst_72 {dimension_numbers = #tpu.dot_dimension_numbers<[1], [0], [0], [1], [0, 0, 1, 1], [], []>} : vector<8x2048xbf16>, vector<2048x32xbf16>, vector<8x32xf32> -> vector<8x32xf32>
    %c0_73 = arith.constant 0 : index
    %c0_74 = arith.constant 0 : index
    %c0_75 = arith.constant 0 : index
    %104 = vector.load %arg18[%c0_73, %c0_74, %c0_75] : memref<2x1x32xf32, #tpu.memory_space<vmem>>, vector<1x1x32xf32>
    %105 = vector.shape_cast %104 : vector<1x1x32xf32> to vector<1x32xf32>
    %106 = vector.broadcast %105 : vector<1x32xf32> to vector<8x32xf32>
    %107 = arith.addf %103, %106 : vector<8x32xf32>
    %108 = arith.addf %89, %107 : vector<8x32xf32>
    %c0_76 = arith.constant 0 : index
    %c0_77 = arith.constant 0 : index
    %c0_78 = arith.constant 0 : index
    %109 = vector.load %arg19[%c0_76, %c0_77, %c0_78] : memref<2x1x32xf32, #tpu.memory_space<vmem>>, vector<1x1x32xf32>
    %110 = vector.shape_cast %109 : vector<1x1x32xf32> to vector<1x32xf32>
    %c0_79 = arith.constant 0 : index
    %c0_80 = arith.constant 0 : index
    %c0_81 = arith.constant 0 : index
    %111 = vector.load %arg20[%c0_79, %c0_80, %c0_81] : memref<2x1x32xf32, #tpu.memory_space<vmem>>, vector<1x1x32xf32>
    %112 = vector.shape_cast %111 : vector<1x1x32xf32> to vector<1x32xf32>
    %cst_82 = arith.constant dense<0.000000e+00> : vector<8xf32>
    %113 = vector.multi_reduction <add>, %108, %cst_82 [1] : vector<8x32xf32> to vector<8xf32>
    %114 = vector.shape_cast %113 : vector<8xf32> to vector<8x1xf32>
    %cst_83 = arith.constant 3.200000e+01 : f32
    %115 = vector.broadcast %cst_83 : f32 to vector<8x1xf32>
    %116 = arith.divf %114, %115 : vector<8x1xf32>
    %117 = vector.broadcast %116 : vector<8x1xf32> to vector<8x32xf32>
    %118 = arith.subf %108, %117 : vector<8x32xf32>
    %119 = arith.mulf %118, %118 : vector<8x32xf32>
    %cst_84 = arith.constant dense<0.000000e+00> : vector<8xf32>
    %120 = vector.multi_reduction <add>, %119, %cst_84 [1] : vector<8x32xf32> to vector<8xf32>
    %121 = vector.shape_cast %120 : vector<8xf32> to vector<8x1xf32>
    %cst_85 = arith.constant 3.200000e+01 : f32
    %122 = vector.broadcast %cst_85 : f32 to vector<8x1xf32>
    %123 = arith.divf %121, %122 : vector<8x1xf32>
    %124 = vector.broadcast %116 : vector<8x1xf32> to vector<8x32xf32>
    %125 = arith.subf %108, %124 : vector<8x32xf32>
    %cst_86 = arith.constant 9.99999974E-6 : f32
    %126 = vector.broadcast %cst_86 : f32 to vector<8x1xf32>
    %127 = arith.addf %123, %126 : vector<8x1xf32>
    %128 = math.rsqrt %127 : vector<8x1xf32>
    %129 = vector.broadcast %128 : vector<8x1xf32> to vector<8x32xf32>
    %130 = arith.mulf %125, %129 : vector<8x32xf32>
    %131 = vector.broadcast %110 : vector<1x32xf32> to vector<8x32xf32>
    %132 = arith.mulf %130, %131 : vector<8x32xf32>
    %133 = vector.broadcast %112 : vector<1x32xf32> to vector<8x32xf32>
    %134 = arith.addf %132, %133 : vector<8x32xf32>
    %135 = arith.truncf %134 : vector<8x32xf32> to vector<8x32xbf16>
    %136 = vector.shape_cast %135 : vector<8x32xbf16> to vector<1x8x32xbf16>
    %137 = vector.broadcast %136 : vector<1x8x32xbf16> to vector<4x8x32xbf16>
    %c1 = arith.constant 1 : index
    %c0_87 = arith.constant 0 : index
    %c0_88 = arith.constant 0 : index
    %c0_89 = arith.constant 0 : index
    %138 = vector.load %arg5[%c1, %c0_87, %c0_88, %c0_89] : memref<2x4x32x8xbf16, #tpu.memory_space<vmem>>, vector<1x4x32x8xbf16>
    %139 = vector.shape_cast %138 : vector<1x4x32x8xbf16> to vector<4x32x8xbf16>
    %cst_90 = arith.constant dense<0.000000e+00> : vector<4x8x8xf32>
    %140 = tpu.matmul %137, %139, %cst_90 {dimension_numbers = #tpu.dot_dimension_numbers<[2], [1], [1], [2], [0, 0, 0, 1, 1, 2], [0], [0]>} : vector<4x8x32xbf16>, vector<4x32x8xbf16>, vector<4x8x8xf32> -> vector<4x8x8xf32>
    %c1_91 = arith.constant 1 : index
    %c0_92 = arith.constant 0 : index
    %c0_93 = arith.constant 0 : index
    %c0_94 = arith.constant 0 : index
    %141 = vector.load %arg6[%c1_91, %c0_92, %c0_93, %c0_94] : memref<2x4x1x8xf32, #tpu.memory_space<vmem>>, vector<1x4x1x8xf32>
    %142 = vector.shape_cast %141 : vector<1x4x1x8xf32> to vector<4x1x8xf32>
    %143 = vector.broadcast %142 : vector<4x1x8xf32> to vector<4x8x8xf32>
    %144 = arith.addf %140, %143 : vector<4x8x8xf32>
    %c1_95 = arith.constant 1 : index
    %c0_96 = arith.constant 0 : index
    %c0_97 = arith.constant 0 : index
    %c0_98 = arith.constant 0 : index
    %145 = vector.load %arg7[%c1_95, %c0_96, %c0_97, %c0_98] : memref<2x4x32x8xbf16, #tpu.memory_space<vmem>>, vector<1x4x32x8xbf16>
    %146 = vector.shape_cast %145 : vector<1x4x32x8xbf16> to vector<4x32x8xbf16>
    %cst_99 = arith.constant dense<0.000000e+00> : vector<4x8x8xf32>
    %147 = tpu.matmul %137, %146, %cst_99 {dimension_numbers = #tpu.dot_dimension_numbers<[2], [1], [1], [2], [0, 0, 0, 1, 1, 2], [0], [0]>} : vector<4x8x32xbf16>, vector<4x32x8xbf16>, vector<4x8x8xf32> -> vector<4x8x8xf32>
    %c1_100 = arith.constant 1 : index
    %c0_101 = arith.constant 0 : index
    %c0_102 = arith.constant 0 : index
    %c0_103 = arith.constant 0 : index
    %148 = vector.load %arg8[%c1_100, %c0_101, %c0_102, %c0_103] : memref<2x4x1x8xf32, #tpu.memory_space<vmem>>, vector<1x4x1x8xf32>
    %149 = vector.shape_cast %148 : vector<1x4x1x8xf32> to vector<4x1x8xf32>
    %150 = vector.broadcast %149 : vector<4x1x8xf32> to vector<4x8x8xf32>
    %151 = arith.addf %147, %150 : vector<4x8x8xf32>
    %c1_104 = arith.constant 1 : index
    %c0_105 = arith.constant 0 : index
    %c0_106 = arith.constant 0 : index
    %c0_107 = arith.constant 0 : index
    %152 = vector.load %arg9[%c1_104, %c0_105, %c0_106, %c0_107] : memref<2x4x32x8xbf16, #tpu.memory_space<vmem>>, vector<1x4x32x8xbf16>
    %153 = vector.shape_cast %152 : vector<1x4x32x8xbf16> to vector<4x32x8xbf16>
    %cst_108 = arith.constant dense<0.000000e+00> : vector<4x8x8xf32>
    %154 = tpu.matmul %137, %153, %cst_108 {dimension_numbers = #tpu.dot_dimension_numbers<[2], [1], [1], [2], [0, 0, 0, 1, 1, 2], [0], [0]>} : vector<4x8x32xbf16>, vector<4x32x8xbf16>, vector<4x8x8xf32> -> vector<4x8x8xf32>
    %c1_109 = arith.constant 1 : index
    %c0_110 = arith.constant 0 : index
    %c0_111 = arith.constant 0 : index
    %c0_112 = arith.constant 0 : index
    %155 = vector.load %arg10[%c1_109, %c0_110, %c0_111, %c0_112] : memref<2x4x1x8xf32, #tpu.memory_space<vmem>>, vector<1x4x1x8xf32>
    %156 = vector.shape_cast %155 : vector<1x4x1x8xf32> to vector<4x1x8xf32>
    %157 = vector.broadcast %156 : vector<4x1x8xf32> to vector<4x8x8xf32>
    %158 = arith.addf %154, %157 : vector<4x8x8xf32>
    %159 = arith.truncf %144 : vector<4x8x8xf32> to vector<4x8x8xbf16>
    %160 = arith.truncf %151 : vector<4x8x8xf32> to vector<4x8x8xbf16>
    %cst_113 = arith.constant dense<0.000000e+00> : vector<4x8x8xf32>
    %161 = tpu.matmul %159, %160, %cst_113 {dimension_numbers = #tpu.dot_dimension_numbers<[2], [2], [1], [1], [0, 0, 0, 1, 1, 1], [0], [0]>} : vector<4x8x8xbf16>, vector<4x8x8xbf16>, vector<4x8x8xf32> -> vector<4x8x8xf32>
    %cst_114 = arith.constant 0.353553385 : f32
    %162 = vector.broadcast %cst_114 : f32 to vector<4x8x8xf32>
    %163 = arith.mulf %161, %162 : vector<4x8x8xf32>
    %cst_115 = arith.constant dense<0xFF800000> : vector<4x8xf32>
    %164 = vector.multi_reduction <maximumf>, %163, %cst_115 [2] : vector<4x8x8xf32> to vector<4x8xf32>
    %165 = vector.shape_cast %164 : vector<4x8xf32> to vector<4x8x1xf32>
    %166 = vector.broadcast %165 : vector<4x8x1xf32> to vector<4x8x8xf32>
    %167 = arith.subf %163, %166 : vector<4x8x8xf32>
    %168 = math.exp %167 : vector<4x8x8xf32>
    %cst_116 = arith.constant dense<0.000000e+00> : vector<4x8xf32>
    %169 = vector.multi_reduction <add>, %168, %cst_116 [2] : vector<4x8x8xf32> to vector<4x8xf32>
    %170 = vector.shape_cast %169 : vector<4x8xf32> to vector<4x8x1xf32>
    %171 = tpu.reciprocal %170 {approx = true} : vector<4x8x1xf32> -> vector<4x8x1xf32>
    %172 = vector.broadcast %171 : vector<4x8x1xf32> to vector<4x8x8xf32>
    %173 = arith.mulf %168, %172 : vector<4x8x8xf32>
    %174 = arith.truncf %173 : vector<4x8x8xf32> to vector<4x8x8xbf16>
    %175 = arith.truncf %158 : vector<4x8x8xf32> to vector<4x8x8xbf16>
    %cst_117 = arith.constant dense<0.000000e+00> : vector<4x8x8xf32>
    %176 = tpu.matmul %174, %175, %cst_117 {dimension_numbers = #tpu.dot_dimension_numbers<[2], [1], [1], [2], [0, 0, 0, 1, 1, 2], [0], [0]>} : vector<4x8x8xbf16>, vector<4x8x8xbf16>, vector<4x8x8xf32> -> vector<4x8x8xf32>
    %177 = arith.truncf %176 : vector<4x8x8xf32> to vector<4x8x8xbf16>
    %c1_118 = arith.constant 1 : index
    %c0_119 = arith.constant 0 : index
    %c0_120 = arith.constant 0 : index
    %c0_121 = arith.constant 0 : index
    %178 = vector.load %arg11[%c1_118, %c0_119, %c0_120, %c0_121] : memref<2x4x8x32xbf16, #tpu.memory_space<vmem>>, vector<1x4x8x32xbf16>
    %179 = vector.shape_cast %178 : vector<1x4x8x32xbf16> to vector<4x8x32xbf16>
    %cst_122 = arith.constant dense<0.000000e+00> : vector<4x8x32xf32>
    %180 = tpu.matmul %177, %179, %cst_122 {dimension_numbers = #tpu.dot_dimension_numbers<[2], [1], [1], [2], [0, 0, 0, 1, 1, 2], [0], [0]>} : vector<4x8x8xbf16>, vector<4x8x32xbf16>, vector<4x8x32xf32> -> vector<4x8x32xf32>
    %cst_123 = arith.constant dense<0.000000e+00> : vector<8x32xf32>
    %181 = vector.multi_reduction <add>, %180, %cst_123 [0] : vector<4x8x32xf32> to vector<8x32xf32>
    %c1_124 = arith.constant 1 : index
    %c0_125 = arith.constant 0 : index
    %c0_126 = arith.constant 0 : index
    %182 = vector.load %arg12[%c1_124, %c0_125, %c0_126] : memref<2x1x32xf32, #tpu.memory_space<vmem>>, vector<1x1x32xf32>
    %183 = vector.shape_cast %182 : vector<1x1x32xf32> to vector<1x32xf32>
    %184 = vector.broadcast %183 : vector<1x32xf32> to vector<8x32xf32>
    %185 = arith.addf %181, %184 : vector<8x32xf32>
    %186 = arith.addf %134, %185 : vector<8x32xf32>
    %c1_127 = arith.constant 1 : index
    %c0_128 = arith.constant 0 : index
    %c0_129 = arith.constant 0 : index
    %187 = vector.load %arg13[%c1_127, %c0_128, %c0_129] : memref<2x1x32xf32, #tpu.memory_space<vmem>>, vector<1x1x32xf32>
    %188 = vector.shape_cast %187 : vector<1x1x32xf32> to vector<1x32xf32>
    %c1_130 = arith.constant 1 : index
    %c0_131 = arith.constant 0 : index
    %c0_132 = arith.constant 0 : index
    %189 = vector.load %arg14[%c1_130, %c0_131, %c0_132] : memref<2x1x32xf32, #tpu.memory_space<vmem>>, vector<1x1x32xf32>
    %190 = vector.shape_cast %189 : vector<1x1x32xf32> to vector<1x32xf32>
    %cst_133 = arith.constant dense<0.000000e+00> : vector<8xf32>
    %191 = vector.multi_reduction <add>, %186, %cst_133 [1] : vector<8x32xf32> to vector<8xf32>
    %192 = vector.shape_cast %191 : vector<8xf32> to vector<8x1xf32>
    %cst_134 = arith.constant 3.200000e+01 : f32
    %193 = vector.broadcast %cst_134 : f32 to vector<8x1xf32>
    %194 = arith.divf %192, %193 : vector<8x1xf32>
    %195 = vector.broadcast %194 : vector<8x1xf32> to vector<8x32xf32>
    %196 = arith.subf %186, %195 : vector<8x32xf32>
    %197 = arith.mulf %196, %196 : vector<8x32xf32>
    %cst_135 = arith.constant dense<0.000000e+00> : vector<8xf32>
    %198 = vector.multi_reduction <add>, %197, %cst_135 [1] : vector<8x32xf32> to vector<8xf32>
    %199 = vector.shape_cast %198 : vector<8xf32> to vector<8x1xf32>
    %cst_136 = arith.constant 3.200000e+01 : f32
    %200 = vector.broadcast %cst_136 : f32 to vector<8x1xf32>
    %201 = arith.divf %199, %200 : vector<8x1xf32>
    %202 = vector.broadcast %194 : vector<8x1xf32> to vector<8x32xf32>
    %203 = arith.subf %186, %202 : vector<8x32xf32>
    %cst_137 = arith.constant 9.99999974E-6 : f32
    %204 = vector.broadcast %cst_137 : f32 to vector<8x1xf32>
    %205 = arith.addf %201, %204 : vector<8x1xf32>
    %206 = math.rsqrt %205 : vector<8x1xf32>
    %207 = vector.broadcast %206 : vector<8x1xf32> to vector<8x32xf32>
    %208 = arith.mulf %203, %207 : vector<8x32xf32>
    %209 = vector.broadcast %188 : vector<1x32xf32> to vector<8x32xf32>
    %210 = arith.mulf %208, %209 : vector<8x32xf32>
    %211 = vector.broadcast %190 : vector<1x32xf32> to vector<8x32xf32>
    %212 = arith.addf %210, %211 : vector<8x32xf32>
    %213 = arith.truncf %212 : vector<8x32xf32> to vector<8x32xbf16>
    %c1_138 = arith.constant 1 : index
    %c0_139 = arith.constant 0 : index
    %c0_140 = arith.constant 0 : index
    %214 = vector.load %arg15[%c1_138, %c0_139, %c0_140] : memref<2x32x2048xbf16, #tpu.memory_space<vmem>>, vector<1x32x2048xbf16>
    %215 = vector.shape_cast %214 : vector<1x32x2048xbf16> to vector<32x2048xbf16>
    %cst_141 = arith.constant dense<0.000000e+00> : vector<8x2048xf32>
    %216 = tpu.matmul %213, %215, %cst_141 {dimension_numbers = #tpu.dot_dimension_numbers<[1], [0], [0], [1], [0, 0, 1, 1], [], []>} : vector<8x32xbf16>, vector<32x2048xbf16>, vector<8x2048xf32> -> vector<8x2048xf32>
    %c1_142 = arith.constant 1 : index
    %c0_143 = arith.constant 0 : index
    %c0_144 = arith.constant 0 : index
    %217 = vector.load %arg16[%c1_142, %c0_143, %c0_144] : memref<2x1x2048xf32, #tpu.memory_space<vmem>>, vector<1x1x2048xf32>
    %218 = vector.shape_cast %217 : vector<1x1x2048xf32> to vector<1x2048xf32>
    %219 = vector.broadcast %218 : vector<1x2048xf32> to vector<8x2048xf32>
    %220 = arith.addf %216, %219 : vector<8x2048xf32>
    %cst_145 = arith.constant 0.000000e+00 : f32
    %221 = vector.broadcast %cst_145 : f32 to vector<8x2048xf32>
    %222 = arith.maximumf %220, %221 : vector<8x2048xf32>
    %223 = arith.truncf %222 : vector<8x2048xf32> to vector<8x2048xbf16>
    %c1_146 = arith.constant 1 : index
    %c0_147 = arith.constant 0 : index
    %c0_148 = arith.constant 0 : index
    %224 = vector.load %arg17[%c1_146, %c0_147, %c0_148] : memref<2x2048x32xbf16, #tpu.memory_space<vmem>>, vector<1x2048x32xbf16>
    %225 = vector.shape_cast %224 : vector<1x2048x32xbf16> to vector<2048x32xbf16>
    %cst_149 = arith.constant dense<0.000000e+00> : vector<8x32xf32>
    %226 = tpu.matmul %223, %225, %cst_149 {dimension_numbers = #tpu.dot_dimension_numbers<[1], [0], [0], [1], [0, 0, 1, 1], [], []>} : vector<8x2048xbf16>, vector<2048x32xbf16>, vector<8x32xf32> -> vector<8x32xf32>
    %c1_150 = arith.constant 1 : index
    %c0_151 = arith.constant 0 : index
    %c0_152 = arith.constant 0 : index
    %227 = vector.load %arg18[%c1_150, %c0_151, %c0_152] : memref<2x1x32xf32, #tpu.memory_space<vmem>>, vector<1x1x32xf32>
    %228 = vector.shape_cast %227 : vector<1x1x32xf32> to vector<1x32xf32>
    %229 = vector.broadcast %228 : vector<1x32xf32> to vector<8x32xf32>
    %230 = arith.addf %226, %229 : vector<8x32xf32>
    %231 = arith.addf %212, %230 : vector<8x32xf32>
    %c1_153 = arith.constant 1 : index
    %c0_154 = arith.constant 0 : index
    %c0_155 = arith.constant 0 : index
    %232 = vector.load %arg19[%c1_153, %c0_154, %c0_155] : memref<2x1x32xf32, #tpu.memory_space<vmem>>, vector<1x1x32xf32>
    %233 = vector.shape_cast %232 : vector<1x1x32xf32> to vector<1x32xf32>
    %c1_156 = arith.constant 1 : index
    %c0_157 = arith.constant 0 : index
    %c0_158 = arith.constant 0 : index
    %234 = vector.load %arg20[%c1_156, %c0_157, %c0_158] : memref<2x1x32xf32, #tpu.memory_space<vmem>>, vector<1x1x32xf32>
    %235 = vector.shape_cast %234 : vector<1x1x32xf32> to vector<1x32xf32>
    %cst_159 = arith.constant dense<0.000000e+00> : vector<8xf32>
    %236 = vector.multi_reduction <add>, %231, %cst_159 [1] : vector<8x32xf32> to vector<8xf32>
    %237 = vector.shape_cast %236 : vector<8xf32> to vector<8x1xf32>
    %cst_160 = arith.constant 3.200000e+01 : f32
    %238 = vector.broadcast %cst_160 : f32 to vector<8x1xf32>
    %239 = arith.divf %237, %238 : vector<8x1xf32>
    %240 = vector.broadcast %239 : vector<8x1xf32> to vector<8x32xf32>
    %241 = arith.subf %231, %240 : vector<8x32xf32>
    %242 = arith.mulf %241, %241 : vector<8x32xf32>
    %cst_161 = arith.constant dense<0.000000e+00> : vector<8xf32>
    %243 = vector.multi_reduction <add>, %242, %cst_161 [1] : vector<8x32xf32> to vector<8xf32>
    %244 = vector.shape_cast %243 : vector<8xf32> to vector<8x1xf32>
    %cst_162 = arith.constant 3.200000e+01 : f32
    %245 = vector.broadcast %cst_162 : f32 to vector<8x1xf32>
    %246 = arith.divf %244, %245 : vector<8x1xf32>
    %247 = vector.broadcast %239 : vector<8x1xf32> to vector<8x32xf32>
    %248 = arith.subf %231, %247 : vector<8x32xf32>
    %cst_163 = arith.constant 9.99999974E-6 : f32
    %249 = vector.broadcast %cst_163 : f32 to vector<8x1xf32>
    %250 = arith.addf %246, %249 : vector<8x1xf32>
    %251 = math.rsqrt %250 : vector<8x1xf32>
    %252 = vector.broadcast %251 : vector<8x1xf32> to vector<8x32xf32>
    %253 = arith.mulf %248, %252 : vector<8x32xf32>
    %254 = vector.broadcast %233 : vector<1x32xf32> to vector<8x32xf32>
    %255 = arith.mulf %253, %254 : vector<8x32xf32>
    %256 = vector.broadcast %235 : vector<1x32xf32> to vector<8x32xf32>
    %257 = arith.addf %255, %256 : vector<8x32xf32>
    %c0_164 = arith.constant 0 : index
    %c0_165 = arith.constant 0 : index
    %c0_166 = arith.constant 0 : index
    %258 = vector.load %arg21[%c0_164, %c0_165, %c0_166] : memref<1x8x32xf32, #tpu.memory_space<vmem>>, vector<1x8x32xf32>
    %259 = vector.shape_cast %258 : vector<1x8x32xf32> to vector<8x32xf32>
    %260 = vector.shape_cast %257 : vector<8x32xf32> to vector<1x8x32xf32>
    tpu.vector_store %arg21[%c0_164, %c0_165, %c0_166], %260 {strides = array<i32>} : memref<1x8x32xf32, #tpu.memory_space<vmem>>, vector<1x8x32xf32>,
    return
  }
  func.func @transform_0(%arg0: i32) -> (i32, i32, i32) {
    %c0_i32 = arith.constant 0 : i32
    %c0_i32_0 = arith.constant 0 : i32
    %c0_i32_1 = arith.constant 0 : i32
    return %arg0, %c0_i32, %c0_i32_0 : i32, i32, i32
  }
  func.func @transform_1(%arg0: i32) -> (i32, i32) {
    %c0_i32 = arith.constant 0 : i32
    %c0_i32_0 = arith.constant 0 : i32
    %c0_i32_1 = arith.constant 0 : i32
    return %c0_i32, %c0_i32_0 : i32, i32
  }
  func.func @transform_2(%arg0: i32) -> (i32, i32) {
    %c0_i32 = arith.constant 0 : i32
    %c0_i32_0 = arith.constant 0 : i32
    %c0_i32_1 = arith.constant 0 : i32
    return %c0_i32, %c0_i32_0 : i32, i32
  }
  func.func @transform_3(%arg0: i32) -> (i32, i32) {
    %c0_i32 = arith.constant 0 : i32
    %c0_i32_0 = arith.constant 0 : i32
    %c0_i32_1 = arith.constant 0 : i32
    return %c0_i32, %c0_i32_0 : i32, i32
  }
  func.func @transform_4(%arg0: i32) -> (i32, i32, i32, i32) {
    %c0_i32 = arith.constant 0 : i32
    %c0_i32_0 = arith.constant 0 : i32
    %c0_i32_1 = arith.constant 0 : i32
    %c0_i32_2 = arith.constant 0 : i32
    %c0_i32_3 = arith.constant 0 : i32
    return %c0_i32, %c0_i32_0, %c0_i32_1, %c0_i32_2 : i32, i32, i32, i32
  }
  func.func @transform_5(%arg0: i32) -> (i32, i32, i32, i32) {
    %c0_i32 = arith.constant 0 : i32
    %c0_i32_0 = arith.constant 0 : i32
    %c0_i32_1 = arith.constant 0 : i32
    %c0_i32_2 = arith.constant 0 : i32
    %c0_i32_3 = arith.constant 0 : i32
    return %c0_i32, %c0_i32_0, %c0_i32_1, %c0_i32_2 : i32, i32, i32, i32
  }
  func.func @transform_6(%arg0: i32) -> (i32, i32, i32, i32) {
    %c0_i32 = arith.constant 0 : i32
    %c0_i32_0 = arith.constant 0 : i32
    %c0_i32_1 = arith.constant 0 : i32
    %c0_i32_2 = arith.constant 0 : i32
    %c0_i32_3 = arith.constant 0 : i32
    return %c0_i32, %c0_i32_0, %c0_i32_1, %c0_i32_2 : i32, i32, i32, i32
  }
  func.func @transform_7(%arg0: i32) -> (i32, i32, i32, i32) {
    %c0_i32 = arith.constant 0 : i32
    %c0_i32_0 = arith.constant 0 : i32
    %c0_i32_1 = arith.constant 0 : i32
    %c0_i32_2 = arith.constant 0 : i32
    %c0_i32_3 = arith.constant 0 : i32
    return %c0_i32, %c0_i32_0, %c0_i32_1, %c0_i32_2 : i32, i32, i32, i32
  }
  func.func @transform_8(%arg0: i32) -> (i32, i32, i32, i32) {
    %c0_i32 = arith.constant 0 : i32
    %c0_i32_0 = arith.constant 0 : i32
    %c0_i32_1 = arith.constant 0 : i32
    %c0_i32_2 = arith.constant 0 : i32
    %c0_i32_3 = arith.constant 0 : i32
    return %c0_i32, %c0_i32_0, %c0_i32_1, %c0_i32_2 : i32, i32, i32, i32
  }
  func.func @transform_9(%arg0: i32) -> (i32, i32, i32, i32) {
    %c0_i32 = arith.constant 0 : i32
    %c0_i32_0 = arith.constant 0 : i32
    %c0_i32_1 = arith.constant 0 : i32
    %c0_i32_2 = arith.constant 0 : i32
    %c0_i32_3 = arith.constant 0 : i32
    return %c0_i32, %c0_i32_0, %c0_i32_1, %c0_i32_2 : i32, i32, i32, i32
  }
  func.func @transform_10(%arg0: i32) -> (i32, i32, i32, i32) {
    %c0_i32 = arith.constant 0 : i32
    %c0_i32_0 = arith.constant 0 : i32
    %c0_i32_1 = arith.constant 0 : i32
    %c0_i32_2 = arith.constant 0 : i32
    %c0_i32_3 = arith.constant 0 : i32
    return %c0_i32, %c0_i32_0, %c0_i32_1, %c0_i32_2 : i32, i32, i32, i32
  }
  func.func @transform_11(%arg0: i32) -> (i32, i32, i32) {
    %c0_i32 = arith.constant 0 : i32
    %c0_i32_0 = arith.constant 0 : i32
    %c0_i32_1 = arith.constant 0 : i32
    %c0_i32_2 = arith.constant 0 : i32
    return %c0_i32, %c0_i32_0, %c0_i32_1 : i32, i32, i32
  }
  func.func @transform_12(%arg0: i32) -> (i32, i32, i32) {
    %c0_i32 = arith.constant 0 : i32
    %c0_i32_0 = arith.constant 0 : i32
    %c0_i32_1 = arith.constant 0 : i32
    %c0_i32_2 = arith.constant 0 : i32
    return %c0_i32, %c0_i32_0, %c0_i32_1 : i32, i32, i32
  }
  func.func @transform_13(%arg0: i32) -> (i32, i32, i32) {
    %c0_i32 = arith.constant 0 : i32
    %c0_i32_0 = arith.constant 0 : i32
    %c0_i32_1 = arith.constant 0 : i32
    %c0_i32_2 = arith.constant 0 : i32
    return %c0_i32, %c0_i32_0, %c0_i32_1 : i32, i32, i32
  }
  func.func @transform_14(%arg0: i32) -> (i32, i32, i32) {
    %c0_i32 = arith.constant 0 : i32
    %c0_i32_0 = arith.constant 0 : i32
    %c0_i32_1 = arith.constant 0 : i32
    %c0_i32_2 = arith.constant 0 : i32
    return %c0_i32, %c0_i32_0, %c0_i32_1 : i32, i32, i32
  }
  func.func @transform_15(%arg0: i32) -> (i32, i32, i32) {
    %c0_i32 = arith.constant 0 : i32
    %c0_i32_0 = arith.constant 0 : i32
    %c0_i32_1 = arith.constant 0 : i32
    %c0_i32_2 = arith.constant 0 : i32
    return %c0_i32, %c0_i32_0, %c0_i32_1 : i32, i32, i32
  }
  func.func @transform_16(%arg0: i32) -> (i32, i32, i32) {
    %c0_i32 = arith.constant 0 : i32
    %c0_i32_0 = arith.constant 0 : i32
    %c0_i32_1 = arith.constant 0 : i32
    %c0_i32_2 = arith.constant 0 : i32
    return %c0_i32, %c0_i32_0, %c0_i32_1 : i32, i32, i32
  }
  func.func @transform_17(%arg0: i32) -> (i32, i32, i32) {
    %c0_i32 = arith.constant 0 : i32
    %c0_i32_0 = arith.constant 0 : i32
    %c0_i32_1 = arith.constant 0 : i32
    %c0_i32_2 = arith.constant 0 : i32
    return %c0_i32, %c0_i32_0, %c0_i32_1 : i32, i32, i32
  }
  func.func @transform_18(%arg0: i32) -> (i32, i32, i32) {
    %c0_i32 = arith.constant 0 : i32
    %c0_i32_0 = arith.constant 0 : i32
    %c0_i32_1 = arith.constant 0 : i32
    %c0_i32_2 = arith.constant 0 : i32
    return %c0_i32, %c0_i32_0, %c0_i32_1 : i32, i32, i32
  }
  func.func @transform_19(%arg0: i32) -> (i32, i32, i32) {
    %c0_i32 = arith.constant 0 : i32
    %c0_i32_0 = arith.constant 0 : i32
    %c0_i32_1 = arith.constant 0 : i32
    %c0_i32_2 = arith.constant 0 : i32
    return %c0_i32, %c0_i32_0, %c0_i32_1 : i32, i32, i32
  }
  func.func @transform_20(%arg0: i32) -> (i32, i32, i32) {
    %c0_i32 = arith.constant 0 : i32
    %c0_i32_0 = arith.constant 0 : i32
    %c0_i32_1 = arith.constant 0 : i32
    return %arg0, %c0_i32, %c0_i32_0 : i32, i32, i32
  }
}

</mosaic_0001>

<bundles_post_ra>
// kernel: tpu_custom_call.1
= control target key start
LH: loop header
LB: loop body
LE: loop exit
PB: predicated region body
PF: predicated region fallthrough
CT: control target
= control target key end

     0   :  { %s10098_s0 = inlined_call_operand.vmem [shape: f32[2,8,8], index: 0, kind: input, shape index: {}]   ;;  %s10099_s1 = inlined_call_operand.vmem [shape: f32[8,32], index: 1, kind: input, shape index: {}]   ;;  %s10100_s2 = inlined_call_operand.vmem [shape: bf16[8,32], index: 2, kind: input, shape index: {}]   ;;  %s10101_s3 = inlined_call_operand.vmem [shape: f32[1,32], index: 3, kind: input, shape index: {}]   ;;  %s10102_s4 = inlined_call_operand.vmem [shape: bf16[2,4,32,8], index: 4, kind: input, shape index: {}]   ;;  %s10103_s5 = inlined_call_operand.vmem [shape: f32[2,4,1,8], index: 5, kind: input, shape index: {}]   ;;  %s10104_s6 = inlined_call_operand.vmem [shape: bf16[2,4,32,8], index: 6, kind: input, shape index: {}]   ;;  %s10105_s7 = inlined_call_operand.vmem [shape: f32[2,4,1,8], index: 7, kind: input, shape index: {}]   ;;  %s10106_s8 = inlined_call_operand.vmem [shape: bf16[2,4,32,8], index: 8, kind: input, shape index: {}]   ;;  %s10107_s9 = inlined_call_operand.vmem [shape: f32[2,4,1,8], index: 9, kind: input, shape index: {}]   ;;  %s10108_s10 = inlined_call_operand.vmem [shape: bf16[2,4,8,32], index: 10, kind: input, shape index: {}]   ;;  %s10109_s11 = inlined_call_operand.vmem [shape: f32[2,1,32], index: 11, kind: input, shape index: {}]   ;;  %s10110_s12 = inlined_call_operand.vmem [shape: f32[2,1,32], index: 12, kind: input, shape index: {}]   ;;  %s10111_s13 = inlined_call_operand.vmem [shape: f32[2,1,32], index: 13, kind: input, shape index: {}]   ;;  %s10112_s14 = inlined_call_operand.vmem [shape: bf16[2,32,2048], index: 14, kind: input, shape index: {}]   ;;  %s10113_s15 = inlined_call_operand.vmem [shape: f32[2,1,2048], index: 15, kind: input, shape index: {}]   ;;  %s10114_s16 = inlined_call_operand.vmem [shape: bf16[2,2048,32], index: 16, kind: input, shape index: {}]   ;;  %s10115_s17 = inlined_call_operand.vmem [shape: f32[2,1,32], index: 17, kind: input, shape index: {}]   ;;  %s10116_s18 = inlined_call_operand.vmem [shape: f32[2,1,32], index: 18, kind: input, shape index: {}]   ;;  %s10117_s19 = inlined_call_operand.vmem [shape: f32[2,1,32], index: 19, kind: input, shape index: {}]   ;;  %s10118_s20 = inlined_call_operand.hbm [shape: f32[2,8,32], index: 20, kind: output, shape index: {}]  }
   0x1   :  { %10128 = sst [smem:[#allocation12_spill]] %s10098_s0 }
   0x2   :  { %10129 = sst [smem:[#allocation13_spill]] %s10099_s1 }
   0x3   :  { %10130 = sst [smem:[#allocation14_spill]] %s10100_s2 }
   0x4   :  { %10131 = sst [smem:[#allocation15_spill]] %s10101_s3 }
   0x5   :  { %10132 = sst [smem:[#allocation16_spill]] %s10102_s4 }
   0x6   :  { %10133 = sst [smem:[#allocation17_spill]] %s10103_s5 }
   0x7   :  { %10134 = sst [smem:[#allocation18_spill]] %s10104_s6 }
   0x8   :  { %25 = vsyncpa [#allocation3], 0 }
   0x9   :  { %27 = vsyncpa [#allocation3 + $0x1], 0  ;;  %s8309_s1 = smov 0   ;;  %s8311_s22 = smov 0  }
   0xa   :  { %s8313_s23 = smov 0   ;;  %s8315_s24 = smov 0  }
   0xb LB: > { %10135 = sst [smem:[#allocation5_spill]] %s8189_s1  ;;  %s8330_s2 = sadd.s32 4294967295, %s8201_s24   ;;  %s8201_s24 = sphi %s8315_s24, %s10155_s24   ;;  %s8197_s23 = sphi %s8313_s23, %s10157_s23   ;;  %s8193_s22 = sphi %s8311_s22, %s10159_s22   ;;  %s8189_s1 = sphi %s8309_s1, %s10158_s1  }
   0xc   : > { %10136 = sst [smem:[#allocation6_spill]] %s8197_s23  ;;  %s5729_s25 = sadd.s32 4294967294, %s8201_s24  }
   0xd   : > { %10137 = sst [smem:[#allocation7_spill]] %s8201_s24  ;;  %s8334_s3 = sadd.s32 1, %s8201_s24  }
   0xe   : > { %10138 = sst [smem:[#allocation8_spill]] %s8334_s3  ;;  %s465_s26 = sadd.s32 1, %s8197_s23 }
   0xf   : > { %s462_s27 = ssub.s32 %s8201_s24, %s8334_s3  ;;  %p475_p0 = scmp.ne.s32.totalorder %s8197_s23, %s8193_s22 }
  0x10   : > { %p463_p1 = scmp.eq.s32.totalorder %s462_s27, 0  ;;  %p476_p2 = scmp.eq.s32.totalorder %s8330_s2, 1 }
  0x11   : > { %p481_p3 = scmp.ne.s32.totalorder %s8193_s22, %s8189_s1  ;;  %p482_p4 = scmp.eq.s32.totalorder %s5729_s25, 1 }
  0x12   : > { %s8345_s28 = scalar_select %p463_p1, %s8197_s23, %s465_s26  }
  0x13   : > { %p8347_p5 = por %p476_p2, %p475_p0  ;;  %p8351_p6 = por %p482_p4, %p481_p3 }
  0x14   : > { %10139 = sst [smem:[#allocation9_spill]] %s8345_s28  ;;  %p5732_p7 = scmp.ge.s32.totalorder %s8201_s24, 1 }
  0x15   : > { %s10140_s4 = scalar_select %p8347_p5, 1, 0 }
  0x16   : > { %s10142_s29 = scalar_select %p8351_p6, 1, 0 }
  0x17   : > { %10141 = sst [smem:[#allocation10_spill]] %s10140_s4  ;;  %p564_p8 = scmp.lt.s32.totalorder %s8201_s24, 3 }
  0x18   : > { %10143 = sst [smem:[#allocation11_spill]] %s10142_s29 }
  0x19   : > { %p565_p9 = pnand %p5732_p7, %p564_p8 }
  0x1a   : > { %s10144_s21 = sld [smem:[#allocation14_spill]] (!%p565_p9)  ;;  %p621_p10 = scmp.lt.s32.totalorder (!%p565_p9), %s8330_s2, 1 }
  0x1b   : > { %568 = sbr.rel (%p565_p9) target bundleno = 3598 (0xe0e), region = 100  ;;  %s10145_s23 = sld [smem:[#allocation12_spill]] (!%p565_p9) }
  0x1c   : > { %s10146_s29 = sld [smem:[#allocation16_spill]] (!%p565_p9)  ;;  %s618_s24 = sand.u32 (!%p565_p9), 1, %s8193_s22  }
  0x1d   : > { %s10147_s6 = sld [smem:[#allocation18_spill]] (!%p565_p9)  ;;  %s5733_s4 = sshll.u32 (!%p565_p9), %s618_s24, 3 }
  0x1e   : > { %s10149_s30 = sld [smem:[#allocation13_spill]] (!%p565_p9)  ;;  %s7649_s0 = sshll.u32 (!%p565_p9), %s8330_s2, 3 }
  0x1f   : > { %s10150_s5 = sld [smem:[#allocation17_spill]] (!%p565_p9) }
  0x20   : > { %v628_v0 = vld [vmem:[%s10144_s21] sm:$0xf]  ;;  %vm637_vm0 = vcmask 1043456   ;;  %s622_s25 = scalar_select %p621_p10, %s8330_s2, 1  ;;  %vm633_vm1 = vcmask 64512   ;;  %vm702_vm2 = vcmask 261120  }
  0x21   : > { %v639_v1 = vsel %vm637_vm0, %v628_v0, 0  ;;  %v7669_v27 = vld [vmem:[%s10106_s8 + $0x8] sm:$0xff]  ;;  %v7671_v28 = vld [vmem:[%s10106_s8 + $0x18] sm:$0xff]  ;;  %v7668_v32 = vld [vmem:[%s10106_s8] sm:$0xff]  ;;  %s5655_s21 = scalar_lea.sflag [#allocation3], %s618_s24 }
  0x22   : > { %648 = vmatpush.bf16.msra.mxu0 %v639_v1  ;;  %s5734_s26 = sshll.u32 %s622_s25, 3  ;;  %v7653_v4 = vld [vmem:[%s10146_s29 + $0x8] sm:$0xff]  ;;  %v7655_v5 = vld [vmem:[%s10146_s29 + $0x18] sm:$0xff]  ;;  %v7652_v8 = vld [vmem:[%s10146_s29] sm:$0xff] }
  0x23   : > { %s624_s3 = scalar_lea.vmem %s10145_s23, %s5734_s26  ;;  %v7657_v6 = vld [vmem:[%s10146_s29 + $0x28] sm:$0xff]  ;;  %v7659_v7 = vld [vmem:[%s10146_s29 + $0x38] sm:$0xff]  ;;  %712 = vmatpush.bf16.msra.mxu1 %v7653_v4  ;;  %737 = vmatpush.bf16.msra.mxu2 %v7655_v5  ;;  %v7654_v9 = vld [vmem:[%s10146_s29 + $0x10] sm:$0xff]  ;;  %s10148_s26 = sld [smem:[#allocation15_spill]] }
  0x24   : > { %v626_v2 = vld [vmem:[%s624_s3] sm:$0xff]  ;;  %762 = vmatpush.bf16.msra.mxu3 %v7657_v6  ;;  %v7658_v11 = vld [vmem:[%s10146_s29 + $0x30] sm:$0xff]  ;;  %v7661_v12 = vld [vmem:[%s10147_s6 + $0x8] sm:$0xff]  ;;  %s5665_s3 = scalar_lea.hbm %s10118_s20, %s7649_s0 }
  0x25   : > { %v627_v3 = vpack.c.bf16 %v626_v2, %v626_v2  ;;  %v7656_v10 = vld [vmem:[%s10146_s29 + $0x20] sm:$0xff]  ;;  %v7663_v13 = vld [vmem:[%s10147_s6 + $0x18] sm:$0xff]  ;;  %v7665_v14 = vld [vmem:[%s10147_s6 + $0x28] sm:$0xff] }
  0x26   : > { %787 = vmatpush.bf16.msrb.mxu0 %v7659_v7  ;;  %v7667_v15 = vld [vmem:[%s10147_s6 + $0x38] sm:$0xff]  ;;  %v7660_v16 = vld [vmem:[%s10147_s6] sm:$0xff]  ;;  %v7662_v17 = vld [vmem:[%s10147_s6 + $0x10] sm:$0xff] }
  0x27   : > { %5735 = vmatmul.msk.bf16.vlgmr.msra.gmra.mxu0 %vm633_vm1, %v627_v3  ;;  %713 = vmatpush.bf16.msra.mxu1 %v7652_v8  ;;  %v7664_v18 = vld [vmem:[%s10147_s6 + $0x20] sm:$0xff]  ;;  %v7666_v19 = vld [vmem:[%s10147_s6 + $0x30] sm:$0xff]  ;;  %v7673_v30 = vld [vmem:[%s10106_s8 + $0x28] sm:$0xff] }
  0x28   : > { %738 = vmatpush.bf16.msra.mxu2 %v7654_v9  ;;  %763 = vmatpush.bf16.msra.mxu3 %v7656_v10  ;;  %v655_v23 = vld [vmem:[%s10149_s30] sm:$0xff]  ;;  %v7675_v31 = vld [vmem:[%s10106_s8 + $0x38] sm:$0xff]  ;;  %v7670_v33 = vld [vmem:[%s10106_s8 + $0x10] sm:$0xff]  ;;  %s620_s30 = scalar_lea.vmem [#allocation2], %s5733_s4  ;;  %s8159_s4 = scalar_lea.hbm %s10118_s20, 16 }
  0x29   : > { %v8060_v20 = vld [vmem:[%s10148_s26] ss:$0 sm:$0xff]  ;;  %v7674_v35 = vld [vmem:[%s10106_s8 + $0x30] sm:$0xff]  ;;  %v8066_v44 = vld [vmem:[%s10105_s7 + $0x3] ss:$0 sm:$0xff]  ;;  %s5667_s2 = sshll.u32 %s620_s30, 4  ;;  %s5668_s2 = int_to_ptr.vmem [resolvable:$true] %s5667_s2 }
  0x2a   : > { %788 = vmatpush.bf16.msrb.mxu0 %v7658_v11  ;;  %v7672_v34 = vld [vmem:[%s10106_s8 + $0x20] sm:$0xff] }
  0x2b   : > { %844 = vmatpush.bf16.msrb.mxu1 %v7661_v12  ;;  %v8065_v42 = vld [vmem:[%s10105_s7] ss:$0 sm:$0xff]  ;;  %v8067_v52 = vld [vmem:[%s10105_s7 + $0x1] ss:$0 sm:$0xff]  ;;  %v8062_v53 = vld [vmem:[%s10150_s5 + $0x3] ss:$0 sm:$0xff] }
  0x2c   : > { %869 = vmatpush.bf16.msrb.mxu2 %v7663_v13  ;;  %894 = vmatpush.bf16.msrb.mxu3 %v7665_v14  ;;  %v8061_v50 = vld [vmem:[%s10150_s5] ss:$0 sm:$0xff]  ;;  %v8068_v55 = vld [vmem:[%s10105_s7 + $0x2] ss:$0 sm:$0xff]  ;;  %v8063_v1 = vld [vmem:[%s10150_s5 + $0x1] ss:$0 sm:$0xff] }
  0x2d   : > { %v8064_v4 = vld [vmem:[%s10150_s5 + $0x2] ss:$0 sm:$0xff]  ;;  %v8069_v11 = vld [vmem:[%s10107_s9] ss:$0 sm:$0xff]  ;;  %v8070_v14 = vld [vmem:[%s10107_s9 + $0x3] ss:$0 sm:$0xff] }
  0x2e   : > { %919 = vmatpush.bf16.msra.mxu0 %v7667_v15 }
  0x2f   : > { %845 = vmatpush.bf16.msrb.mxu1 %v7660_v16 }
  0x30   : > { %870 = vmatpush.bf16.msrb.mxu2 %v7662_v17  ;;  %895 = vmatpush.bf16.msrb.mxu3 %v7664_v18 }
  0x32   : > { %920 = vmatpush.bf16.msra.mxu0 %v7666_v19 }
  0xa4   : > { %v650_v21 = vpop.f32.mrf.mxu0 }
  0xa5   : > { %v651_v22 = vadd.f32 %v8060_v20, %v650_v21 }
  0xa7   : > { %v654_v24 = vmul.f32 5.656854, %v651_v22 }
  0xa9   : > { %v8421_v25 = vadd.f32 %v655_v23, %v654_v24  ;;  %v8071_v23 = vld [vmem:[%s10107_s9 + $0x1] ss:$0 sm:$0xff] }
  0xab   : > { %v657_v26 = vpack.c.bf16 %v8421_v25, %v8421_v25 }
  0xac   : > { %v652_v29 = vpop.f32.mrf.mxu0 }
  0xad   : > { %5744 = vmatmul.msk.bf16.vlgmr.msra.gmra.mxu1 %vm702_vm2, %v657_v26  ;;  %5753 = vmatmul.msk.bf16.vlgmr.msra.gmra.mxu2 %vm702_vm2, %v657_v26 }
  0xae   : > { %5762 = vmatmul.msk.bf16.vlgmr.msra.gmra.mxu3 %vm702_vm2, %v657_v26  ;;  %5771 = vmatmul.msk.bf16.vlgmr.msrb.gmra.mxu0 %vm702_vm2, %v657_v26 }
  0xaf   : > { %976 = vmatpush.bf16.msra.mxu1 %v7669_v27  ;;  %1001 = vmatpush.bf16.msra.mxu2 %v7671_v28 }
  0xb0   : > { %1026 = vmatpush.bf16.msra.mxu3 %v7673_v30  ;;  %1051 = vmatpush.bf16.msrb.mxu0 %v7675_v31 }
  0xb3   : > { %977 = vmatpush.bf16.msra.mxu1 %v7668_v32  ;;  %1002 = vmatpush.bf16.msra.mxu2 %v7670_v33 }
  0xb4   : > { %1027 = vmatpush.bf16.msra.mxu3 %v7672_v34  ;;  %1052 = vmatpush.bf16.msrb.mxu0 %v7674_v35 }
  0xbd   : > { %5780 = vmatmul.msk.bf16.vlgmr.msrb.gmra.mxu1 %vm702_vm2, %v657_v26  ;;  %5789 = vmatmul.msk.bf16.vlgmr.msrb.gmra.mxu2 %vm702_vm2, %v657_v26 }
  0xbe   : > { %5798 = vmatmul.msk.bf16.vlgmr.msrb.gmra.mxu3 %vm702_vm2, %v657_v26  ;;  %5807 = vmatmul.msk.bf16.vlgmr.msra.gmra.mxu0 %vm702_vm2, %v657_v26 }
  0xcd   : > { %5816 = vmatmul.msk.bf16.vlgmr.msra.gmra.mxu1 %vm702_vm2, %v657_v26  ;;  %5825 = vmatmul.msk.bf16.vlgmr.msra.gmra.mxu2 %vm702_vm2, %v657_v26 }
  0xce   : > { %5834 = vmatmul.msk.bf16.vlgmr.msra.gmra.mxu3 %vm702_vm2, %v657_v26  ;;  %5843 = vmatmul.msk.bf16.vlgmr.msrb.gmra.mxu0 %vm702_vm2, %v657_v26  ;;  %v8072_v26 = vld [vmem:[%s10107_s9 + $0x2] ss:$0 sm:$0xff] }
 0x12a   : > { %v715_v36 = vpop.f32.mrf.mxu1 }
 0x12b   : > { %v790_v37 = vpop.f32.mrf.mxu0  ;;  %v716_v59 = vadd.f32 %v8061_v50, %v715_v36 }
 0x12c   : > { %v791_v62 = vadd.f32 %v8062_v53, %v790_v37 }
 0x12d   : > { %v1058_v6 = vpack.c.bf16 %v716_v59, %v716_v59 }
 0x12e   : > { %v1061_v8 = vpack.c.bf16 %v791_v62, %v791_v62 }
 0x130   : > { %v740_v38 = vpop.f32.mrf.mxu2 }
 0x131   : > { %v765_v39 = vpop.f32.mrf.mxu3  ;;  %v741_v10 = vadd.f32 %v8063_v1, %v740_v38 }
 0x132   : > { %v717_v40 = vpop.f32.mrf.mxu1  ;;  %v766_v12 = vadd.f32 %v8064_v4, %v765_v39 }
 0x133   : > { %v792_v41 = vpop.f32.mrf.mxu0  ;;  %v1059_v17 = vpack.c.bf16 %v741_v10, %v741_v10 }
 0x134   : > { %v1060_v20 = vpack.c.bf16 %v766_v12, %v766_v12 }
 0x138   : > { %v742_v43 = vpop.f32.mrf.mxu2 }
 0x139   : > { %v767_v45 = vpop.f32.mrf.mxu3 }
 0x13a   : > { %v847_v46 = vpop.f32.mrf.mxu1 }
 0x13b   : > { %v848_v47 = vadd.f32 %v8065_v42, %v847_v46  ;;  %v922_v48 = vpop.f32.mrf.mxu0 }
 0x13c   : > { %v923_v49 = vadd.f32 %v8066_v44, %v922_v48 }
 0x13d   : > { %v1062_v51 = vpack.c.bf16 %v848_v47, %v848_v47 }
 0x13e   : > { %v1065_v54 = vpack.c.bf16 %v923_v49, %v923_v49 }
 0x13f   : > { %v1070_v56 = vsel %vm633_vm1, %v1062_v51, 0 }
 0x140   : > { %v1127_v57 = vsel %vm633_vm1, %v1065_v54, 0  ;;  %v872_v58 = vpop.f32.mrf.mxu2  ;;  %1079 = vmatpush.bf16.xpose.msrb.mxu1 %v1070_v56 }
 0x141   : > { %v873_v60 = vadd.f32 %v8067_v52, %v872_v58  ;;  %v897_v61 = vpop.f32.mrf.mxu3  ;;  %1136 = vmatpush.bf16.xpose.msra.mxu0 %v1127_v57 }
 0x142   : > { %v898_v63 = vadd.f32 %v8068_v55, %v897_v61  ;;  %v849_v0 = vpop.f32.mrf.mxu1 }
 0x143   : > { %v1063_v2 = vpack.c.bf16 %v873_v60, %v873_v60  ;;  %v924_v3 = vpop.f32.mrf.mxu0 }
 0x144   : > { %v1064_v5 = vpack.c.bf16 %v898_v63, %v898_v63 }
 0x145   : > { %v1089_v7 = vsel %vm633_vm1, %v1063_v2, 0 }
 0x146   : > { %v1108_v9 = vsel %vm633_vm1, %v1064_v5, 0  ;;  %1098 = vmatpush.bf16.xpose.msrb.mxu2 %v1089_v7 }
 0x147   : > { %1117 = vmatpush.bf16.xpose.msrb.mxu3 %v1108_v9  ;;  %5844 = vmatmul.msk.bf16.vlgmr.msrb.gmra.mxu1 %vm633_vm1, %v1058_v6 }
 0x148   : > { %5847 = vmatmul.msk.bf16.vlgmr.msra.gmra.mxu0 %vm633_vm1, %v1061_v8  ;;  %v874_v13 = vpop.f32.mrf.mxu2 }
 0x149   : > { %v899_v15 = vpop.f32.mrf.mxu3 }
 0x14a   : > { %v979_v16 = vpop.f32.mrf.mxu1 }
 0x14b   : > { %v980_v18 = vadd.f32 %v8069_v11, %v979_v16  ;;  %v1054_v19 = vpop.f32.mrf.mxu0 }
 0x14c   : > { %v1055_v21 = vadd.f32 %v8070_v14, %v1054_v19 }
 0x14d   : > { %v1194_v22 = vpack.c.bf16 %v980_v18, %v980_v18  ;;  %5845 = vmatmul.msk.bf16.vlgmr.msrb.gmra.mxu2 %vm633_vm1, %v1059_v17 }
 0x14e   : > { %v1197_v24 = vpack.c.bf16 %v1055_v21, %v1055_v21  ;;  %5846 = vmatmul.msk.bf16.vlgmr.msrb.gmra.mxu3 %vm633_vm1, %v1060_v20 }
 0x14f   : > { %v1202_v27 = vsel %vm637_vm0, %v1194_v22, 0 }
 0x150   : > { %v1259_v28 = vsel %vm637_vm0, %v1197_v24, 0  ;;  %v1004_v29 = vpop.f32.mrf.mxu2  ;;  %1211 = vmatpush.bf16.msra.mxu1 %v1202_v27 }
 0x151   : > { %v1005_v30 = vadd.f32 %v8071_v23, %v1004_v29  ;;  %v1029_v31 = vpop.f32.mrf.mxu3  ;;  %1268 = vmatpush.bf16.msrb.mxu0 %v1259_v28 }
 0x152   : > { %v1030_v32 = vadd.f32 %v8072_v26, %v1029_v31  ;;  %v981_v33 = vpop.f32.mrf.mxu1 }
 0x153   : > { %v1195_v34 = vpack.c.bf16 %v1005_v30, %v1005_v30  ;;  %v1056_v35 = vpop.f32.mrf.mxu0  ;;  %v1278_v30 = vld [vmem:[%s10108_s10] sm:$0xf] }
 0x154   : > { %v1196_v36 = vpack.c.bf16 %v1030_v32, %v1030_v32  ;;  %v1286_v31 = vsel %vm637_vm0, %v1278_v30, 0  ;;  %v1281_v32 = vld [vmem:[%s10108_s10 + $0xc] sm:$0xf]  ;;  %v7684_v30 = vld [vmem:[%s10112_s14 + $0x3c] sm:$0xf0] }
 0x155   : > { %v1221_v37 = vsel %vm637_vm0, %v1195_v34, 0  ;;  %1295 = vmatpush.bf16.msrb.mxu1 %v1286_v31  ;;  %v1343_v33 = vsel %vm637_vm0, %v1281_v32, 0  ;;  %v1279_v34 = vld [vmem:[%s10108_s10 + $0x4] sm:$0xf] }
 0x156   : > { %v1240_v38 = vsel %vm637_vm0, %v1196_v36, 0  ;;  %1230 = vmatpush.bf16.msra.mxu2 %v1221_v37  ;;  %1352 = vmatpush.bf16.msra.mxu0 %v1343_v33  ;;  %v1305_v35 = vsel %vm637_vm0, %v1279_v34, 0  ;;  %v1280_v36 = vld [vmem:[%s10108_s10 + $0x8] sm:$0xf]  ;;  %v7676_v31 = vld [vmem:[%s10112_s14 + $0x4] sm:$0xf] }
 0x157   : > { %1249 = vmatpush.bf16.msra.mxu3 %v1240_v38  ;;  %v1324_v37 = vsel %vm637_vm0, %v1280_v36, 0  ;;  %v5860_v33 = vld [vmem:[%s10112_s14 + $0x40] sm:$0xf0]  ;;  %v5866_v34 = vld [vmem:[%s10112_s14 + $0x8] sm:$0xf] }
 0x158   : > { %v1006_v39 = vpop.f32.mrf.mxu2  ;;  %v5863_v36 = vor.u32 %v7676_v31, %v5860_v33  ;;  %v5892_v33 = vld [vmem:[%s10112_s14 + $0x60] sm:$0xf0] }
 0x159   : > { %v1031_v40 = vpop.f32.mrf.mxu3 }
 0x15a   : > { %1314 = vmatpush.bf16.msrb.mxu2 %v1305_v35  ;;  %v7685_v35 = vld [vmem:[%s10112_s14 + $0x44] sm:$0xf0] }
 0x15b   : > { %1333 = vmatpush.bf16.msrb.mxu3 %v1324_v37  ;;  %v5867_v37 = vor.u32 %v7685_v35, %v5866_v34  ;;  %v5898_v34 = vld [vmem:[%s10112_s14 + $0x28] sm:$0xf] }
 0x15c   : > { %v7689_v35 = vld [vmem:[%s10112_s14 + $0x64] sm:$0xf0] }
 0x1c4   : > { %v1081_v41 = vpop.f32.mrf.mxu1 }
 0x1c5   : > { %v1142_v42 = vmul.f32 0.35355338, %v1081_v41  ;;  %v1138_v43 = vpop.f32.mrf.mxu0 }
 0x1c6   : > { %v1145_v45 = vmul.f32 0.35355338, %v1138_v43 }
 0x1c7   : > { %v1146_v44 = vsel %vm633_vm1, %v1142_v42, -inf }
 0x1c8   : > { %1147 = vmax.xlane.f32.xlu1 %v1146_v44  ;;  %v1155_v48 = vsel %vm633_vm1, %v1145_v45, -inf }
 0x1cc   : > { %v1083_v46 = vpop.f32.mrf.mxu1 }
 0x1cd   : > { %v1140_v47 = vpop.f32.mrf.mxu0 }
 0x1d0   : > { %v1100_v49 = vpop.f32.mrf.mxu2  ;;  %1156 = vmax.xlane.f32.xlu1 %v1155_v48 }
 0x1d1   : > { %v1143_v50 = vmul.f32 0.35355338, %v1100_v49  ;;  %v1119_v51 = vpop.f32.mrf.mxu3 }
 0x1d2   : > { %v1144_v53 = vmul.f32 0.35355338, %v1119_v51 }
 0x1d3   : > { %v1149_v52 = vsel %vm633_vm1, %v1143_v50, -inf }
 0x1d4   : > { %1150 = vmax.xlane.f32.xlu0 %v1149_v52  ;;  %v1152_v56 = vsel %vm633_vm1, %v1144_v53, -inf }
 0x1d8   : > { %v1102_v54 = vpop.f32.mrf.mxu2 }
 0x1d9   : > { %v1121_v55 = vpop.f32.mrf.mxu3 }
 0x1dc   : > { %1153 = vmax.xlane.f32.xlu0 %v1152_v56 }
 0x23b   : > { %v1148_v57 = vpop.xlane.xlu1 %1147 }
 0x23c   : > { %v1158_v58 = vsub.f32 %v1142_v42, %v1148_v57 }
 0x23e   : > { %v1162_v59 = vmul.f32 1.442695, %v1158_v58 }
 0x240   : > { %8097 = vpow2.f32 %v1162_v59 }
 0x243   : > { %v1157_v60 = vpop.xlane.xlu1 %1156 }
 0x244   : > { %v1161_v61 = vsub.f32 %v1145_v45, %v1157_v60 }
 0x246   : > { %v8098_v62 = vpop.eup %8097  ;;  %v1168_v63 = vmul.f32 1.442695, %v1161_v61 }
 0x247   : > { %v1151_v0 = vpop.xlane.xlu0 %1150  ;;  %v1170_v1 = vsel %vm633_vm1, %v8098_v62, 0.0 }
 0x248   : > { %8099 = vpow2.f32 %v1168_v63  ;;  %v1159_v2 = vsub.f32 %v1143_v50, %v1151_v0  ;;  %1171 = vadd.xlane.f32.xlu0 %v1170_v1 }
 0x24a   : > { %v1164_v3 = vmul.f32 1.442695, %v1159_v2 }
 0x24c   : > { %8101 = vpow2.f32 %v1164_v3 }
 0x24e   : > { %v8100_v4 = vpop.eup %8099 }
 0x24f   : > { %v1154_v5 = vpop.xlane.xlu0 %1153  ;;  %v1179_v6 = vsel %vm633_vm1, %v8100_v4, 0.0 }
 0x250   : > { %v1160_v7 = vsub.f32 %v1144_v53, %v1154_v5  ;;  %1180 = vadd.xlane.f32.xlu1 %v1179_v6  ;;  %v8203_v5 = vmov 32.0  }
 0x252   : > { %v8102_v8 = vpop.eup %8101  ;;  %v1166_v9 = vmul.f32 1.442695, %v1160_v7 }
 0x253   : > { %v1173_v10 = vsel %vm633_vm1, %v8102_v8, 0.0 }
 0x254   : > { %8103 = vpow2.f32 %v1166_v9  ;;  %1174 = vadd.xlane.f32.xlu2 %v1173_v10 }
 0x25a   : > { %v8104_v11 = vpop.eup %8103 }
 0x25b   : > { %v1176_v12 = vsel %vm633_vm1, %v8104_v11, 0.0 }
 0x25c   : > { %1177 = vadd.xlane.f32.xlu2 %v1176_v12 }
 0x2bb   : > { %v1172_v13 = vpop.xlane.xlu0 %1171 }
 0x2bc   : > { %8105 = vrcp.f32 %v1172_v13 }
 0x2c2   : > { %v8106_v14 = vpop.eup %8105 }
 0x2c3   : > { %v1186_v15 = vmul.f32 %v8106_v14, %v8098_v62  ;;  %v1181_v16 = vpop.xlane.xlu1 %1180  ;;  %v8073_v62 = vld [vmem:[%s10109_s11] ss:$0 sm:$0xff] }
 0x2c4   : > { %8107 = vrcp.f32 %v1181_v16  ;;  %v5922_v16 = vld [vmem:[%s10112_s14 + $0x80] sm:$0xf] }
 0x2c5   : > { %v1190_v17 = vpack.c.bf16 %v1186_v15, %v1186_v15 }
 0x2c7   : > { %v1175_v18 = vpop.xlane.xlu2 %1174  ;;  %5848 = vmatmul.msk.bf16.vlgmr.msra.gmra.mxu1 %vm633_vm1, %v1190_v17  ;;  %v7700_v17 = vld [vmem:[%s10112_s14 + $0xbc] sm:$0xf0] }
 0x2c8   : > { %8109 = vrcp.f32 %v1175_v18  ;;  %v7692_v18 = vld [vmem:[%s10112_s14 + $0x84] sm:$0xf] }
 0x2ca   : > { %v8108_v19 = vpop.eup %8107 }
 0x2cb   : > { %v1189_v20 = vmul.f32 %v8108_v19, %v8100_v4  ;;  %v5923_v19 = vor.u32 %v7700_v17, %v5922_v16  ;;  %v5954_v16 = vld [vmem:[%s10112_s14 + $0xa0] sm:$0xf] }
 0x2cc   : > { %v7704_v17 = vld [vmem:[%s10112_s14 + $0xdc] sm:$0xf0] }
 0x2cd   : > { %v1193_v21 = vpack.c.bf16 %v1189_v20, %v1189_v20  ;;  %v5924_v20 = vld [vmem:[%s10112_s14 + $0xc0] sm:$0xf0]  ;;  %1648 = vmatpush.bf16.msra.mxu1 %v5923_v19 }
 0x2ce   : > { %v8110_v22 = vpop.eup %8109  ;;  %v5956_v19 = vld [vmem:[%s10112_s14 + $0xe0] sm:$0xf0] }
 0x2cf   : > { %v1187_v23 = vmul.f32 %v8110_v22, %v8102_v8  ;;  %v1178_v24 = vpop.xlane.xlu2 %1177  ;;  %5851 = vmatmul.msk.bf16.vlgmr.msrb.gmra.mxu0 %vm633_vm1, %v1193_v21  ;;  %v5930_v21 = vld [vmem:[%s10112_s14 + $0x88] sm:$0xf] }
 0x2d0   : > { %8111 = vrcp.f32 %v1178_v24  ;;  %v7701_v22 = vld [vmem:[%s10112_s14 + $0xc4] sm:$0xf0] }
 0x2d1   : > { %v1191_v26 = vpack.c.bf16 %v1187_v23, %v1187_v23  ;;  %8113 = vrcp.f32 %v8203_v5  ;;  %v5927_v23 = vor.u32 %v7692_v18, %v5924_v20  ;;  %v5931_v24 = vor.u32 %v7701_v22, %v5930_v21  ;;  %v7696_v18 = vld [vmem:[%s10112_s14 + $0xa4] sm:$0xf]  ;;  %v7705_v21 = vld [vmem:[%s10112_s14 + $0xe4] sm:$0xf0]  ;;  %v7697_v22 = vld [vmem:[%s10112_s14 + $0xac] sm:$0xf] }
 0x2d3   : > { %5849 = vmatmul.msk.bf16.vlgmr.msra.gmra.mxu2 %vm633_vm1, %v1191_v26  ;;  %v7693_v26 = vld [vmem:[%s10112_s14 + $0x8c] sm:$0xf] }
 0x2d4   : > { %1661 = vmatpush.bf16.msra.mxu2 %v5927_v23  ;;  %v5964_v23 = vld [vmem:[%s10112_s14 + $0xe8] sm:$0xf0] }
 0x2d5   : > { %v5967_v31 = vor.u32 %v7697_v22, %v5964_v23  ;;  %v7727_v22 = vld [vmem:[%s10114_s16 + $0x98] sm:$0xff]  ;;  %v7710_v23 = vld [vmem:[%s10114_s16 + $0x10] sm:$0xff] }
 0x2d6   : > { %v8112_v27 = vpop.eup %8111 }
 0x2d7   : > { %v1188_v28 = vmul.f32 %v8112_v27, %v8104_v11  ;;  %v8114_v6 = vpop.eup %8113  ;;  %v5932_v27 = vld [vmem:[%s10112_s14 + $0xc8] sm:$0xf0] }
 0x2d8   : > { %v1377_v7 = vmul.f32 32.0, %v8114_v6  ;;  %vm1381_vm3 = vweird.f32 %v8114_v6  ;;  %1662 = vmatpush.bf16.msra.mxu2 %v5863_v36  ;;  %v7681_v36 = vld [vmem:[%s10112_s14 + $0x2c] sm:$0xf] }
 0x2d9   : > { %v1192_v29 = vpack.c.bf16 %v1188_v28, %v1188_v28  ;;  %v5935_v28 = vor.u32 %v7693_v26, %v5932_v27  ;;  %v5955_v26 = vor.u32 %v7704_v17, %v5954_v16  ;;  %v5959_v27 = vor.u32 %v7696_v18, %v5956_v19  ;;  %v7736_v16 = vld [vmem:[%s10114_s16 + $0xe0] sm:$0xff]  ;;  %v7711_v19 = vld [vmem:[%s10114_s16 + $0x18] sm:$0xff] }
 0x2da   : > { %v1378_v8 = vsub.f32 1.0, %v1377_v7  ;;  %v7720_v17 = vld [vmem:[%s10114_s16 + $0x60] sm:$0xff] }
 0x2db   : > { %5850 = vmatmul.msk.bf16.vlgmr.msra.gmra.mxu3 %vm633_vm1, %v1192_v29  ;;  %v5858_v29 = vld [vmem:[%s10112_s14] sm:$0xf]  ;;  %1687 = vmatpush.bf16.msrb.mxu0 %v5935_v28 }
 0x2dc   : > { %v1379_v9 = vmul.f32 %v8114_v6, %v1378_v8  ;;  %1674 = vmatpush.bf16.msra.mxu3 %v5931_v24  ;;  %v5859_v32 = vor.u32 %v7684_v30, %v5858_v29  ;;  %v5890_v28 = vld [vmem:[%s10112_s14 + $0x20] sm:$0xf] }
 0x2dd   : > { %v7688_v29 = vld [vmem:[%s10112_s14 + $0x5c] sm:$0xf0] }
 0x2de   : > { %v1380_v10 = vadd.f32 %v8114_v6, %v1379_v9  ;;  %1649 = vmatpush.bf16.msra.mxu1 %v5859_v32  ;;  %v7680_v32 = vld [vmem:[%s10112_s14 + $0x24] sm:$0xf] }
 0x2df   : > { %v7728_v18 = vld [vmem:[%s10114_s16 + $0xa0] sm:$0xff] }
 0x2e0   : > { %v8550_v11 = vsel %vm1381_vm3, %v8114_v6, %v1380_v10  ;;  %1675 = vmatpush.bf16.msra.mxu3 %v5867_v37  ;;  %v8074_v10 = vld [vmem:[%s10110_s12] ss:$0 sm:$0xff]  ;;  %v5900_v37 = vld [vmem:[%s10112_s14 + $0x68] sm:$0xf0] }
 0x344   : > { %v1213_v38 = vpop.f32.mrf.mxu1 }
 0x345   : > { %v1274_v39 = vpack.c.bf16 %v1213_v38, %v1213_v38  ;;  %v7677_v38 = vld [vmem:[%s10112_s14 + $0xc] sm:$0xf] }
 0x347   : > { %5852 = vmatmul.msk.bf16.vlgmr.msrb.gmra.mxu1 %vm633_vm1, %v1274_v39  ;;  %v5868_v39 = vld [vmem:[%s10112_s14 + $0x48] sm:$0xf0] }
 0x34c   : > { %v1215_v40 = vpop.f32.mrf.mxu1  ;;  %v1270_v41 = vpop.f32.mrf.mxu0 }
 0x34d   : > { %v1277_v42 = vpack.c.bf16 %v1270_v41, %v1270_v41  ;;  %v5871_v40 = vor.u32 %v7677_v38, %v5868_v39  ;;  %v5891_v38 = vor.u32 %v7688_v29, %v5890_v28  ;;  %v5895_v39 = vor.u32 %v7680_v32, %v5892_v33  ;;  %v7709_v28 = vld [vmem:[%s10114_s16 + $0x8] sm:$0xff]  ;;  %v7708_v32 = vld [vmem:[%s10114_s16] sm:$0xff] }
 0x34e   : > { %v7733_v29 = vld [vmem:[%s10114_s16 + $0xc8] sm:$0xff]  ;;  %v7732_v33 = vld [vmem:[%s10114_s16 + $0xc0] sm:$0xff] }
 0x34f   : > { %5855 = vmatmul.msk.bf16.vlgmr.msra.gmra.mxu0 %vm633_vm1, %v1277_v42  ;;  %v5938_v42 = vld [vmem:[%s10112_s14 + $0x90] sm:$0xf] }
 0x350   : > { %1688 = vmatpush.bf16.msrb.mxu0 %v5871_v40  ;;  %v5899_v40 = vor.u32 %v7689_v35, %v5898_v34  ;;  %v7747_v34 = vld [vmem:[%s10114_s16 + $0x138] sm:$0xff] }
 0x351   : > { %v7771_v35 = vld [vmem:[%s10114_s16 + $0x1f8] sm:$0xff] }
 0x354   : > { %v1272_v43 = vpop.f32.mrf.mxu0 }
 0x355   : > { %v7702_v43 = vld [vmem:[%s10112_s14 + $0xcc] sm:$0xf0] }
 0x356   : > { %v1232_v44 = vpop.f32.mrf.mxu2 }
 0x357   : > { %v1275_v45 = vpack.c.bf16 %v1232_v44, %v1232_v44  ;;  %v7694_v44 = vld [vmem:[%s10112_s14 + $0x94] sm:$0xf] }
 0x359   : > { %5853 = vmatmul.msk.bf16.vlgmr.msrb.gmra.mxu2 %vm633_vm1, %v1275_v45 }
 0x35e   : > { %v1234_v46 = vpop.f32.mrf.mxu2  ;;  %v1251_v47 = vpop.f32.mrf.mxu3 }
 0x35f   : > { %v1276_v48 = vpack.c.bf16 %v1251_v47, %v1251_v47  ;;  %v5939_v46 = vor.u32 %v7702_v43, %v5938_v42  ;;  %v5940_v47 = vld [vmem:[%s10112_s14 + $0xd0] sm:$0xf0]  ;;  %v5970_v42 = vld [vmem:[%s10112_s14 + $0xb0] sm:$0xf] }
 0x360   : > { %v7706_v43 = vld [vmem:[%s10112_s14 + $0xec] sm:$0xf0] }
 0x361   : > { %5854 = vmatmul.msk.bf16.vlgmr.msrb.gmra.mxu3 %vm633_vm1, %v1276_v48  ;;  %v5946_v48 = vld [vmem:[%s10112_s14 + $0x98] sm:$0xf]  ;;  %1700 = vmatpush.bf16.msrb.mxu1 %v5939_v46 }
 0x362   : > { %v5978_v46 = vld [vmem:[%s10112_s14 + $0xb8] sm:$0xf] }
 0x366   : > { %v1253_v49 = vpop.f32.mrf.mxu3 }
 0x367   : > { %v7703_v49 = vld [vmem:[%s10112_s14 + $0xd4] sm:$0xf0] }
 0x3c4   : > { %v1297_v50 = vpop.f32.mrf.mxu1 }
 0x3c5   : > { %v1358_v56 = vsel %vm702_vm2, %v1297_v50, 0.0  ;;  %v5943_v50 = vor.u32 %v7694_v44, %v5940_v47  ;;  %v7698_v44 = vld [vmem:[%s10112_s14 + $0xb4] sm:$0xf]  ;;  %v7707_v47 = vld [vmem:[%s10112_s14 + $0xf4] sm:$0xf0] }
 0x3c7   : > { %1713 = vmatpush.bf16.msrb.mxu2 %v5943_v50  ;;  %v5971_v50 = vor.u32 %v7706_v43, %v5970_v42  ;;  %v7754_v42 = vld [vmem:[%s10114_s16 + $0x170] sm:$0xff] }
 0x3c8   : > { %v7762_v43 = vld [vmem:[%s10114_s16 + $0x1b0] sm:$0xff] }
 0x3cc   : > { %v1299_v51 = vpop.f32.mrf.mxu1  ;;  %v1354_v52 = vpop.f32.mrf.mxu0 }
 0x3cd   : > { %v1363_v63 = vsel %vm702_vm2, %v1354_v52, 0.0  ;;  %v5947_v51 = vor.u32 %v7703_v49, %v5946_v48  ;;  %v7695_v52 = vld [vmem:[%s10112_s14 + $0x9c] sm:$0xf] }
 0x3ce   : > { %v7699_v48 = vld [vmem:[%s10112_s14 + $0xbc] sm:$0xf] }
 0x3cf   : > { %1726 = vmatpush.bf16.msrb.mxu3 %v5947_v51  ;;  %v5980_v49 = vld [vmem:[%s10112_s14 + $0xf8] sm:$0xf0] }
 0x3d4   : > { %v1356_v53 = vpop.f32.mrf.mxu0 }
 0x3d5   : > { %v5948_v53 = vld [vmem:[%s10112_s14 + $0xd8] sm:$0xf0] }
 0x3dc   : > { %v1316_v54 = vpop.f32.mrf.mxu2 }
 0x3dd   : > { %v1359_v55 = vsel %vm702_vm2, %v1316_v54, 0.0  ;;  %v5874_v54 = vld [vmem:[%s10112_s14 + $0x10] sm:$0xf] }
 0x3de   : > { %v1360_v57 = vadd.f32 %v1359_v55, %v1358_v56  ;;  %v5951_v56 = vor.u32 %v7695_v52, %v5948_v53  ;;  %v5906_v52 = vld [vmem:[%s10112_s14 + $0x30] sm:$0xf] }
 0x3df   : > { %v7690_v53 = vld [vmem:[%s10112_s14 + $0x6c] sm:$0xf0] }
 0x3e0   : > { %1739 = vmatpush.bf16.msra.mxu0 %v5951_v56  ;;  %v7682_v56 = vld [vmem:[%s10112_s14 + $0x34] sm:$0xf] }
 0x3e4   : > { %v1318_v58 = vpop.f32.mrf.mxu2  ;;  %v1335_v59 = vpop.f32.mrf.mxu3 }
 0x3e5   : > { %v1361_v60 = vsel %vm702_vm2, %v1335_v59, 0.0  ;;  %v7678_v58 = vld [vmem:[%s10112_s14 + $0x14] sm:$0xf] }
 0x3e6   : > { %v1362_v61 = vadd.f32 %v1361_v60, %v1360_v57  ;;  %v7686_v57 = vld [vmem:[%s10112_s14 + $0x4c] sm:$0xf0]  ;;  %v5876_v60 = vld [vmem:[%s10112_s14 + $0x50] sm:$0xf0] }
 0x3e7   : > { %v5875_v59 = vor.u32 %v7686_v57, %v5874_v54  ;;  %v5979_v54 = vor.u32 %v7707_v47, %v5978_v46  ;;  %v5908_v57 = vld [vmem:[%s10112_s14 + $0x70] sm:$0xf0]  ;;  %v7753_v46 = vld [vmem:[%s10114_s16 + $0x168] sm:$0xff] }
 0x3e8   : > { %v1364_v0 = vadd.f32 %v1363_v63, %v1362_v61  ;;  %v5882_v61 = vld [vmem:[%s10112_s14 + $0x18] sm:$0xf]  ;;  %v5879_v63 = vor.u32 %v7678_v58, %v5876_v60  ;;  %v7683_v60 = vld [vmem:[%s10112_s14 + $0x3c] sm:$0xf]  ;;  %v7761_v47 = vld [vmem:[%s10114_s16 + $0x1a8] sm:$0xff] }
 0x3e9   : > { %1701 = vmatpush.bf16.msrb.mxu1 %v5875_v59  ;;  %v5914_v58 = vld [vmem:[%s10112_s14 + $0x38] sm:$0xf] }
 0x3ea   : > { %v1369_v1 = vadd.f32 %v8073_v62, %v1364_v0  ;;  %v7687_v62 = vld [vmem:[%s10112_s14 + $0x54] sm:$0xf0]  ;;  %1714 = vmatpush.bf16.msrb.mxu2 %v5879_v63  ;;  %v5911_v63 = vor.u32 %v7682_v56, %v5908_v57 }
 0x3eb   : > { %v5883_v0 = vor.u32 %v7687_v62, %v5882_v61  ;;  %v7691_v59 = vld [vmem:[%s10112_s14 + $0x74] sm:$0xf0]  ;;  %v5916_v61 = vld [vmem:[%s10112_s14 + $0x78] sm:$0xf0]  ;;  %v5907_v62 = vor.u32 %v7690_v53, %v5906_v52 }
 0x3ec   : > { %v1337_v2 = vpop.f32.mrf.mxu3  ;;  %v1370_v3 = vadd.f32 %v1369_v1, %v8421_v25  ;;  %v7679_v1 = vld [vmem:[%s10112_s14 + $0x1c] sm:$0xf] }
 0x3ed   : > { %v5884_v2 = vld [vmem:[%s10112_s14 + $0x58] sm:$0xf0]  ;;  %1727 = vmatpush.bf16.msrb.mxu3 %v5883_v0  ;;  %v5915_v0 = vor.u32 %v7691_v59, %v5914_v58  ;;  %v7741_v58 = vld [vmem:[%s10114_s16 + $0x108] sm:$0xff] }
 0x3ee   : > { %v1373_v4 = vsel %vm702_vm2, %v1370_v3, 0.0  ;;  %v7743_v52 = vld [vmem:[%s10114_s16 + $0x118] sm:$0xff]  ;;  %v7765_v59 = vld [vmem:[%s10114_s16 + $0x1c8] sm:$0xff] }
 0x3ef   : > { %1374 = vadd.xlane.f32.xlu2 %v1373_v4  ;;  %v7767_v53 = vld [vmem:[%s10114_s16 + $0x1d8] sm:$0xff] }
 0x3f0   : > { %v7751_v56 = vld [vmem:[%s10114_s16 + $0x158] sm:$0xff] }
 0x3f1   : > { %v7759_v57 = vld [vmem:[%s10114_s16 + $0x198] sm:$0xff] }
 0x462   : > { %v1375_v12 = vpop.xlane.xlu2 %1374 }
 0x463   : > { %v1383_v13 = vmul.f32 %v8550_v11, %v1375_v12 }
 0x465   : > { %v8553_v14 = vsub.f32 %v1370_v3, %v1383_v13  ;;  %v5887_v3 = vor.u32 %v7679_v1, %v5884_v2  ;;  %v8075_v13 = vld [vmem:[%s10111_s13] ss:$0 sm:$0xff]  ;;  %v5919_v1 = vor.u32 %v7683_v60, %v5916_v61  ;;  %v7715_v2 = vld [vmem:[%s10114_s16 + $0x38] sm:$0xff]  ;;  %v7750_v60 = vld [vmem:[%s10114_s16 + $0x150] sm:$0xff] }
 0x466   : > { %v7758_v61 = vld [vmem:[%s10114_s16 + $0x190] sm:$0xff] }
 0x467   : > { %v1385_v25 = vmul.f32 %v8553_v14, %v8553_v14  ;;  %1740 = vmatpush.bf16.msra.mxu0 %v5887_v3  ;;  %v7739_v3 = vld [vmem:[%s10114_s16 + $0xf8] sm:$0xff] }
 0x469   : > { %v1386_v15 = vsel %vm702_vm2, %v1385_v25, 0.0 }
 0x46a   : > { %1387 = vadd.xlane.f32.xlu0 %v1386_v15 }
 0x4dd   : > { %v1388_v41 = vpop.xlane.xlu0 %1387 }
 0x4de   : > { %v1389_v45 = vmul.f32 %v1388_v41, %v8550_v11  ;;  %v5903_v41 = vor.u32 %v7681_v36, %v5900_v37  ;;  %v7716_v36 = vld [vmem:[%s10114_s16 + $0x40] sm:$0xff] }
 0x4df   : > { %v7724_v37 = vld [vmem:[%s10114_s16 + $0x80] sm:$0xff] }
 0x4e0   : > { %v1390_v55 = vadd.f32 1e-05, %v1389_v45  ;;  %v5972_v45 = vld [vmem:[%s10112_s14 + $0xf0] sm:$0xf0] }
 0x4e1   : > { %v5975_v51 = vor.u32 %v7698_v44, %v5972_v45  ;;  %v7745_v44 = vld [vmem:[%s10114_s16 + $0x128] sm:$0xff] }
 0x4e2   : > { %8115 = vrsqrt.f32 %v1390_v55  ;;  %vm1397_vm5 = vweird.f32 %v1390_v55  ;;  %v7769_v45 = vld [vmem:[%s10114_s16 + $0x1e8] sm:$0xff] }
 0x4e8   : > { %v8116_v4 = vpop.eup %8115 }
 0x4e9   : > { %v1392_v5 = vmul.f32 %v8116_v4, %v1390_v55  ;;  %vm1398_vm4 = vweird.f32 %v8116_v4  ;;  %v5983_v55 = vor.u32 %v7699_v48, %v5980_v49  ;;  %v7744_v48 = vld [vmem:[%s10114_s16 + $0x120] sm:$0xff] }
 0x4ea   : > { %vm1399_vm6 = vmor %vm1397_vm5, %vm1398_vm4  ;;  %v7768_v49 = vld [vmem:[%s10114_s16 + $0x1e0] sm:$0xff] }
 0x4eb   : > { %v1393_v6 = vmul.f32 %v8116_v4, %v1392_v5  ;;  %v7731_v5 = vld [vmem:[%s10114_s16 + $0xb8] sm:$0xff] }
 0x4ed   : > { %v1394_v7 = vmul.f32 0.5, %v1393_v6  ;;  %v7714_v6 = vld [vmem:[%s10114_s16 + $0x30] sm:$0xff] }
 0x4ef   : > { %v1395_v8 = vsub.f32 1.5, %v1394_v7  ;;  %v7738_v7 = vld [vmem:[%s10114_s16 + $0xf0] sm:$0xff] }
 0x4f1   : > { %v1396_v9 = vmul.f32 %v8116_v4, %v1395_v8  ;;  %v7722_v8 = vld [vmem:[%s10114_s16 + $0x70] sm:$0xff] }
 0x4f3   : > { %v1400_v12 = vsel %vm1399_vm6, %v8116_v4, %v1396_v9  ;;  %v7723_v4 = vld [vmem:[%s10114_s16 + $0x78] sm:$0xff]  ;;  %v7730_v9 = vld [vmem:[%s10114_s16 + $0xb0] sm:$0xff] }
 0x4f4   : > { %v1401_v25 = vmul.f32 %v1400_v12, %v8553_v14  ;;  %v5962_v14 = vld [vmem:[%s10112_s14 + $0xa8] sm:$0xf] }
 0x4f5   : > { %v5963_v30 = vor.u32 %v7705_v21, %v5962_v14  ;;  %v7737_v12 = vld [vmem:[%s10114_s16 + $0xe8] sm:$0xff]  ;;  %v7735_v14 = vld [vmem:[%s10114_s16 + $0xd8] sm:$0xff] }
 0x4f6   : > { %v1405_v15 = vmul.f32 %v8074_v10, %v1401_v25  ;;  %v7713_v10 = vld [vmem:[%s10114_s16 + $0x28] sm:$0xff]  ;;  %v7719_v21 = vld [vmem:[%s10114_s16 + $0x58] sm:$0xff] }
 0x4f7   : > { %v7729_v25 = vld [vmem:[%s10114_s16 + $0xa8] sm:$0xff] }
 0x4f8   : > { %v8677_v20 = vadd.f32 %v8075_v13, %v1405_v15  ;;  %v7721_v13 = vld [vmem:[%s10114_s16 + $0x68] sm:$0xff]  ;;  %v7712_v15 = vld [vmem:[%s10114_s16 + $0x20] sm:$0xff] }
 0x4fa   : > { %v8690_v24 = vpack.c.bf16 %v8677_v20, %v8677_v20 }
 0x4fc   : > { %5984 = vmatmul.msk.bf16.vlgmr.msra.gmra.mxu1 %vm702_vm2, %v8690_v24  ;;  %5985 = vmatmul.msk.bf16.vlgmr.msra.gmra.mxu2 %vm702_vm2, %v8690_v24 }
 0x4fd   : > { %5986 = vmatmul.msk.bf16.vlgmr.msra.gmra.mxu3 %vm702_vm2, %v8690_v24  ;;  %5987 = vmatmul.msk.bf16.vlgmr.msrb.gmra.mxu0 %vm702_vm2, %v8690_v24 }
 0x4fe   : > { %1752 = vmatpush.bf16.msra.mxu1 %v5955_v26  ;;  %1765 = vmatpush.bf16.msra.mxu2 %v5959_v27  ;;  %v7734_v26 = vld [vmem:[%s10114_s16 + $0xd0] sm:$0xff] }
 0x4ff   : > { %1778 = vmatpush.bf16.msra.mxu3 %v5963_v30  ;;  %1791 = vmatpush.bf16.msrb.mxu0 %v5967_v31  ;;  %v7718_v27 = vld [vmem:[%s10114_s16 + $0x50] sm:$0xff]  ;;  %v7717_v30 = vld [vmem:[%s10114_s16 + $0x48] sm:$0xff] }
 0x500   : > { %v7725_v31 = vld [vmem:[%s10114_s16 + $0x88] sm:$0xff] }
 0x502   : > { %1753 = vmatpush.bf16.msra.mxu1 %v5891_v38  ;;  %1766 = vmatpush.bf16.msra.mxu2 %v5895_v39  ;;  %v7755_v38 = vld [vmem:[%s10114_s16 + $0x178] sm:$0xff] }
 0x503   : > { %1779 = vmatpush.bf16.msra.mxu3 %v5899_v40  ;;  %1792 = vmatpush.bf16.msrb.mxu0 %v5903_v41  ;;  %v7763_v39 = vld [vmem:[%s10114_s16 + $0x1b8] sm:$0xff]  ;;  %v7746_v40 = vld [vmem:[%s10114_s16 + $0x130] sm:$0xff] }
 0x504   : > { %v7770_v41 = vld [vmem:[%s10114_s16 + $0x1f0] sm:$0xff] }
 0x50c   : > { %5988 = vmatmul.msk.bf16.vlgmr.msrb.gmra.mxu1 %vm702_vm2, %v8690_v24  ;;  %5989 = vmatmul.msk.bf16.vlgmr.msrb.gmra.mxu2 %vm702_vm2, %v8690_v24 }
 0x50d   : > { %5990 = vmatmul.msk.bf16.vlgmr.msrb.gmra.mxu3 %vm702_vm2, %v8690_v24  ;;  %5991 = vmatmul.msk.bf16.vlgmr.msra.gmra.mxu0 %vm702_vm2, %v8690_v24 }
 0x50e   : > { %1804 = vmatpush.bf16.msrb.mxu1 %v5971_v50  ;;  %1817 = vmatpush.bf16.msrb.mxu2 %v5975_v51  ;;  %v7752_v50 = vld [vmem:[%s10114_s16 + $0x160] sm:$0xff] }
 0x50f   : > { %1830 = vmatpush.bf16.msrb.mxu3 %v5979_v54  ;;  %1843 = vmatpush.bf16.msra.mxu0 %v5983_v55  ;;  %v7760_v51 = vld [vmem:[%s10114_s16 + $0x1a0] sm:$0xff]  ;;  %v7742_v54 = vld [vmem:[%s10114_s16 + $0x110] sm:$0xff] }
 0x510   : > { %v7766_v55 = vld [vmem:[%s10114_s16 + $0x1d0] sm:$0xff] }
 0x512   : > { %1805 = vmatpush.bf16.msrb.mxu1 %v5907_v62  ;;  %1818 = vmatpush.bf16.msrb.mxu2 %v5911_v63  ;;  %v7740_v62 = vld [vmem:[%s10114_s16 + $0x100] sm:$0xff] }
 0x513   : > { %1831 = vmatpush.bf16.msrb.mxu3 %v5915_v0  ;;  %1844 = vmatpush.bf16.msra.mxu0 %v5919_v1  ;;  %v7764_v63 = vld [vmem:[%s10114_s16 + $0x1c0] sm:$0xff]  ;;  %v7749_v0 = vld [vmem:[%s10114_s16 + $0x148] sm:$0xff] }
 0x514   : > { %v7757_v1 = vld [vmem:[%s10114_s16 + $0x188] sm:$0xff] }
 0x51c   : > { %5992 = vmatmul.msk.bf16.vlgmr.msra.gmra.mxu1 %vm702_vm2, %v8690_v24  ;;  %5993 = vmatmul.msk.bf16.vlgmr.msra.gmra.mxu2 %vm702_vm2, %v8690_v24 }
 0x51d   : > { %5994 = vmatmul.msk.bf16.vlgmr.msra.gmra.mxu3 %vm702_vm2, %v8690_v24  ;;  %5995 = vmatmul.msk.bf16.vlgmr.msrb.gmra.mxu0 %vm702_vm2, %v8690_v24 }
 0x51e   : > { %2910 = vmatpush.bf16.msra.mxu1 %v7715_v2  ;;  %2949 = vmatpush.bf16.msrb.mxu0 %v7739_v3  ;;  %v7748_v2 = vld [vmem:[%s10114_s16 + $0x140] sm:$0xff] }
 0x51f   : > { %2923 = vmatpush.bf16.msra.mxu2 %v7723_v4  ;;  %2936 = vmatpush.bf16.msra.mxu3 %v7731_v5  ;;  %v7756_v3 = vld [vmem:[%s10114_s16 + $0x180] sm:$0xff] }
 0x520   : > { %v8991_v4 = vld [vmem:[%s10113_s15] sm:$0xff] }
 0x521   : > { %v1447_v5 = vperm.slane %v8991_v4, 0 }
 0x522   : > { %2911 = vmatpush.bf16.msra.mxu1 %v7714_v6  ;;  %2950 = vmatpush.bf16.msrb.mxu0 %v7738_v7  ;;  %v1450_v6 = vperm.slane %v8991_v4, 3 }
 0x523   : > { %2924 = vmatpush.bf16.msra.mxu2 %v7722_v8  ;;  %2937 = vmatpush.bf16.msra.mxu3 %v7730_v9 }
 0x526   : > { %2912 = vmatpush.bf16.msra.mxu1 %v7713_v10  ;;  %2951 = vmatpush.bf16.msrb.mxu0 %v7737_v12 }
 0x527   : > { %2925 = vmatpush.bf16.msra.mxu2 %v7721_v13  ;;  %2938 = vmatpush.bf16.msra.mxu3 %v7729_v25  ;;  %v1448_v13 = vperm.slane %v8991_v4, 1 }
 0x52a   : > { %2913 = vmatpush.bf16.msra.mxu1 %v7712_v15  ;;  %2952 = vmatpush.bf16.msrb.mxu0 %v7736_v16  ;;  %v1449_v15 = vperm.slane %v8991_v4, 2  ;;  %v7779_v16 = vld [vmem:[%s10114_s16 + $0x238] sm:$0xff] }
 0x52b   : > { %2926 = vmatpush.bf16.msra.mxu2 %v7720_v17  ;;  %2939 = vmatpush.bf16.msra.mxu3 %v7728_v18  ;;  %v7803_v18 = vld [vmem:[%s10114_s16 + $0x2f8] sm:$0xff] }
 0x52c   : > { %5996 = vmatmul.msk.bf16.vlgmr.msrb.gmra.mxu1 %vm702_vm2, %v8690_v24  ;;  %5997 = vmatmul.msk.bf16.vlgmr.msrb.gmra.mxu2 %vm702_vm2, %v8690_v24 }
 0x52d   : > { %5998 = vmatmul.msk.bf16.vlgmr.msrb.gmra.mxu3 %vm702_vm2, %v8690_v24  ;;  %5999 = vmatmul.msk.bf16.vlgmr.msra.gmra.mxu0 %vm702_vm2, %v8690_v24  ;;  %v7726_v24 = vld [vmem:[%s10114_s16 + $0x90] sm:$0xff] }
 0x52e   : > { %2914 = vmatpush.bf16.msra.mxu1 %v7711_v19  ;;  %2953 = vmatpush.bf16.msrb.mxu0 %v7735_v14 }
 0x52f   : > { %2927 = vmatpush.bf16.msra.mxu2 %v7719_v21  ;;  %2940 = vmatpush.bf16.msra.mxu3 %v7727_v22 }
 0x532   : > { %2915 = vmatpush.bf16.msra.mxu1 %v7710_v23  ;;  %2954 = vmatpush.bf16.msrb.mxu0 %v7734_v26 }
 0x533   : > { %2928 = vmatpush.bf16.msra.mxu2 %v7718_v27  ;;  %2941 = vmatpush.bf16.msra.mxu3 %v7726_v24  ;;  %v7778_v27 = vld [vmem:[%s10114_s16 + $0x230] sm:$0xff] }
 0x536   : > { %2916 = vmatpush.bf16.msra.mxu1 %v7709_v28  ;;  %2955 = vmatpush.bf16.msrb.mxu0 %v7733_v29  ;;  %v7802_v29 = vld [vmem:[%s10114_s16 + $0x2f0] sm:$0xff] }
 0x537   : > { %2929 = vmatpush.bf16.msra.mxu2 %v7717_v30  ;;  %2942 = vmatpush.bf16.msra.mxu3 %v7725_v31  ;;  %v7787_v31 = vld [vmem:[%s10114_s16 + $0x278] sm:$0xff] }
 0x53a   : > { %2917 = vmatpush.bf16.msra.mxu1 %v7708_v32  ;;  %2956 = vmatpush.bf16.msrb.mxu0 %v7732_v33  ;;  %v7795_v33 = vld [vmem:[%s10114_s16 + $0x2b8] sm:$0xff] }
 0x53b   : > { %2930 = vmatpush.bf16.msra.mxu2 %v7716_v36  ;;  %2943 = vmatpush.bf16.msra.mxu3 %v7724_v37  ;;  %v7801_v36 = vld [vmem:[%s10114_s16 + $0x2e8] sm:$0xff]  ;;  %v1451_v37 = vperm.slane %v8991_v4, 4 }
 0x53e   : > { %2962 = vmatpush.bf16.msrb.mxu1 %v7747_v34  ;;  %3001 = vmatpush.bf16.msra.mxu0 %v7771_v35  ;;  %v7777_v35 = vld [vmem:[%s10114_s16 + $0x228] sm:$0xff] }
 0x53f   : > { %2975 = vmatpush.bf16.msrb.mxu2 %v7755_v38  ;;  %2988 = vmatpush.bf16.msrb.mxu3 %v7763_v39  ;;  %v1454_v39 = vperm.slane %v8991_v4, 7 }
 0x542   : > { %2963 = vmatpush.bf16.msrb.mxu1 %v7746_v40  ;;  %3002 = vmatpush.bf16.msra.mxu0 %v7770_v41  ;;  %v7786_v40 = vld [vmem:[%s10114_s16 + $0x270] sm:$0xff] }
 0x543   : > { %2976 = vmatpush.bf16.msrb.mxu2 %v7754_v42  ;;  %2989 = vmatpush.bf16.msrb.mxu3 %v7762_v43  ;;  %v7794_v42 = vld [vmem:[%s10114_s16 + $0x2b0] sm:$0xff] }
 0x546   : > { %2964 = vmatpush.bf16.msrb.mxu1 %v7745_v44  ;;  %3003 = vmatpush.bf16.msra.mxu0 %v7769_v45  ;;  %v7776_v44 = vld [vmem:[%s10114_s16 + $0x220] sm:$0xff] }
 0x547   : > { %2977 = vmatpush.bf16.msrb.mxu2 %v7753_v46  ;;  %2990 = vmatpush.bf16.msrb.mxu3 %v7761_v47  ;;  %v7800_v47 = vld [vmem:[%s10114_s16 + $0x2e0] sm:$0xff] }
 0x54a   : > { %2965 = vmatpush.bf16.msrb.mxu1 %v7744_v48  ;;  %3004 = vmatpush.bf16.msra.mxu0 %v7768_v49  ;;  %v7785_v49 = vld [vmem:[%s10114_s16 + $0x268] sm:$0xff] }
 0x54b   : > { %2978 = vmatpush.bf16.msrb.mxu2 %v7752_v50  ;;  %2991 = vmatpush.bf16.msrb.mxu3 %v7760_v51  ;;  %v7793_v51 = vld [vmem:[%s10114_s16 + $0x2a8] sm:$0xff] }
 0x54e   : > { %2966 = vmatpush.bf16.msrb.mxu1 %v7743_v52  ;;  %3005 = vmatpush.bf16.msra.mxu0 %v7767_v53  ;;  %v1452_v52 = vperm.slane %v8991_v4, 5 }
 0x54f   : > { %2979 = vmatpush.bf16.msrb.mxu2 %v7751_v56  ;;  %2992 = vmatpush.bf16.msrb.mxu3 %v7759_v57  ;;  %v7799_v57 = vld [vmem:[%s10114_s16 + $0x2d8] sm:$0xff] }
 0x552   : > { %2967 = vmatpush.bf16.msrb.mxu1 %v7742_v54  ;;  %3006 = vmatpush.bf16.msra.mxu0 %v7766_v55  ;;  %v1453_v54 = vperm.slane %v8991_v4, 6  ;;  %v7775_v55 = vld [vmem:[%s10114_s16 + $0x218] sm:$0xff] }
 0x553   : > { %2980 = vmatpush.bf16.msrb.mxu2 %v7750_v60  ;;  %2993 = vmatpush.bf16.msrb.mxu3 %v7758_v61  ;;  %v7784_v60 = vld [vmem:[%s10114_s16 + $0x260] sm:$0xff] }
 0x556   : > { %2968 = vmatpush.bf16.msrb.mxu1 %v7741_v58  ;;  %3007 = vmatpush.bf16.msra.mxu0 %v7765_v59 }
 0x557   : > { %2981 = vmatpush.bf16.msrb.mxu2 %v7749_v0  ;;  %2994 = vmatpush.bf16.msrb.mxu3 %v7757_v1 }
 0x55a   : > { %2969 = vmatpush.bf16.msrb.mxu1 %v7740_v62  ;;  %3008 = vmatpush.bf16.msra.mxu0 %v7764_v63  ;;  %v7792_v63 = vld [vmem:[%s10114_s16 + $0x2a0] sm:$0xff] }
 0x55b   : > { %2982 = vmatpush.bf16.msrb.mxu2 %v7748_v2  ;;  %2995 = vmatpush.bf16.msrb.mxu3 %v7756_v3  ;;  %v7774_v2 = vld [vmem:[%s10114_s16 + $0x210] sm:$0xff] }
 0x579   : > { %v1651_v7 = vpop.f32.mrf.mxu1 }
 0x57a   : > { %v1652_v8 = vadd.f32 %v1651_v7, %v1447_v5  ;;  %v1690_v9 = vpop.f32.mrf.mxu0  ;;  %v7798_v5 = vld [vmem:[%s10114_s16 + $0x2d0] sm:$0xff]  ;;  %v7783_v7 = vld [vmem:[%s10114_s16 + $0x258] sm:$0xff] }
 0x57b   : > { %v1691_v10 = vadd.f32 %v1690_v9, %v1450_v6 }
 0x57c   : > { %v1850_v12 = vmax.f32 %v1652_v8, 0.0  ;;  %v9067_v8 = vld [vmem:[%s10113_s15 + $0x8] sm:$0xff] }
 0x57d   : > { %v1853_v25 = vmax.f32 %v1691_v10, 0.0  ;;  %v7791_v10 = vld [vmem:[%s10114_s16 + $0x298] sm:$0xff] }
 0x57e   : > { %v1866_v17 = vpack.c.bf16 %v1850_v12, %v1850_v12 }
 0x57f   : > { %v1869_v19 = vpack.c.bf16 %v1853_v25, %v1853_v25  ;;  %v1664_v14 = vpop.f32.mrf.mxu2  ;;  %v7797_v25 = vld [vmem:[%s10114_s16 + $0x2c8] sm:$0xff] }
 0x580   : > { %v1665_v21 = vadd.f32 %v1664_v14, %v1448_v13  ;;  %v1677_v22 = vpop.f32.mrf.mxu3  ;;  %2918 = vmatmul.bf16.vlgmr.msra.gmra.mxu1 %v1866_v17  ;;  %v7773_v13 = vld [vmem:[%s10114_s16 + $0x208] sm:$0xff]  ;;  %v1458_v17 = vperm.slane %v9067_v8, 3  ;;  %v7790_v14 = vld [vmem:[%s10114_s16 + $0x290] sm:$0xff] }
 0x581   : > { %v1678_v23 = vadd.f32 %v1677_v22, %v1449_v15  ;;  %2957 = vmatmul.bf16.vlgmr.msrb.gmra.mxu0 %v1869_v19  ;;  %3014 = vmatpush.bf16.msra.mxu1 %v7779_v16  ;;  %v1653_v26 = vpop.f32.mrf.mxu1  ;;  %v1455_v15 = vperm.slane %v9067_v8, 0  ;;  %v7772_v22 = vld [vmem:[%s10114_s16 + $0x200] sm:$0xff] }
 0x582   : > { %v1851_v24 = vmax.f32 %v1665_v21, 0.0  ;;  %3053 = vmatpush.bf16.msrb.mxu0 %v7803_v18  ;;  %v1692_v28 = vpop.f32.mrf.mxu0  ;;  %v7782_v18 = vld [vmem:[%s10114_s16 + $0x250] sm:$0xff] }
 0x583   : > { %v1852_v30 = vmax.f32 %v1678_v23, 0.0 }
 0x584   : > { %v1867_v32 = vpack.c.bf16 %v1851_v24, %v1851_v24  ;;  %v7811_v24 = vld [vmem:[%s10114_s16 + $0x338] sm:$0xff] }
 0x585   : > { %v1868_v34 = vpack.c.bf16 %v1852_v30, %v1852_v30  ;;  %3015 = vmatpush.bf16.msra.mxu1 %v7778_v27  ;;  %v7796_v27 = vld [vmem:[%s10114_s16 + $0x2c0] sm:$0xff]  ;;  %v7781_v30 = vld [vmem:[%s10114_s16 + $0x248] sm:$0xff] }
 0x586   : > { %3054 = vmatpush.bf16.msrb.mxu0 %v7802_v29  ;;  %2931 = vmatmul.bf16.vlgmr.msra.gmra.mxu2 %v1867_v32  ;;  %v7835_v29 = vld [vmem:[%s10114_s16 + $0x3f8] sm:$0xff]  ;;  %v7789_v32 = vld [vmem:[%s10114_s16 + $0x288] sm:$0xff] }
 0x587   : > { %2944 = vmatmul.bf16.vlgmr.msra.gmra.mxu3 %v1868_v34  ;;  %3027 = vmatpush.bf16.msra.mxu2 %v7787_v31  ;;  %v1666_v38 = vpop.f32.mrf.mxu2 }
 0x588   : > { %3040 = vmatpush.bf16.msra.mxu3 %v7795_v33  ;;  %v1679_v41 = vpop.f32.mrf.mxu3  ;;  %v1456_v33 = vperm.slane %v9067_v8, 1 }
 0x589   : > { %3016 = vmatpush.bf16.msra.mxu1 %v7777_v35  ;;  %v1703_v43 = vpop.f32.mrf.mxu1  ;;  %v1457_v35 = vperm.slane %v9067_v8, 2  ;;  %v7780_v41 = vld [vmem:[%s10114_s16 + $0x240] sm:$0xff] }
 0x58a   : > { %3055 = vmatpush.bf16.msrb.mxu0 %v7801_v36  ;;  %v1704_v45 = vadd.f32 %v1703_v43, %v1451_v37  ;;  %v1742_v46 = vpop.f32.mrf.mxu0  ;;  %v7810_v37 = vld [vmem:[%s10114_s16 + $0x330] sm:$0xff] }
 0x58b   : > { %v1743_v48 = vadd.f32 %v1742_v46, %v1454_v39  ;;  %3028 = vmatpush.bf16.msra.mxu2 %v7786_v40  ;;  %v7834_v40 = vld [vmem:[%s10114_s16 + $0x3f0] sm:$0xff] }
 0x58c   : > { %v1854_v50 = vmax.f32 %v1704_v45, 0.0  ;;  %3041 = vmatpush.bf16.msra.mxu3 %v7794_v42  ;;  %v7819_v45 = vld [vmem:[%s10114_s16 + $0x378] sm:$0xff] }
 0x58d   : > { %v1857_v53 = vmax.f32 %v1743_v48, 0.0  ;;  %3017 = vmatpush.bf16.msra.mxu1 %v7776_v44  ;;  %v7788_v44 = vld [vmem:[%s10114_s16 + $0x280] sm:$0xff]  ;;  %v7827_v48 = vld [vmem:[%s10114_s16 + $0x3b8] sm:$0xff] }
 0x58e   : > { %v1870_v56 = vpack.c.bf16 %v1854_v50, %v1854_v50  ;;  %3056 = vmatpush.bf16.msrb.mxu0 %v7800_v47 }
 0x58f   : > { %v1873_v58 = vpack.c.bf16 %v1857_v53, %v1857_v53  ;;  %3029 = vmatpush.bf16.msra.mxu2 %v7785_v49  ;;  %v1716_v59 = vpop.f32.mrf.mxu2  ;;  %v7833_v53 = vld [vmem:[%s10114_s16 + $0x3e8] sm:$0xff] }
 0x590   : > { %3042 = vmatpush.bf16.msra.mxu3 %v7793_v51  ;;  %v1717_v61 = vadd.f32 %v1716_v59, %v1452_v52  ;;  %v1729_v62 = vpop.f32.mrf.mxu3  ;;  %2970 = vmatmul.bf16.vlgmr.msrb.gmra.mxu1 %v1870_v56  ;;  %v7809_v51 = vld [vmem:[%s10114_s16 + $0x328] sm:$0xff] }
 0x591   : > { %v1730_v0 = vadd.f32 %v1729_v62, %v1453_v54  ;;  %3009 = vmatmul.bf16.vlgmr.msra.gmra.mxu0 %v1873_v58  ;;  %3018 = vmatpush.bf16.msra.mxu1 %v7775_v55  ;;  %v1705_v1 = vpop.f32.mrf.mxu1  ;;  %v7818_v55 = vld [vmem:[%s10114_s16 + $0x370] sm:$0xff]  ;;  %v7808_v58 = vld [vmem:[%s10114_s16 + $0x320] sm:$0xff]  ;;  %v7817_v62 = vld [vmem:[%s10114_s16 + $0x368] sm:$0xff] }
 0x592   : > { %v1855_v3 = vmax.f32 %v1717_v61, 0.0  ;;  %3057 = vmatpush.bf16.msrb.mxu0 %v7799_v57  ;;  %v1744_v4 = vpop.f32.mrf.mxu0  ;;  %v7826_v57 = vld [vmem:[%s10114_s16 + $0x3b0] sm:$0xff] }
 0x593   : > { %v1856_v6 = vmax.f32 %v1730_v0, 0.0  ;;  %3030 = vmatpush.bf16.msra.mxu2 %v7784_v60  ;;  %v7832_v60 = vld [vmem:[%s10114_s16 + $0x3e0] sm:$0xff]  ;;  %v7825_v0 = vld [vmem:[%s10114_s16 + $0x3a8] sm:$0xff] }
 0x594   : > { %v1871_v9 = vpack.c.bf16 %v1855_v3, %v1855_v3  ;;  %3043 = vmatpush.bf16.msra.mxu3 %v7792_v63  ;;  %v7831_v3 = vld [vmem:[%s10114_s16 + $0x3d8] sm:$0xff]  ;;  %v7816_v4 = vld [vmem:[%s10114_s16 + $0x360] sm:$0xff] }
 0x595   : > { %v1872_v12 = vpack.c.bf16 %v1856_v6, %v1856_v6  ;;  %3019 = vmatpush.bf16.msra.mxu1 %v7774_v2  ;;  %v7807_v2 = vld [vmem:[%s10114_s16 + $0x318] sm:$0xff]  ;;  %v7806_v6 = vld [vmem:[%s10114_s16 + $0x310] sm:$0xff] }
 0x596   : > { %3058 = vmatpush.bf16.msrb.mxu0 %v7798_v5  ;;  %2983 = vmatmul.bf16.vlgmr.msrb.gmra.mxu2 %v1871_v9  ;;  %v7824_v5 = vld [vmem:[%s10114_s16 + $0x3a0] sm:$0xff] }
 0x597   : > { %2996 = vmatmul.bf16.vlgmr.msrb.gmra.mxu3 %v1872_v12  ;;  %3031 = vmatpush.bf16.msra.mxu2 %v7783_v7  ;;  %v1718_v16 = vpop.f32.mrf.mxu2  ;;  %v1459_v7 = vperm.slane %v9067_v8, 4  ;;  %v1462_v12 = vperm.slane %v9067_v8, 7 }
 0x598   : > { %3044 = vmatpush.bf16.msra.mxu3 %v7791_v10  ;;  %v1731_v19 = vpop.f32.mrf.mxu3  ;;  %v7830_v10 = vld [vmem:[%s10114_s16 + $0x3d0] sm:$0xff]  ;;  %v7823_v16 = vld [vmem:[%s10114_s16 + $0x398] sm:$0xff] }
 0x599   : > { %3020 = vmatpush.bf16.msra.mxu1 %v7773_v13  ;;  %v1755_v21 = vpop.f32.mrf.mxu1 }
 0x59a   : > { %3059 = vmatpush.bf16.msrb.mxu0 %v7797_v25  ;;  %v1756_v23 = vadd.f32 %v1755_v21, %v1455_v15  ;;  %v1794_v26 = vpop.f32.mrf.mxu0  ;;  %v7815_v25 = vld [vmem:[%s10114_s16 + $0x358] sm:$0xff] }
 0x59b   : > { %v1795_v28 = vadd.f32 %v1794_v26, %v1458_v17  ;;  %3032 = vmatpush.bf16.msra.mxu2 %v7782_v18  ;;  %v7805_v18 = vld [vmem:[%s10114_s16 + $0x308] sm:$0xff]  ;;  %v7822_v26 = vld [vmem:[%s10114_s16 + $0x390] sm:$0xff] }
 0x59c   : > { %v1858_v31 = vmax.f32 %v1756_v23, 0.0  ;;  %3045 = vmatpush.bf16.msra.mxu3 %v7790_v14  ;;  %v7829_v14 = vld [vmem:[%s10114_s16 + $0x3c8] sm:$0xff]  ;;  %v1460_v23 = vperm.slane %v9067_v8, 5 }
 0x59d   : > { %v1861_v34 = vmax.f32 %v1795_v28, 0.0  ;;  %3021 = vmatpush.bf16.msra.mxu1 %v7772_v22  ;;  %v7814_v22 = vld [vmem:[%s10114_s16 + $0x350] sm:$0xff] }
 0x59e   : > { %v1874_v36 = vpack.c.bf16 %v1858_v31, %v1858_v31  ;;  %3060 = vmatpush.bf16.msrb.mxu0 %v7796_v27  ;;  %v1461_v27 = vperm.slane %v9067_v8, 6 }
 0x59f   : > { %v1877_v38 = vpack.c.bf16 %v1861_v34, %v1861_v34  ;;  %3033 = vmatpush.bf16.msra.mxu2 %v7781_v30  ;;  %v1768_v39 = vpop.f32.mrf.mxu2  ;;  %v7828_v30 = vld [vmem:[%s10114_s16 + $0x3c0] sm:$0xff]  ;;  %v7821_v34 = vld [vmem:[%s10114_s16 + $0x388] sm:$0xff] }
 0x5a0   : > { %3046 = vmatpush.bf16.msra.mxu3 %v7789_v32  ;;  %v1769_v42 = vadd.f32 %v1768_v39, %v1456_v33  ;;  %v1781_v43 = vpop.f32.mrf.mxu3  ;;  %3022 = vmatmul.bf16.vlgmr.msra.gmra.mxu1 %v1874_v36  ;;  %v7813_v33 = vld [vmem:[%s10114_s16 + $0x348] sm:$0xff] }
 0x5a1   : > { %3066 = vmatpush.bf16.msrb.mxu1 %v7811_v24  ;;  %v1782_v46 = vadd.f32 %v1781_v43, %v1457_v35  ;;  %3061 = vmatmul.bf16.vlgmr.msrb.gmra.mxu0 %v1877_v38  ;;  %v1757_v47 = vpop.f32.mrf.mxu1  ;;  %v7804_v24 = vld [vmem:[%s10114_s16 + $0x300] sm:$0xff] }
 0x5a2   : > { %3105 = vmatpush.bf16.msra.mxu0 %v7835_v29  ;;  %v1859_v49 = vmax.f32 %v1769_v42, 0.0  ;;  %v1796_v50 = vpop.f32.mrf.mxu0  ;;  %v7812_v38 = vld [vmem:[%s10114_s16 + $0x340] sm:$0xff] }
 0x5a3   : > { %v1860_v52 = vmax.f32 %v1782_v46, 0.0  ;;  %3034 = vmatpush.bf16.msra.mxu2 %v7780_v41 }
 0x5a4   : > { %v1875_v54 = vpack.c.bf16 %v1859_v49, %v1859_v49  ;;  %3047 = vmatpush.bf16.msra.mxu3 %v7788_v44 }
 0x5a5   : > { %3067 = vmatpush.bf16.msrb.mxu1 %v7810_v37  ;;  %v1876_v56 = vpack.c.bf16 %v1860_v52, %v1860_v52 }
 0x5a6   : > { %3106 = vmatpush.bf16.msra.mxu0 %v7834_v40  ;;  %3035 = vmatmul.bf16.vlgmr.msra.gmra.mxu2 %v1875_v54  ;;  %v7820_v40 = vld [vmem:[%s10114_s16 + $0x380] sm:$0xff] }
 0x5a7   : > { %3079 = vmatpush.bf16.msrb.mxu2 %v7819_v45  ;;  %3048 = vmatmul.bf16.vlgmr.msra.gmra.mxu3 %v1876_v56  ;;  %v1770_v59 = vpop.f32.mrf.mxu2  ;;  %v8076_v56 = vld [vmem:[%s10115_s17] ss:$0 sm:$0xff] }
 0x5a8   : > { %3092 = vmatpush.bf16.msrb.mxu3 %v7827_v48  ;;  %v1783_v61 = vpop.f32.mrf.mxu3 }
 0x5a9   : > { %3068 = vmatpush.bf16.msrb.mxu1 %v7809_v51  ;;  %v1807_v63 = vpop.f32.mrf.mxu1 }
 0x5aa   : > { %3107 = vmatpush.bf16.msra.mxu0 %v7833_v53  ;;  %v1846_v1 = vpop.f32.mrf.mxu0  ;;  %v1808_v19 = vadd.f32 %v1807_v63, %v1459_v7 }
 0x5ab   : > { %3080 = vmatpush.bf16.msrb.mxu2 %v7818_v55  ;;  %v1847_v21 = vadd.f32 %v1846_v1, %v1462_v12 }
 0x5ac   : > { %3093 = vmatpush.bf16.msrb.mxu3 %v7826_v57  ;;  %v1862_v28 = vmax.f32 %v1808_v19, 0.0 }
 0x5ad   : > { %3069 = vmatpush.bf16.msrb.mxu1 %v7808_v58  ;;  %v1865_v31 = vmax.f32 %v1847_v21, 0.0 }
 0x5ae   : > { %3108 = vmatpush.bf16.msra.mxu0 %v7832_v60  ;;  %v1878_v36 = vpack.c.bf16 %v1862_v28, %v1862_v28 }
 0x5af   : > { %3081 = vmatpush.bf16.msrb.mxu2 %v7817_v62  ;;  %v1820_v9 = vpop.f32.mrf.mxu2  ;;  %v1881_v37 = vpack.c.bf16 %v1865_v31, %v1865_v31 }
 0x5b0   : > { %3094 = vmatpush.bf16.msrb.mxu3 %v7825_v0  ;;  %v1833_v13 = vpop.f32.mrf.mxu3  ;;  %v1821_v8 = vadd.f32 %v1820_v9, %v1460_v23 }
 0x5b1   : > { %3070 = vmatpush.bf16.msrb.mxu1 %v7807_v2  ;;  %v1809_v15 = vpop.f32.mrf.mxu1  ;;  %v1834_v35 = vadd.f32 %v1833_v13, %v1461_v27 }
 0x5b2   : > { %3109 = vmatpush.bf16.msra.mxu0 %v7831_v3  ;;  %v1848_v17 = vpop.f32.mrf.mxu0  ;;  %v1863_v39 = vmax.f32 %v1821_v8, 0.0 }
 0x5b3   : > { %3082 = vmatpush.bf16.msrb.mxu2 %v7816_v4  ;;  %v1864_v41 = vmax.f32 %v1834_v35, 0.0 }
 0x5b4   : > { %3095 = vmatpush.bf16.msrb.mxu3 %v7824_v5  ;;  %v1879_v42 = vpack.c.bf16 %v1863_v39, %v1863_v39  ;;  %v7841_v39 = vld [vmem:[%s10146_s29 + $0x68] sm:$0xff] }
 0x5b5   : > { %3071 = vmatpush.bf16.msrb.mxu1 %v7806_v6  ;;  %v1880_v43 = vpack.c.bf16 %v1864_v41, %v1864_v41  ;;  %v7836_v41 = vld [vmem:[%s10146_s29 + $0x40] sm:$0xff] }
 0x5b6   : > { %3110 = vmatpush.bf16.msra.mxu0 %v7830_v10 }
 0x5b7   : > { %3083 = vmatpush.bf16.msrb.mxu2 %v7815_v25  ;;  %v1822_v29 = vpop.f32.mrf.mxu2 }
 0x5b8   : > { %3096 = vmatpush.bf16.msrb.mxu3 %v7823_v16  ;;  %v1835_v32 = vpop.f32.mrf.mxu3 }
 0x5b9   : > { %3072 = vmatpush.bf16.msrb.mxu1 %v7805_v18 }
 0x5ba   : > { %3111 = vmatpush.bf16.msra.mxu0 %v7829_v14 }
 0x5bb   : > { %3084 = vmatpush.bf16.msrb.mxu2 %v7814_v22 }
 0x5bc   : > { %3097 = vmatpush.bf16.msrb.mxu3 %v7822_v26 }
 0x5bd   : > { %3073 = vmatpush.bf16.msrb.mxu1 %v7804_v24 }
 0x5be   : > { %3112 = vmatpush.bf16.msra.mxu0 %v7828_v30 }
 0x5bf   : > { %3085 = vmatpush.bf16.msrb.mxu2 %v7813_v33 }
 0x5c0   : > { %3098 = vmatpush.bf16.msrb.mxu3 %v7821_v34  ;;  %3074 = vmatmul.bf16.vlgmr.msrb.gmra.mxu1 %v1878_v36 }
 0x5c1   : > { %3113 = vmatmul.bf16.vlgmr.msra.gmra.mxu0 %v1881_v37 }
 0x5c3   : > { %3086 = vmatpush.bf16.msrb.mxu2 %v7812_v38  ;;  %v7837_v38 = vld [vmem:[%s10146_s29 + $0x48] sm:$0xff] }
 0x5c4   : > { %3099 = vmatpush.bf16.msrb.mxu3 %v7820_v40  ;;  %v7843_v40 = vld [vmem:[%s10146_s29 + $0x78] sm:$0xff]  ;;  %3207 = vmatpush.bf16.msra.mxu1 %v7837_v38 }
 0x5c5   : > { %3282 = vmatpush.bf16.msrb.mxu0 %v7843_v40 }
 0x5c6   : > { %3087 = vmatmul.bf16.vlgmr.msrb.gmra.mxu2 %v1879_v42  ;;  %v7838_v42 = vld [vmem:[%s10146_s29 + $0x50] sm:$0xff] }
 0x5c7   : > { %3100 = vmatmul.bf16.vlgmr.msrb.gmra.mxu3 %v1880_v43  ;;  %v7840_v43 = vld [vmem:[%s10146_s29 + $0x60] sm:$0xff] }
 0x5c8   : > { %3257 = vmatpush.bf16.msra.mxu3 %v7841_v39  ;;  %3208 = vmatpush.bf16.msra.mxu1 %v7836_v41 }
 0x5cc   : > { %3258 = vmatpush.bf16.msra.mxu3 %v7840_v43  ;;  %v8081_v43 = vld [vmem:[%s10150_s5 + $0x5] ss:$0 sm:$0xff] }
 0x5fd   : > { %v2919_v44 = vpop.f32.mrf.mxu1 }
 0x5fe   : > { %v2958_v45 = vpop.f32.mrf.mxu0  ;;  %v2920_v59 = vadd.f32 %v8076_v56, %v2919_v44  ;;  %v7842_v44 = vld [vmem:[%s10146_s29 + $0x70] sm:$0xff] }
 0x5ff   : > { %3283 = vmatpush.bf16.msrb.mxu0 %v7842_v44 }
 0x605   : > { %v2921_v46 = vpop.f32.mrf.mxu1 }
 0x606   : > { %v2960_v47 = vpop.f32.mrf.mxu0  ;;  %v7845_v46 = vld [vmem:[%s10147_s6 + $0x48] sm:$0xff] }
 0x607   : > { %v7847_v47 = vld [vmem:[%s10147_s6 + $0x58] sm:$0xff]  ;;  %3341 = vmatpush.bf16.msrb.mxu1 %v7845_v46  ;;  %v8082_v46 = vld [vmem:[%s10150_s5 + $0x6] ss:$0 sm:$0xff] }
 0x609   : > { %v2932_v48 = vpop.f32.mrf.mxu2 }
 0x60a   : > { %v2945_v49 = vpop.f32.mrf.mxu3  ;;  %v2933_v62 = vadd.f32 %v2932_v48, %v2920_v59  ;;  %v7849_v48 = vld [vmem:[%s10147_s6 + $0x68] sm:$0xff] }
 0x60b   : > { %3391 = vmatpush.bf16.msrb.mxu3 %v7849_v48 }
 0x60c   : > { %v2946_v1 = vadd.f32 %v2945_v49, %v2933_v62  ;;  %v8077_v62 = vld [vmem:[%s10116_s18] ss:$0 sm:$0xff] }
 0x60d   : > { %v2971_v50 = vpop.f32.mrf.mxu1 }
 0x60e   : > { %v3010_v51 = vpop.f32.mrf.mxu0  ;;  %v2959_v4 = vadd.f32 %v2958_v45, %v2946_v1 }
 0x610   : > { %v2972_v7 = vadd.f32 %v2971_v50, %v2959_v4  ;;  %v7851_v50 = vld [vmem:[%s10147_s6 + $0x78] sm:$0xff] }
 0x611   : > { %v2934_v52 = vpop.f32.mrf.mxu2  ;;  %3416 = vmatpush.bf16.msra.mxu0 %v7851_v50 }
 0x612   : > { %v2947_v53 = vpop.f32.mrf.mxu3  ;;  %v7846_v52 = vld [vmem:[%s10147_s6 + $0x50] sm:$0xff] }
 0x615   : > { %v2973_v54 = vpop.f32.mrf.mxu1 }
 0x616   : > { %v3012_v55 = vpop.f32.mrf.mxu0  ;;  %v7848_v54 = vld [vmem:[%s10147_s6 + $0x60] sm:$0xff] }
 0x617   : > { %v7850_v55 = vld [vmem:[%s10147_s6 + $0x70] sm:$0xff]  ;;  %3392 = vmatpush.bf16.msrb.mxu3 %v7848_v54 }
 0x618   : > { %3417 = vmatpush.bf16.msra.mxu0 %v7850_v55 }
 0x619   : > { %v2984_v57 = vpop.f32.mrf.mxu2 }
 0x61a   : > { %v2997_v58 = vpop.f32.mrf.mxu3  ;;  %v2985_v9 = vadd.f32 %v2984_v57, %v2972_v7  ;;  %v7857_v7 = vld [vmem:[%s10106_s8 + $0x68] sm:$0xff] }
 0x61c   : > { %v2998_v10 = vadd.f32 %v2997_v58, %v2985_v9  ;;  %v7859_v9 = vld [vmem:[%s10106_s8 + $0x78] sm:$0xff] }
 0x61d   : > { %v3023_v60 = vpop.f32.mrf.mxu1 }
 0x61e   : > { %v3062_v61 = vpop.f32.mrf.mxu0  ;;  %v3011_v25 = vadd.f32 %v3010_v51, %v2998_v10  ;;  %v7844_v51 = vld [vmem:[%s10147_s6 + $0x40] sm:$0xff] }
 0x61f   : > { %3342 = vmatpush.bf16.msrb.mxu1 %v7844_v51  ;;  %v7852_v10 = vld [vmem:[%s10106_s8 + $0x40] sm:$0xff] }
 0x620   : > { %v3024_v15 = vadd.f32 %v3023_v60, %v3011_v25  ;;  %v7858_v25 = vld [vmem:[%s10106_s8 + $0x70] sm:$0xff] }
 0x621   : > { %v2986_v63 = vpop.f32.mrf.mxu2 }
 0x622   : > { %v2999_v0 = vpop.f32.mrf.mxu3 }
 0x623   : > { %v8078_v0 = vld [vmem:[%s10117_s19] ss:$0 sm:$0xff] }
 0x625   : > { %v3025_v2 = vpop.f32.mrf.mxu1 }
 0x626   : > { %v3064_v3 = vpop.f32.mrf.mxu0 }
 0x629   : > { %v3036_v5 = vpop.f32.mrf.mxu2 }
 0x62a   : > { %v3049_v6 = vpop.f32.mrf.mxu3  ;;  %v3037_v17 = vadd.f32 %v3036_v5, %v3024_v15  ;;  %v7853_v5 = vld [vmem:[%s10106_s8 + $0x48] sm:$0xff] }
 0x62c   : > { %v3050_v19 = vadd.f32 %v3049_v6, %v3037_v17  ;;  %v7855_v6 = vld [vmem:[%s10106_s8 + $0x58] sm:$0xff] }
 0x62e   : > { %v3063_v21 = vadd.f32 %v3062_v61, %v3050_v19 }
 0x631   : > { %v3038_v12 = vpop.f32.mrf.mxu2 }
 0x632   : > { %v3051_v13 = vpop.f32.mrf.mxu3  ;;  %v7854_v12 = vld [vmem:[%s10106_s8 + $0x50] sm:$0xff] }
 0x633   : > { %v7856_v13 = vld [vmem:[%s10106_s8 + $0x60] sm:$0xff] }
 0x63d   : > { %v3075_v16 = vpop.f32.mrf.mxu1 }
 0x63e   : > { %v3114_v18 = vpop.f32.mrf.mxu0  ;;  %v3076_v23 = vadd.f32 %v3075_v16, %v3063_v21  ;;  %v8083_v21 = vld [vmem:[%s10105_s7 + $0x4] ss:$0 sm:$0xff] }
 0x645   : > { %v3077_v14 = vpop.f32.mrf.mxu1 }
 0x646   : > { %v3116_v22 = vpop.f32.mrf.mxu0 }
 0x649   : > { %v3088_v26 = vpop.f32.mrf.mxu2 }
 0x64a   : > { %v3089_v27 = vadd.f32 %v3088_v26, %v3076_v23  ;;  %v3101_v24 = vpop.f32.mrf.mxu3  ;;  %v8084_v23 = vld [vmem:[%s10105_s7 + $0x7] ss:$0 sm:$0xff] }
 0x64c   : > { %v3102_v28 = vadd.f32 %v3101_v24, %v3089_v27 }
 0x64e   : > { %v3115_v29 = vadd.f32 %v3114_v18, %v3102_v28 }
 0x650   : > { %v3118_v30 = vadd.f32 %v3115_v29, %v8677_v20  ;;  %v7839_v20 = vld [vmem:[%s10146_s29 + $0x58] sm:$0xff] }
 0x651   : > { %v3090_v31 = vpop.f32.mrf.mxu2  ;;  %3232 = vmatpush.bf16.msra.mxu2 %v7839_v20 }
 0x652   : > { %v3103_v32 = vpop.f32.mrf.mxu3  ;;  %v3121_v33 = vsel %vm702_vm2, %v3118_v30, 0.0 }
 0x653   : > { %3122 = vadd.xlane.f32.xlu1 %v3121_v33  ;;  %v8085_v32 = vld [vmem:[%s10105_s7 + $0x5] ss:$0 sm:$0xff]  ;;  %v8080_v33 = vld [vmem:[%s10150_s5 + $0x7] ss:$0 sm:$0xff] }
 0x655   : > { %3233 = vmatpush.bf16.msra.mxu2 %v7838_v42 }
 0x659   : > { %3366 = vmatpush.bf16.msrb.mxu2 %v7847_v47 }
 0x65d   : > { %3367 = vmatpush.bf16.msrb.mxu2 %v7846_v52 }
 0x6c6   : > { %v3123_v8 = vpop.xlane.xlu1 %3122 }
 0x6c7   : > { %v3124_v34 = vmul.f32 %v3123_v8, %v8550_v11 }
 0x6c9   : > { %v3125_v35 = vsub.f32 %v3118_v30, %v3124_v34  ;;  %v8079_v30 = vld [vmem:[%s10150_s5 + $0x4] ss:$0 sm:$0xff]  ;;  %v8086_v34 = vld [vmem:[%s10105_s7 + $0x6] ss:$0 sm:$0xff]  ;;  %s5669_s5 = sshll.u32 %s5665_s3, 4  ;;  %s5670_s5 = int_to_ptr.hbm [resolvable:$true] %s5669_s5 }
 0x6ca   : > { %s8153_s25 = sshra.s32 %s5670_s5, 4  ;;  %s8154_s25 = int_to_ptr.hbm [resolvable:$true] %s8153_s25 }
 0x6cb   : > { %v3126_v36 = vmul.f32 %v3125_v35, %v3125_v35  ;;  %s8155_s0 = scalar_lea.hbm %s8154_s25, 8  ;;  %p8160_p0 = scmp.lt.s32.totalorder %s8154_s25, %s10118_s20 }
 0x6cc   : > { %p8156_p11 = scmp.ne.s32.totalorder %s8154_s25, %s8155_s0  ;;  %p8161_p1 = scmp.lt.s32.totalorder %s8159_s4, %s8155_s0 }
 0x6cd   : > { %v3127_v37 = vsel %vm702_vm2, %v3126_v36, 0.0 }
 0x6ce   : > { %3128 = vadd.xlane.f32.xlu2 %v3127_v37  ;;  %p8157_p12 = pnand %p8156_p11, %p8347_p5  ;;  %p8162_p2 = por %p8161_p1, %p8160_p0 }
 0x6d0   : > { %p8158_p13 = pneg %p8157_p12 }
 0x6d2   : > { %p8163_p3 = pnand %p8162_p2, %p8158_p13 }
 0x741   : > { %v3129_v45 = vpop.xlane.xlu2 %3128 }
 0x742   : > { %v3130_v49 = vmul.f32 %v3129_v45, %v8550_v11 }
 0x744   : > { %v3131_v53 = vadd.f32 1e-05, %v3130_v49 }
 0x746   : > { %8117 = vrsqrt.f32 %v3131_v53  ;;  %vm3138_vm8 = vweird.f32 %v3131_v53 }
 0x74c   : > { %v8118_v56 = vpop.eup %8117 }
 0x74d   : > { %v3133_v57 = vmul.f32 %v8118_v56, %v3131_v53  ;;  %vm3139_vm7 = vweird.f32 %v8118_v56  ;;  %v8087_v53 = vld [vmem:[%s10107_s9 + $0x4] ss:$0 sm:$0xff] }
 0x74e   : > { %vm3140_vm9 = vmor %vm3138_vm8, %vm3139_vm7 }
 0x74f   : > { %v3134_v58 = vmul.f32 %v8118_v56, %v3133_v57 }
 0x751   : > { %v3135_v59 = vmul.f32 0.5, %v3134_v58 }
 0x753   : > { %v3136_v60 = vsub.f32 1.5, %v3135_v59 }
 0x755   : > { %v3137_v61 = vmul.f32 %v8118_v56, %v3136_v60 }
 0x757   : > { %v3141_v63 = vsel %vm3140_vm9, %v8118_v56, %v3137_v61  ;;  %v8088_v56 = vld [vmem:[%s10107_s9 + $0x7] ss:$0 sm:$0xff] }
 0x758   : > { %v3142_v1 = vmul.f32 %v3141_v63, %v3125_v35 }
 0x75a   : > { %v3146_v2 = vmul.f32 %v8077_v62, %v3142_v1  ;;  %v8089_v1 = vld [vmem:[%s10107_s9 + $0x5] ss:$0 sm:$0xff] }
 0x75c   : > { %v9268_v3 = vadd.f32 %v8078_v0, %v3146_v2 }
 0x75e   : > { %v3151_v4 = vpack.c.bf16 %v9268_v3, %v9268_v3 }
 0x760   : > { %6540 = vmatmul.msk.bf16.vlgmr.msra.gmra.mxu1 %vm702_vm2, %v3151_v4  ;;  %6549 = vmatmul.msk.bf16.vlgmr.msra.gmra.mxu2 %vm702_vm2, %v3151_v4 }
 0x761   : > { %6558 = vmatmul.msk.bf16.vlgmr.msra.gmra.mxu3 %vm702_vm2, %v3151_v4  ;;  %6567 = vmatmul.msk.bf16.vlgmr.msrb.gmra.mxu0 %vm702_vm2, %v3151_v4 }
 0x762   : > { %3475 = vmatpush.bf16.msra.mxu1 %v7853_v5  ;;  %3500 = vmatpush.bf16.msra.mxu2 %v7855_v6 }
 0x763   : > { %3525 = vmatpush.bf16.msra.mxu3 %v7857_v7  ;;  %3550 = vmatpush.bf16.msrb.mxu0 %v7859_v9 }
 0x766   : > { %3476 = vmatpush.bf16.msra.mxu1 %v7852_v10  ;;  %3501 = vmatpush.bf16.msra.mxu2 %v7854_v12 }
 0x767   : > { %3526 = vmatpush.bf16.msra.mxu3 %v7856_v13  ;;  %3551 = vmatpush.bf16.msrb.mxu0 %v7858_v25 }
 0x770   : > { %6596 = vmatmul.msk.bf16.vlgmr.msrb.gmra.mxu1 %vm702_vm2, %v3151_v4  ;;  %6605 = vmatmul.msk.bf16.vlgmr.msrb.gmra.mxu2 %vm702_vm2, %v3151_v4 }
 0x771   : > { %6614 = vmatmul.msk.bf16.vlgmr.msrb.gmra.mxu3 %vm702_vm2, %v3151_v4  ;;  %6623 = vmatmul.msk.bf16.vlgmr.msra.gmra.mxu0 %vm702_vm2, %v3151_v4 }
 0x780   : > { %6652 = vmatmul.msk.bf16.vlgmr.msra.gmra.mxu1 %vm702_vm2, %v3151_v4  ;;  %6661 = vmatmul.msk.bf16.vlgmr.msra.gmra.mxu2 %vm702_vm2, %v3151_v4 }
 0x781   : > { %6670 = vmatmul.msk.bf16.vlgmr.msra.gmra.mxu3 %vm702_vm2, %v3151_v4  ;;  %6679 = vmatmul.msk.bf16.vlgmr.msrb.gmra.mxu0 %vm702_vm2, %v3151_v4  ;;  %v8090_v4 = vld [vmem:[%s10107_s9 + $0x6] ss:$0 sm:$0xff] }
 0x7dd   : > { %v3210_v15 = vpop.f32.mrf.mxu1 }
 0x7de   : > { %v3285_v16 = vpop.f32.mrf.mxu0  ;;  %v3211_v38 = vadd.f32 %v8079_v30, %v3210_v15 }
 0x7df   : > { %v3286_v40 = vadd.f32 %v8080_v33, %v3285_v16 }
 0x7e0   : > { %v3557_v48 = vpack.c.bf16 %v3211_v38, %v3211_v38 }
 0x7e1   : > { %v3560_v50 = vpack.c.bf16 %v3286_v40, %v3286_v40 }
 0x7e3   : > { %v3235_v17 = vpop.f32.mrf.mxu2 }
 0x7e4   : > { %v3260_v18 = vpop.f32.mrf.mxu3  ;;  %v3236_v52 = vadd.f32 %v8081_v43, %v3235_v17 }
 0x7e5   : > { %v3212_v19 = vpop.f32.mrf.mxu1  ;;  %v3261_v54 = vadd.f32 %v8082_v46, %v3260_v18 }
 0x7e6   : > { %v3287_v14 = vpop.f32.mrf.mxu0  ;;  %v3558_v59 = vpack.c.bf16 %v3236_v52, %v3236_v52 }
 0x7e7   : > { %v3559_v62 = vpack.c.bf16 %v3261_v54, %v3261_v54 }
 0x7eb   : > { %v3237_v22 = vpop.f32.mrf.mxu2 }
 0x7ec   : > { %v3262_v26 = vpop.f32.mrf.mxu3 }
 0x7ed   : > { %v3344_v27 = vpop.f32.mrf.mxu1 }
 0x7ee   : > { %v3345_v24 = vadd.f32 %v8083_v21, %v3344_v27  ;;  %v3419_v28 = vpop.f32.mrf.mxu0 }
 0x7ef   : > { %v3420_v29 = vadd.f32 %v8084_v23, %v3419_v28 }
 0x7f0   : > { %v3561_v31 = vpack.c.bf16 %v3345_v24, %v3345_v24 }
 0x7f1   : > { %v3564_v8 = vpack.c.bf16 %v3420_v29, %v3420_v29 }
 0x7f2   : > { %v3569_v35 = vsel %vm633_vm1, %v3561_v31, 0 }
 0x7f3   : > { %v3626_v36 = vsel %vm633_vm1, %v3564_v8, 0  ;;  %v3369_v37 = vpop.f32.mrf.mxu2  ;;  %3578 = vmatpush.bf16.xpose.msrb.mxu1 %v3569_v35 }
 0x7f4   : > { %v3370_v20 = vadd.f32 %v8085_v32, %v3369_v37  ;;  %v3394_v39 = vpop.f32.mrf.mxu3  ;;  %3635 = vmatpush.bf16.xpose.msra.mxu0 %v3626_v36 }
 0x7f5   : > { %v3395_v41 = vadd.f32 %v8086_v34, %v3394_v39  ;;  %v3346_v42 = vpop.f32.mrf.mxu1 }
 0x7f6   : > { %v3562_v44 = vpack.c.bf16 %v3370_v20, %v3370_v20  ;;  %v3421_v45 = vpop.f32.mrf.mxu0 }
 0x7f7   : > { %v3563_v47 = vpack.c.bf16 %v3395_v41, %v3395_v41 }
 0x7f8   : > { %v3588_v49 = vsel %vm633_vm1, %v3562_v44, 0 }
 0x7f9   : > { %v3607_v51 = vsel %vm633_vm1, %v3563_v47, 0  ;;  %3597 = vmatpush.bf16.xpose.msrb.mxu2 %v3588_v49 }
 0x7fa   : > { %3616 = vmatpush.bf16.xpose.msrb.mxu3 %v3607_v51  ;;  %6680 = vmatmul.msk.bf16.vlgmr.msrb.gmra.mxu1 %vm633_vm1, %v3557_v48 }
 0x7fb   : > { %6683 = vmatmul.msk.bf16.vlgmr.msra.gmra.mxu0 %vm633_vm1, %v3560_v50  ;;  %v3371_v55 = vpop.f32.mrf.mxu2 }
 0x7fc   : > { %v3396_v57 = vpop.f32.mrf.mxu3 }
 0x7fd   : > { %v3478_v58 = vpop.f32.mrf.mxu1 }
 0x7fe   : > { %v3479_v60 = vadd.f32 %v8087_v53, %v3478_v58  ;;  %v3553_v61 = vpop.f32.mrf.mxu0 }
 0x7ff   : > { %v3554_v63 = vadd.f32 %v8088_v56, %v3553_v61 }
 0x800   : > { %v3693_v0 = vpack.c.bf16 %v3479_v60, %v3479_v60  ;;  %6681 = vmatmul.msk.bf16.vlgmr.msrb.gmra.mxu2 %vm633_vm1, %v3558_v59 }
 0x801   : > { %v3696_v2 = vpack.c.bf16 %v3554_v63, %v3554_v63  ;;  %6682 = vmatmul.msk.bf16.vlgmr.msrb.gmra.mxu3 %vm633_vm1, %v3559_v62 }
 0x802   : > { %v3701_v5 = vsel %vm637_vm0, %v3693_v0, 0 }
 0x803   : > { %v3758_v6 = vsel %vm637_vm0, %v3696_v2, 0  ;;  %v3503_v7 = vpop.f32.mrf.mxu2  ;;  %3710 = vmatpush.bf16.msra.mxu1 %v3701_v5 }
 0x804   : > { %v3504_v9 = vadd.f32 %v8089_v1, %v3503_v7  ;;  %v3528_v10 = vpop.f32.mrf.mxu3  ;;  %3767 = vmatpush.bf16.msrb.mxu0 %v3758_v6 }
 0x805   : > { %v3529_v12 = vadd.f32 %v8090_v4, %v3528_v10  ;;  %v3480_v13 = vpop.f32.mrf.mxu1  ;;  %v6688_v10 = vld [vmem:[%s10108_s10 + $0x10] sm:$0xf] }
 0x806   : > { %v3694_v25 = vpack.c.bf16 %v3504_v9, %v3504_v9  ;;  %v3555_v15 = vpop.f32.mrf.mxu0  ;;  %v6689_v13 = vld [vmem:[%s10108_s10 + $0x14] sm:$0xf] }
 0x807   : > { %v3695_v16 = vpack.c.bf16 %v3529_v12, %v3529_v12  ;;  %v3786_v12 = vsel %vm637_vm0, %v6688_v10, 0  ;;  %v6690_v15 = vld [vmem:[%s10108_s10 + $0x18] sm:$0xf] }
 0x808   : > { %v3720_v17 = vsel %vm637_vm0, %v3694_v25, 0  ;;  %3795 = vmatpush.bf16.msrb.mxu1 %v3786_v12  ;;  %v3805_v25 = vsel %vm637_vm0, %v6689_v13, 0  ;;  %v7861_v13 = vld [vmem:[%s10112_s14 + $0x10c] sm:$0xf] }
 0x809   : > { %v3739_v18 = vsel %vm637_vm0, %v3695_v16, 0  ;;  %3729 = vmatpush.bf16.msra.mxu2 %v3720_v17  ;;  %v3824_v16 = vsel %vm637_vm0, %v6690_v15, 0  ;;  %v6691_v17 = vld [vmem:[%s10108_s10 + $0x1c] sm:$0xf] }
 0x80a   : > { %3748 = vmatpush.bf16.msra.mxu3 %v3739_v18  ;;  %v3843_v18 = vsel %vm637_vm0, %v6691_v17, 0  ;;  %v6815_v17 = vld [vmem:[%s10112_s14 + $0x190] sm:$0xf] }
 0x80b   : > { %v3505_v19 = vpop.f32.mrf.mxu2  ;;  %3852 = vmatpush.bf16.msra.mxu0 %v3843_v18  ;;  %v7886_v18 = vld [vmem:[%s10112_s14 + $0x1cc] sm:$0xf0] }
 0x80c   : > { %v3530_v14 = vpop.f32.mrf.mxu3 }
 0x80d   : > { %3814 = vmatpush.bf16.msrb.mxu2 %v3805_v25  ;;  %v6745_v25 = vld [vmem:[%s10112_s14 + $0x148] sm:$0xf0] }
 0x80e   : > { %3833 = vmatpush.bf16.msrb.mxu3 %v3824_v16  ;;  %v6748_v15 = vor.u32 %v7861_v13, %v6745_v25 }
 0x877   : > { %v3580_v21 = vpop.f32.mrf.mxu1 }
 0x878   : > { %v3641_v22 = vmul.f32 0.35355338, %v3580_v21  ;;  %v3637_v23 = vpop.f32.mrf.mxu0 }
 0x879   : > { %v3644_v8 = vmul.f32 0.35355338, %v3637_v23 }
 0x87a   : > { %v3645_v26 = vsel %vm633_vm1, %v3641_v22, -inf }
 0x87b   : > { %3646 = vmax.xlane.f32.xlu2 %v3645_v26  ;;  %v3654_v36 = vsel %vm633_vm1, %v3644_v8, -inf }
 0x87f   : > { %v3582_v27 = vpop.f32.mrf.mxu1 }
 0x880   : > { %v3639_v24 = vpop.f32.mrf.mxu0 }
 0x883   : > { %v3599_v28 = vpop.f32.mrf.mxu2 }
 0x884   : > { %v3642_v29 = vmul.f32 0.35355338, %v3599_v28  ;;  %v3618_v30 = vpop.f32.mrf.mxu3 }
 0x885   : > { %v3643_v31 = vmul.f32 0.35355338, %v3618_v30 }
 0x886   : > { %v3648_v32 = vsel %vm633_vm1, %v3642_v29, -inf }
 0x887   : > { %v3651_v33 = vsel %vm633_vm1, %v3643_v31, -inf  ;;  %3649 = vmax.xlane.f32.xlu0 %v3648_v32 }
 0x888   : > { %3652 = vmax.xlane.f32.xlu1 %v3651_v33 }
 0x88b   : > { %v3601_v34 = vpop.f32.mrf.mxu2 }
 0x88c   : > { %v3620_v35 = vpop.f32.mrf.mxu3 }
 0x88f   : > { %3655 = vmax.xlane.f32.xlu0 %v3654_v36 }
 0x8ee   : > { %v3647_v37 = vpop.xlane.xlu2 %3646 }
 0x8ef   : > { %v3657_v38 = vsub.f32 %v3641_v22, %v3647_v37 }
 0x8f1   : > { %v3661_v20 = vmul.f32 1.442695, %v3657_v38 }
 0x8f3   : > { %8119 = vpow2.f32 %v3661_v20 }
 0x8f9   : > { %v8120_v39 = vpop.eup %8119 }
 0x8fa   : > { %v3650_v40 = vpop.xlane.xlu0 %3649  ;;  %v3669_v41 = vsel %vm633_vm1, %v8120_v39, 0.0 }
 0x8fb   : > { %v3653_v42 = vpop.xlane.xlu1 %3652  ;;  %v3658_v43 = vsub.f32 %v3642_v29, %v3650_v40  ;;  %3670 = vadd.xlane.f32.xlu0 %v3669_v41  ;;  %v8091_v41 = vld [vmem:[%s10109_s11 + $0x1] ss:$0 sm:$0xff] }
 0x8fc   : > { %v3659_v44 = vsub.f32 %v3643_v31, %v3653_v42 }
 0x8fd   : > { %v3663_v45 = vmul.f32 1.442695, %v3658_v43 }
 0x8fe   : > { %v3665_v46 = vmul.f32 1.442695, %v3659_v44 }
 0x8ff   : > { %8121 = vpow2.f32 %v3663_v45 }
 0x900   : > { %8123 = vpow2.f32 %v3665_v46 }
 0x902   : > { %v3656_v47 = vpop.xlane.xlu0 %3655 }
 0x903   : > { %v3660_v48 = vsub.f32 %v3644_v8, %v3656_v47 }
 0x905   : > { %v8122_v49 = vpop.eup %8121  ;;  %v3667_v50 = vmul.f32 1.442695, %v3660_v48 }
 0x906   : > { %v8124_v51 = vpop.eup %8123  ;;  %v3672_v52 = vsel %vm633_vm1, %v8122_v49, 0.0 }
 0x907   : > { %8125 = vpow2.f32 %v3667_v50  ;;  %3673 = vadd.xlane.f32.xlu1 %v3672_v52  ;;  %v3675_v53 = vsel %vm633_vm1, %v8124_v51, 0.0 }
 0x908   : > { %3676 = vadd.xlane.f32.xlu2 %v3675_v53 }
 0x90d   : > { %v8126_v54 = vpop.eup %8125 }
 0x90e   : > { %v3678_v55 = vsel %vm633_vm1, %v8126_v54, 0.0 }
 0x90f   : > { %3679 = vadd.xlane.f32.xlu1 %v3678_v55  ;;  %v7876_v55 = vld [vmem:[%s10112_s14 + $0x184] sm:$0xf] }
 0x96e   : > { %v3671_v56 = vpop.xlane.xlu0 %3670 }
 0x96f   : > { %8127 = vrcp.f32 %v3671_v56 }
 0x975   : > { %v8128_v57 = vpop.eup %8127 }
 0x976   : > { %v3685_v58 = vmul.f32 %v8128_v57, %v8120_v39  ;;  %v6801_v57 = vld [vmem:[%s10112_s14 + $0x1c0] sm:$0xf0] }
 0x978   : > { %v3689_v59 = vpack.c.bf16 %v3685_v58, %v3685_v58  ;;  %v6807_v58 = vld [vmem:[%s10112_s14 + $0x188] sm:$0xf] }
 0x97a   : > { %v3674_v60 = vpop.xlane.xlu1 %3673  ;;  %6684 = vmatmul.msk.bf16.vlgmr.msra.gmra.mxu1 %vm633_vm1, %v3689_v59  ;;  %v7885_v59 = vld [vmem:[%s10112_s14 + $0x1c4] sm:$0xf0] }
 0x97b   : > { %8129 = vrcp.f32 %v3674_v60  ;;  %v3677_v61 = vpop.xlane.xlu2 %3676  ;;  %v6804_v60 = vor.u32 %v7876_v55, %v6801_v57  ;;  %v7880_v55 = vld [vmem:[%s10112_s14 + $0x1a4] sm:$0xf] }
 0x97c   : > { %8131 = vrcp.f32 %v3677_v61  ;;  %v6808_v61 = vor.u32 %v7885_v59, %v6807_v58  ;;  %v7889_v58 = vld [vmem:[%s10112_s14 + $0x1e4] sm:$0xf0]  ;;  %v7881_v59 = vld [vmem:[%s10112_s14 + $0x1ac] sm:$0xf] }
 0x981   : > { %v8130_v62 = vpop.eup %8129 }
 0x982   : > { %v8132_v63 = vpop.eup %8131  ;;  %v3686_v0 = vmul.f32 %v8130_v62, %v8122_v49  ;;  %v3680_v1 = vpop.xlane.xlu1 %3679  ;;  %v7877_v62 = vld [vmem:[%s10112_s14 + $0x18c] sm:$0xf] }
 0x983   : > { %v3687_v2 = vmul.f32 %v8132_v63, %v8124_v51  ;;  %8133 = vrcp.f32 %v3680_v1  ;;  %v6809_v63 = vld [vmem:[%s10112_s14 + $0x1c8] sm:$0xf0]  ;;  %v6735_v1 = vld [vmem:[%s10112_s14 + $0x100] sm:$0xf] }
 0x984   : > { %v3690_v4 = vpack.c.bf16 %v3686_v0, %v3686_v0  ;;  %v6812_v0 = vor.u32 %v7877_v62, %v6809_v63 }
 0x985   : > { %v3691_v5 = vpack.c.bf16 %v3687_v2, %v3687_v2  ;;  %v7868_v2 = vld [vmem:[%s10112_s14 + $0x13c] sm:$0xf0] }
 0x986   : > { %6685 = vmatmul.msk.bf16.vlgmr.msra.gmra.mxu2 %vm633_vm1, %v3690_v4  ;;  %v7860_v4 = vld [vmem:[%s10112_s14 + $0x104] sm:$0xf] }
 0x987   : > { %6686 = vmatmul.msk.bf16.vlgmr.msra.gmra.mxu3 %vm633_vm1, %v3691_v5  ;;  %4159 = vmatpush.bf16.msra.mxu2 %v6804_v60  ;;  %v6736_v5 = vor.u32 %v7868_v2, %v6735_v1  ;;  %v6841_v60 = vld [vmem:[%s10112_s14 + $0x1e8] sm:$0xf0]  ;;  %v7872_v1 = vld [vmem:[%s10112_s14 + $0x15c] sm:$0xf0] }
 0x988   : > { %4172 = vmatpush.bf16.msra.mxu3 %v6808_v61 }
 0x989   : > { %v8134_v6 = vpop.eup %8133 }
 0x98a   : > { %v3688_v7 = vmul.f32 %v8134_v6, %v8126_v54  ;;  %v6799_v54 = vld [vmem:[%s10112_s14 + $0x180] sm:$0xf]  ;;  %v6737_v6 = vld [vmem:[%s10112_s14 + $0x140] sm:$0xf0] }
 0x98b   : > { %v6740_v10 = vor.u32 %v7860_v4, %v6737_v6  ;;  %v6844_v4 = vor.u32 %v7881_v59, %v6841_v60  ;;  %v6769_v6 = vld [vmem:[%s10112_s14 + $0x160] sm:$0xf0]  ;;  %v7911_v59 = vld [vmem:[%s10114_s16 + $0x498] sm:$0xff]  ;;  %v7894_v60 = vld [vmem:[%s10114_s16 + $0x410] sm:$0xff] }
 0x98c   : > { %v3692_v9 = vpack.c.bf16 %v3688_v7, %v3688_v7  ;;  %v6743_v7 = vld [vmem:[%s10112_s14 + $0x108] sm:$0xf] }
 0x98d   : > { %4160 = vmatpush.bf16.msra.mxu2 %v6740_v10  ;;  %v7865_v10 = vld [vmem:[%s10112_s14 + $0x12c] sm:$0xf] }
 0x98e   : > { %6687 = vmatmul.msk.bf16.vlgmr.msrb.gmra.mxu0 %vm633_vm1, %v3692_v9  ;;  %v7869_v9 = vld [vmem:[%s10112_s14 + $0x144] sm:$0xf0] }
 0x98f   : > { %4185 = vmatpush.bf16.msrb.mxu0 %v6812_v0  ;;  %v6744_v12 = vor.u32 %v7869_v9, %v6743_v7  ;;  %v6767_v0 = vld [vmem:[%s10112_s14 + $0x120] sm:$0xf]  ;;  %v6775_v7 = vld [vmem:[%s10112_s14 + $0x128] sm:$0xf] }
 0x990   : > { %v7873_v9 = vld [vmem:[%s10112_s14 + $0x164] sm:$0xf0]  ;;  %v6768_v13 = vor.u32 %v7872_v1, %v6767_v0 }
 0x991   : > { %4173 = vmatpush.bf16.msra.mxu3 %v6744_v12  ;;  %v6777_v12 = vld [vmem:[%s10112_s14 + $0x168] sm:$0xf0] }
 0x992   : > { %v7893_v0 = vld [vmem:[%s10114_s16 + $0x408] sm:$0xff] }
 0x993   : > { %4186 = vmatpush.bf16.msrb.mxu0 %v6748_v15  ;;  %v6776_v15 = vor.u32 %v7873_v9, %v6775_v7  ;;  %v7917_v1 = vld [vmem:[%s10114_s16 + $0x4c8] sm:$0xff]  ;;  %v7931_v7 = vld [vmem:[%s10114_s16 + $0x538] sm:$0xff] }
 0x994   : > { %v7955_v9 = vld [vmem:[%s10114_s16 + $0x5f8] sm:$0xff] }
 0x9f7   : > { %v3712_v19 = vpop.f32.mrf.mxu1 }
 0x9f8   : > { %v3773_v14 = vpack.c.bf16 %v3712_v19, %v3712_v19  ;;  %v7878_v19 = vld [vmem:[%s10112_s14 + $0x194] sm:$0xf] }
 0x9fa   : > { %6692 = vmatmul.msk.bf16.vlgmr.msrb.gmra.mxu1 %vm633_vm1, %v3773_v14 }
 0x9ff   : > { %v3714_v21 = vpop.f32.mrf.mxu1 }
 0xa00   : > { %v6816_v21 = vor.u32 %v7886_v18, %v6815_v17  ;;  %v6847_v17 = vld [vmem:[%s10112_s14 + $0x1b0] sm:$0xf] }
 0xa01   : > { %v7890_v18 = vld [vmem:[%s10112_s14 + $0x1ec] sm:$0xf0] }
 0xa09   : > { %v3731_v22 = vpop.f32.mrf.mxu2 }
 0xa0a   : > { %v3774_v23 = vpack.c.bf16 %v3731_v22, %v3731_v22  ;;  %v3750_v26 = vpop.f32.mrf.mxu3  ;;  %v6817_v22 = vld [vmem:[%s10112_s14 + $0x1d0] sm:$0xf0] }
 0xa0b   : > { %v3775_v27 = vpack.c.bf16 %v3750_v26, %v3750_v26  ;;  %v3769_v24 = vpop.f32.mrf.mxu0  ;;  %v7887_v26 = vld [vmem:[%s10112_s14 + $0x1d4] sm:$0xf0] }
 0xa0c   : > { %v3776_v28 = vpack.c.bf16 %v3769_v24, %v3769_v24  ;;  %6693 = vmatmul.msk.bf16.vlgmr.msrb.gmra.mxu2 %vm633_vm1, %v3774_v23  ;;  %v6823_v23 = vld [vmem:[%s10112_s14 + $0x198] sm:$0xf] }
 0xa0d   : > { %6694 = vmatmul.msk.bf16.vlgmr.msrb.gmra.mxu3 %vm633_vm1, %v3775_v27  ;;  %v6820_v27 = vor.u32 %v7878_v19, %v6817_v22  ;;  %v6824_v24 = vor.u32 %v7887_v26, %v6823_v23  ;;  %v7882_v19 = vld [vmem:[%s10112_s14 + $0x1b4] sm:$0xf]  ;;  %v7891_v22 = vld [vmem:[%s10112_s14 + $0x1f4] sm:$0xf0]  ;;  %v7883_v23 = vld [vmem:[%s10112_s14 + $0x1bc] sm:$0xf] }
 0xa0e   : > { %6695 = vmatmul.msk.bf16.vlgmr.msra.gmra.mxu0 %vm633_vm1, %v3776_v28  ;;  %v7879_v28 = vld [vmem:[%s10112_s14 + $0x19c] sm:$0xf] }
 0xa0f   : > { %4211 = vmatpush.bf16.msrb.mxu2 %v6820_v27  ;;  %4224 = vmatpush.bf16.msrb.mxu3 %v6824_v24  ;;  %v6857_v26 = vld [vmem:[%s10112_s14 + $0x1f8] sm:$0xf0]  ;;  %v6848_v27 = vor.u32 %v7890_v18, %v6847_v17  ;;  %v7938_v17 = vld [vmem:[%s10114_s16 + $0x570] sm:$0xff] }
 0xa10   : > { %v7946_v18 = vld [vmem:[%s10114_s16 + $0x5b0] sm:$0xff] }
 0xa11   : > { %v3733_v29 = vpop.f32.mrf.mxu2 }
 0xa12   : > { %v3752_v30 = vpop.f32.mrf.mxu3  ;;  %v6825_v29 = vld [vmem:[%s10112_s14 + $0x1d8] sm:$0xf0] }
 0xa13   : > { %v3771_v31 = vpop.f32.mrf.mxu0  ;;  %v6751_v30 = vld [vmem:[%s10112_s14 + $0x110] sm:$0xf] }
 0xa77   : > { %v3797_v32 = vpop.f32.mrf.mxu1 }
 0xa78   : > { %v3858_v35 = vsel %vm702_vm2, %v3797_v32, 0.0  ;;  %v6828_v32 = vor.u32 %v7879_v28, %v6825_v29  ;;  %v6783_v28 = vld [vmem:[%s10112_s14 + $0x130] sm:$0xf] }
 0xa79   : > { %v7874_v29 = vld [vmem:[%s10112_s14 + $0x16c] sm:$0xf0] }
 0xa7a   : > { %4237 = vmatpush.bf16.msra.mxu0 %v6828_v32  ;;  %v7866_v32 = vld [vmem:[%s10112_s14 + $0x134] sm:$0xf] }
 0xa7f   : > { %v3799_v33 = vpop.f32.mrf.mxu1 }
 0xa80   : > { %v7870_v33 = vld [vmem:[%s10112_s14 + $0x14c] sm:$0xf0] }
 0xa8b   : > { %v3854_v8 = vpop.f32.mrf.mxu0 }
 0xa8c   : > { %v3863_v42 = vsel %vm702_vm2, %v3854_v8, 0.0  ;;  %v7862_v8 = vld [vmem:[%s10112_s14 + $0x114] sm:$0xf] }
 0xa8f   : > { %v3816_v34 = vpop.f32.mrf.mxu2 }
 0xa90   : > { %v3859_v36 = vsel %vm702_vm2, %v3816_v34, 0.0  ;;  %v3835_v37 = vpop.f32.mrf.mxu3  ;;  %v6752_v34 = vor.u32 %v7870_v33, %v6751_v30  ;;  %v6785_v33 = vld [vmem:[%s10112_s14 + $0x170] sm:$0xf0] }
 0xa91   : > { %v3860_v38 = vadd.f32 %v3859_v36, %v3858_v35  ;;  %v3861_v20 = vsel %vm702_vm2, %v3835_v37, 0.0  ;;  %v6753_v35 = vld [vmem:[%s10112_s14 + $0x150] sm:$0xf0]  ;;  %v6759_v36 = vld [vmem:[%s10112_s14 + $0x118] sm:$0xf] }
 0xa92   : > { %v7871_v37 = vld [vmem:[%s10112_s14 + $0x154] sm:$0xf0] }
 0xa93   : > { %v3862_v39 = vadd.f32 %v3861_v20, %v3860_v38  ;;  %v3856_v40 = vpop.f32.mrf.mxu0  ;;  %v6756_v38 = vor.u32 %v7862_v8, %v6753_v35  ;;  %v6760_v20 = vor.u32 %v7871_v37, %v6759_v36  ;;  %v6791_v8 = vld [vmem:[%s10112_s14 + $0x138] sm:$0xf]  ;;  %v7867_v35 = vld [vmem:[%s10112_s14 + $0x13c] sm:$0xf]  ;;  %v6784_v37 = vor.u32 %v7874_v29, %v6783_v28 }
 0xa94   : > { %v6761_v40 = vld [vmem:[%s10112_s14 + $0x158] sm:$0xf0] }
 0xa95   : > { %v3864_v43 = vadd.f32 %v3863_v42, %v3862_v39  ;;  %v7863_v39 = vld [vmem:[%s10112_s14 + $0x11c] sm:$0xf]  ;;  %4212 = vmatpush.bf16.msrb.mxu2 %v6756_v38  ;;  %4225 = vmatpush.bf16.msrb.mxu3 %v6760_v20  ;;  %v6788_v38 = vor.u32 %v7866_v32, %v6785_v33 }
 0xa96   : > { %v6793_v36 = vld [vmem:[%s10112_s14 + $0x178] sm:$0xf0] }
 0xa97   : > { %v3818_v44 = vpop.f32.mrf.mxu2  ;;  %v3870_v45 = vadd.f32 %v8091_v41, %v3864_v43  ;;  %v6764_v41 = vor.u32 %v7863_v39, %v6761_v40  ;;  %v6796_v39 = vor.u32 %v7867_v35, %v6793_v36  ;;  %v7899_v40 = vld [vmem:[%s10114_s16 + $0x438] sm:$0xff]  ;;  %v7934_v35 = vld [vmem:[%s10114_s16 + $0x550] sm:$0xff] }
 0xa98   : > { %v3837_v46 = vpop.f32.mrf.mxu3  ;;  %v7927_v28 = vld [vmem:[%s10114_s16 + $0x518] sm:$0xff]  ;;  %v7942_v36 = vld [vmem:[%s10114_s16 + $0x590] sm:$0xff] }
 0xa99   : > { %v3871_v47 = vadd.f32 %v3870_v45, %v9268_v3  ;;  %v7884_v3 = vld [vmem:[%s10112_s14 + $0x1bc] sm:$0xf0]  ;;  %4238 = vmatpush.bf16.msra.mxu0 %v6764_v41  ;;  %v7923_v41 = vld [vmem:[%s10114_s16 + $0x4f8] sm:$0xff] }
 0xa9a   : > { %v6800_v56 = vor.u32 %v7884_v3, %v6799_v54  ;;  %v6831_v54 = vld [vmem:[%s10112_s14 + $0x1a0] sm:$0xf]  ;;  %v7951_v29 = vld [vmem:[%s10114_s16 + $0x5d8] sm:$0xff] }
 0xa9b   : > { %v3876_v48 = vsel %vm702_vm2, %v3871_v47, 0.0  ;;  %v7888_v3 = vld [vmem:[%s10112_s14 + $0x1dc] sm:$0xf0]  ;;  %v7935_v32 = vld [vmem:[%s10114_s16 + $0x558] sm:$0xff] }
 0xa9c   : > { %3877 = vadd.xlane.f32.xlu2 %v3876_v48  ;;  %4146 = vmatpush.bf16.msra.mxu1 %v6800_v56  ;;  %v8092_v48 = vld [vmem:[%s10110_s12 + $0x1] ss:$0 sm:$0xff]  ;;  %v6833_v56 = vld [vmem:[%s10112_s14 + $0x1e0] sm:$0xf0]  ;;  %v6832_v62 = vor.u32 %v7888_v3, %v6831_v54  ;;  %v7943_v33 = vld [vmem:[%s10114_s16 + $0x598] sm:$0xff] }
 0xa9d   : > { %v6836_v63 = vor.u32 %v7880_v55, %v6833_v56  ;;  %v7920_v54 = vld [vmem:[%s10114_s16 + $0x4e0] sm:$0xff]  ;;  %v7895_v56 = vld [vmem:[%s10114_s16 + $0x418] sm:$0xff] }
 0xa9e   : > { %v7904_v3 = vld [vmem:[%s10114_s16 + $0x460] sm:$0xff] }
 0xa9f   : > { %v7912_v55 = vld [vmem:[%s10114_s16 + $0x4a0] sm:$0xff] }
 0xaa0   : > { %4147 = vmatpush.bf16.msra.mxu1 %v6736_v5  ;;  %v7864_v5 = vld [vmem:[%s10112_s14 + $0x124] sm:$0xf] }
 0xaa1   : > { %v6772_v25 = vor.u32 %v7864_v5, %v6769_v6  ;;  %v7892_v5 = vld [vmem:[%s10114_s16 + $0x400] sm:$0xff] }
 0xaa2   : > { %v7916_v6 = vld [vmem:[%s10114_s16 + $0x4c0] sm:$0xff] }
 0xaa4   : > { %4198 = vmatpush.bf16.msrb.mxu1 %v6816_v21  ;;  %v6855_v21 = vld [vmem:[%s10112_s14 + $0x1b8] sm:$0xf] }
 0xaa5   : > { %v6856_v30 = vor.u32 %v7891_v22, %v6855_v21  ;;  %v7937_v21 = vld [vmem:[%s10114_s16 + $0x568] sm:$0xff] }
 0xaa6   : > { %v7945_v22 = vld [vmem:[%s10114_s16 + $0x5a8] sm:$0xff] }
 0xaa8   : > { %4199 = vmatpush.bf16.msrb.mxu1 %v6752_v34  ;;  %v7875_v34 = vld [vmem:[%s10112_s14 + $0x174] sm:$0xf0] }
 0xaa9   : > { %v6792_v20 = vor.u32 %v7875_v34, %v6791_v8  ;;  %v7925_v8 = vld [vmem:[%s10114_s16 + $0x508] sm:$0xff] }
 0xaaa   : > { %v7949_v34 = vld [vmem:[%s10114_s16 + $0x5c8] sm:$0xff] }
 0xb0f   : > { %v3878_v49 = vpop.xlane.xlu2 %3877 }
 0xb10   : > { %v3879_v50 = vmul.f32 %v3878_v49, %v8550_v11 }
 0xb12   : > { %v9398_v51 = vsub.f32 %v3871_v47, %v3879_v50  ;;  %v8093_v50 = vld [vmem:[%s10111_s13 + $0x1] ss:$0 sm:$0xff] }
 0xb14   : > { %v3881_v52 = vmul.f32 %v9398_v51, %v9398_v51 }
 0xb16   : > { %v3882_v53 = vsel %vm702_vm2, %v3881_v52, 0.0 }
 0xb17   : > { %3883 = vadd.xlane.f32.xlu0 %v3882_v53 }
 0xb8a   : > { %v3884_v16 = vpop.xlane.xlu0 %3883 }
 0xb8b   : > { %v3885_v14 = vmul.f32 %v3884_v16, %v8550_v11  ;;  %v6780_v16 = vor.u32 %v7865_v10, %v6777_v12  ;;  %v7900_v10 = vld [vmem:[%s10114_s16 + $0x440] sm:$0xff] }
 0xb8c   : > { %v7908_v12 = vld [vmem:[%s10114_s16 + $0x480] sm:$0xff] }
 0xb8d   : > { %v3886_v31 = vadd.f32 1e-05, %v3885_v14  ;;  %v6849_v14 = vld [vmem:[%s10112_s14 + $0x1f0] sm:$0xf0] }
 0xb8e   : > { %v6852_v24 = vor.u32 %v7882_v19, %v6849_v14  ;;  %v7929_v19 = vld [vmem:[%s10114_s16 + $0x528] sm:$0xff] }
 0xb8f   : > { %8135 = vrsqrt.f32 %v3886_v31  ;;  %vm3893_vm11 = vweird.f32 %v3886_v31  ;;  %v7953_v14 = vld [vmem:[%s10114_s16 + $0x5e8] sm:$0xff] }
 0xb95   : > { %v8136_v42 = vpop.eup %8135 }
 0xb96   : > { %v3888_v43 = vmul.f32 %v8136_v42, %v3886_v31  ;;  %vm3894_vm10 = vweird.f32 %v8136_v42  ;;  %v6860_v31 = vor.u32 %v7883_v23, %v6857_v26  ;;  %v7928_v23 = vld [vmem:[%s10114_s16 + $0x520] sm:$0xff] }
 0xb97   : > { %vm3895_vm12 = vmor %vm3893_vm11, %vm3894_vm10  ;;  %v7952_v26 = vld [vmem:[%s10114_s16 + $0x5e0] sm:$0xff] }
 0xb98   : > { %v3889_v44 = vmul.f32 %v8136_v42, %v3888_v43  ;;  %v7915_v43 = vld [vmem:[%s10114_s16 + $0x4b8] sm:$0xff] }
 0xb9a   : > { %v3890_v45 = vmul.f32 0.5, %v3889_v44  ;;  %v7898_v44 = vld [vmem:[%s10114_s16 + $0x430] sm:$0xff] }
 0xb9c   : > { %v3891_v46 = vsub.f32 1.5, %v3890_v45  ;;  %v7922_v45 = vld [vmem:[%s10114_s16 + $0x4f0] sm:$0xff] }
 0xb9e   : > { %v3892_v47 = vmul.f32 %v8136_v42, %v3891_v46  ;;  %v7906_v46 = vld [vmem:[%s10114_s16 + $0x470] sm:$0xff] }
 0xba0   : > { %v3896_v49 = vsel %vm3895_vm12, %v8136_v42, %v3892_v47  ;;  %v7907_v42 = vld [vmem:[%s10114_s16 + $0x478] sm:$0xff]  ;;  %v7914_v47 = vld [vmem:[%s10114_s16 + $0x4b0] sm:$0xff] }
 0xba1   : > { %v3897_v52 = vmul.f32 %v3896_v49, %v9398_v51  ;;  %v6839_v51 = vld [vmem:[%s10112_s14 + $0x1a8] sm:$0xf] }
 0xba2   : > { %v6840_v2 = vor.u32 %v7889_v58, %v6839_v51  ;;  %v7921_v49 = vld [vmem:[%s10114_s16 + $0x4e8] sm:$0xff]  ;;  %v7919_v51 = vld [vmem:[%s10114_s16 + $0x4d8] sm:$0xff] }
 0xba3   : > { %v3901_v53 = vmul.f32 %v8092_v48, %v3897_v52  ;;  %v7897_v48 = vld [vmem:[%s10114_s16 + $0x428] sm:$0xff]  ;;  %v7903_v58 = vld [vmem:[%s10114_s16 + $0x458] sm:$0xff] }
 0xba4   : > { %v7913_v52 = vld [vmem:[%s10114_s16 + $0x4a8] sm:$0xff] }
 0xba5   : > { %v9522_v57 = vadd.f32 %v8093_v50, %v3901_v53  ;;  %v7905_v50 = vld [vmem:[%s10114_s16 + $0x468] sm:$0xff]  ;;  %v7896_v53 = vld [vmem:[%s10114_s16 + $0x420] sm:$0xff] }
 0xba7   : > { %v9535_v61 = vpack.c.bf16 %v9522_v57, %v9522_v57 }
 0xba9   : > { %6861 = vmatmul.msk.bf16.vlgmr.msra.gmra.mxu1 %vm702_vm2, %v9535_v61  ;;  %6862 = vmatmul.msk.bf16.vlgmr.msra.gmra.mxu2 %vm702_vm2, %v9535_v61 }
 0xbaa   : > { %6863 = vmatmul.msk.bf16.vlgmr.msra.gmra.mxu3 %vm702_vm2, %v9535_v61  ;;  %6864 = vmatmul.msk.bf16.vlgmr.msrb.gmra.mxu0 %vm702_vm2, %v9535_v61 }
 0xbab   : > { %4250 = vmatpush.bf16.msra.mxu1 %v6832_v62  ;;  %4263 = vmatpush.bf16.msra.mxu2 %v6836_v63  ;;  %v7918_v62 = vld [vmem:[%s10114_s16 + $0x4d0] sm:$0xff] }
 0xbac   : > { %4276 = vmatpush.bf16.msra.mxu3 %v6840_v2  ;;  %4289 = vmatpush.bf16.msrb.mxu0 %v6844_v4  ;;  %v7902_v63 = vld [vmem:[%s10114_s16 + $0x450] sm:$0xff]  ;;  %v7901_v2 = vld [vmem:[%s10114_s16 + $0x448] sm:$0xff] }
 0xbad   : > { %v7909_v4 = vld [vmem:[%s10114_s16 + $0x488] sm:$0xff] }
 0xbaf   : > { %4251 = vmatpush.bf16.msra.mxu1 %v6768_v13  ;;  %4264 = vmatpush.bf16.msra.mxu2 %v6772_v25  ;;  %v7939_v13 = vld [vmem:[%s10114_s16 + $0x578] sm:$0xff] }
 0xbb0   : > { %4277 = vmatpush.bf16.msra.mxu3 %v6776_v15  ;;  %4290 = vmatpush.bf16.msrb.mxu0 %v6780_v16  ;;  %v7947_v25 = vld [vmem:[%s10114_s16 + $0x5b8] sm:$0xff]  ;;  %v7930_v15 = vld [vmem:[%s10114_s16 + $0x530] sm:$0xff] }
 0xbb1   : > { %v7954_v16 = vld [vmem:[%s10114_s16 + $0x5f0] sm:$0xff] }
 0xbb9   : > { %6865 = vmatmul.msk.bf16.vlgmr.msrb.gmra.mxu1 %vm702_vm2, %v9535_v61  ;;  %6866 = vmatmul.msk.bf16.vlgmr.msrb.gmra.mxu2 %vm702_vm2, %v9535_v61 }
 0xbba   : > { %6867 = vmatmul.msk.bf16.vlgmr.msrb.gmra.mxu3 %vm702_vm2, %v9535_v61  ;;  %6868 = vmatmul.msk.bf16.vlgmr.msra.gmra.mxu0 %vm702_vm2, %v9535_v61 }
 0xbbb   : > { %4302 = vmatpush.bf16.msrb.mxu1 %v6848_v27  ;;  %4315 = vmatpush.bf16.msrb.mxu2 %v6852_v24  ;;  %v7936_v27 = vld [vmem:[%s10114_s16 + $0x560] sm:$0xff] }
 0xbbc   : > { %4328 = vmatpush.bf16.msrb.mxu3 %v6856_v30  ;;  %4341 = vmatpush.bf16.msra.mxu0 %v6860_v31  ;;  %v7944_v24 = vld [vmem:[%s10114_s16 + $0x5a0] sm:$0xff]  ;;  %v7926_v30 = vld [vmem:[%s10114_s16 + $0x510] sm:$0xff] }
 0xbbd   : > { %v7950_v31 = vld [vmem:[%s10114_s16 + $0x5d0] sm:$0xff] }
 0xbbf   : > { %4303 = vmatpush.bf16.msrb.mxu1 %v6784_v37  ;;  %4316 = vmatpush.bf16.msrb.mxu2 %v6788_v38  ;;  %v7924_v37 = vld [vmem:[%s10114_s16 + $0x500] sm:$0xff] }
 0xbc0   : > { %4329 = vmatpush.bf16.msrb.mxu3 %v6792_v20  ;;  %4342 = vmatpush.bf16.msra.mxu0 %v6796_v39  ;;  %v7948_v38 = vld [vmem:[%s10114_s16 + $0x5c0] sm:$0xff]  ;;  %v7933_v20 = vld [vmem:[%s10114_s16 + $0x548] sm:$0xff] }
 0xbc1   : > { %v7941_v39 = vld [vmem:[%s10114_s16 + $0x588] sm:$0xff] }
 0xbc9   : > { %6869 = vmatmul.msk.bf16.vlgmr.msra.gmra.mxu1 %vm702_vm2, %v9535_v61  ;;  %6870 = vmatmul.msk.bf16.vlgmr.msra.gmra.mxu2 %vm702_vm2, %v9535_v61 }
 0xbca   : > { %6871 = vmatmul.msk.bf16.vlgmr.msra.gmra.mxu3 %vm702_vm2, %v9535_v61  ;;  %6872 = vmatmul.msk.bf16.vlgmr.msrb.gmra.mxu0 %vm702_vm2, %v9535_v61 }
 0xbcb   : > { %5410 = vmatpush.bf16.msra.mxu1 %v7899_v40  ;;  %5449 = vmatpush.bf16.msrb.mxu0 %v7923_v41  ;;  %v7932_v40 = vld [vmem:[%s10114_s16 + $0x540] sm:$0xff] }
 0xbcc   : > { %5423 = vmatpush.bf16.msra.mxu2 %v7907_v42  ;;  %5436 = vmatpush.bf16.msra.mxu3 %v7915_v43  ;;  %v7940_v41 = vld [vmem:[%s10114_s16 + $0x580] sm:$0xff]  ;;  %v9836_v42 = vld [vmem:[%s10113_s15 + $0x10] sm:$0xff] }
 0xbcd   : > { %v3945_v43 = vperm.slane %v9836_v42, 0 }
 0xbcf   : > { %5411 = vmatpush.bf16.msra.mxu1 %v7898_v44  ;;  %5450 = vmatpush.bf16.msrb.mxu0 %v7922_v45  ;;  %v3948_v44 = vperm.slane %v9836_v42, 3 }
 0xbd0   : > { %5424 = vmatpush.bf16.msra.mxu2 %v7906_v46  ;;  %5437 = vmatpush.bf16.msra.mxu3 %v7914_v47 }
 0xbd3   : > { %5412 = vmatpush.bf16.msra.mxu1 %v7897_v48  ;;  %5451 = vmatpush.bf16.msrb.mxu0 %v7921_v49 }
 0xbd4   : > { %5425 = vmatpush.bf16.msra.mxu2 %v7905_v50  ;;  %5438 = vmatpush.bf16.msra.mxu3 %v7913_v52  ;;  %v3946_v50 = vperm.slane %v9836_v42, 1 }
 0xbd7   : > { %5413 = vmatpush.bf16.msra.mxu1 %v7896_v53  ;;  %5452 = vmatpush.bf16.msrb.mxu0 %v7920_v54  ;;  %v3947_v53 = vperm.slane %v9836_v42, 2  ;;  %v7963_v54 = vld [vmem:[%s10114_s16 + $0x638] sm:$0xff] }
 0xbd8   : > { %5426 = vmatpush.bf16.msra.mxu2 %v7904_v3  ;;  %5439 = vmatpush.bf16.msra.mxu3 %v7912_v55  ;;  %v7987_v55 = vld [vmem:[%s10114_s16 + $0x6f8] sm:$0xff] }
 0xbd9   : > { %6873 = vmatmul.msk.bf16.vlgmr.msrb.gmra.mxu1 %vm702_vm2, %v9535_v61  ;;  %6874 = vmatmul.msk.bf16.vlgmr.msrb.gmra.mxu2 %vm702_vm2, %v9535_v61 }
 0xbda   : > { %6875 = vmatmul.msk.bf16.vlgmr.msrb.gmra.mxu3 %vm702_vm2, %v9535_v61  ;;  %6876 = vmatmul.msk.bf16.vlgmr.msra.gmra.mxu0 %vm702_vm2, %v9535_v61  ;;  %v7910_v61 = vld [vmem:[%s10114_s16 + $0x490] sm:$0xff] }
 0xbdb   : > { %5414 = vmatpush.bf16.msra.mxu1 %v7895_v56  ;;  %5453 = vmatpush.bf16.msrb.mxu0 %v7919_v51 }
 0xbdc   : > { %5427 = vmatpush.bf16.msra.mxu2 %v7903_v58  ;;  %5440 = vmatpush.bf16.msra.mxu3 %v7911_v59 }
 0xbdf   : > { %5415 = vmatpush.bf16.msra.mxu1 %v7894_v60  ;;  %5454 = vmatpush.bf16.msrb.mxu0 %v7918_v62 }
 0xbe0   : > { %5428 = vmatpush.bf16.msra.mxu2 %v7902_v63  ;;  %5441 = vmatpush.bf16.msra.mxu3 %v7910_v61  ;;  %v7962_v63 = vld [vmem:[%s10114_s16 + $0x630] sm:$0xff] }
 0xbe3   : > { %5416 = vmatpush.bf16.msra.mxu1 %v7893_v0  ;;  %5455 = vmatpush.bf16.msrb.mxu0 %v7917_v1  ;;  %v7986_v1 = vld [vmem:[%s10114_s16 + $0x6f0] sm:$0xff] }
 0xbe4   : > { %5429 = vmatpush.bf16.msra.mxu2 %v7901_v2  ;;  %5442 = vmatpush.bf16.msra.mxu3 %v7909_v4  ;;  %v7971_v4 = vld [vmem:[%s10114_s16 + $0x678] sm:$0xff] }
 0xbe7   : > { %5417 = vmatpush.bf16.msra.mxu1 %v7892_v5  ;;  %5456 = vmatpush.bf16.msrb.mxu0 %v7916_v6  ;;  %v7979_v6 = vld [vmem:[%s10114_s16 + $0x6b8] sm:$0xff] }
 0xbe8   : > { %5430 = vmatpush.bf16.msra.mxu2 %v7900_v10  ;;  %5443 = vmatpush.bf16.msra.mxu3 %v7908_v12  ;;  %v7985_v10 = vld [vmem:[%s10114_s16 + $0x6e8] sm:$0xff]  ;;  %v3949_v12 = vperm.slane %v9836_v42, 4 }
 0xbeb   : > { %5462 = vmatpush.bf16.msrb.mxu1 %v7931_v7  ;;  %5501 = vmatpush.bf16.msra.mxu0 %v7955_v9  ;;  %v7961_v9 = vld [vmem:[%s10114_s16 + $0x628] sm:$0xff] }
 0xbec   : > { %5475 = vmatpush.bf16.msrb.mxu2 %v7939_v13  ;;  %5488 = vmatpush.bf16.msrb.mxu3 %v7947_v25  ;;  %v3952_v25 = vperm.slane %v9836_v42, 7 }
 0xbef   : > { %5463 = vmatpush.bf16.msrb.mxu1 %v7930_v15  ;;  %5502 = vmatpush.bf16.msra.mxu0 %v7954_v16  ;;  %v7970_v15 = vld [vmem:[%s10114_s16 + $0x670] sm:$0xff] }
 0xbf0   : > { %5476 = vmatpush.bf16.msrb.mxu2 %v7938_v17  ;;  %5489 = vmatpush.bf16.msrb.mxu3 %v7946_v18  ;;  %v7978_v17 = vld [vmem:[%s10114_s16 + $0x6b0] sm:$0xff] }
 0xbf3   : > { %5464 = vmatpush.bf16.msrb.mxu1 %v7929_v19  ;;  %5503 = vmatpush.bf16.msra.mxu0 %v7953_v14  ;;  %v7960_v19 = vld [vmem:[%s10114_s16 + $0x620] sm:$0xff] }
 0xbf4   : > { %5477 = vmatpush.bf16.msrb.mxu2 %v7937_v21  ;;  %5490 = vmatpush.bf16.msrb.mxu3 %v7945_v22  ;;  %v7984_v22 = vld [vmem:[%s10114_s16 + $0x6e0] sm:$0xff] }
 0xbf7   : > { %5465 = vmatpush.bf16.msrb.mxu1 %v7928_v23  ;;  %5504 = vmatpush.bf16.msra.mxu0 %v7952_v26  ;;  %v7969_v26 = vld [vmem:[%s10114_s16 + $0x668] sm:$0xff] }
 0xbf8   : > { %5478 = vmatpush.bf16.msrb.mxu2 %v7936_v27  ;;  %5491 = vmatpush.bf16.msrb.mxu3 %v7944_v24  ;;  %v7977_v24 = vld [vmem:[%s10114_s16 + $0x6a8] sm:$0xff] }
 0xbfb   : > { %5466 = vmatpush.bf16.msrb.mxu1 %v7927_v28  ;;  %5505 = vmatpush.bf16.msra.mxu0 %v7951_v29  ;;  %v3950_v28 = vperm.slane %v9836_v42, 5 }
 0xbfc   : > { %5479 = vmatpush.bf16.msrb.mxu2 %v7935_v32  ;;  %5492 = vmatpush.bf16.msrb.mxu3 %v7943_v33  ;;  %v7983_v33 = vld [vmem:[%s10114_s16 + $0x6d8] sm:$0xff] }
 0xbff   : > { %5467 = vmatpush.bf16.msrb.mxu1 %v7926_v30  ;;  %5506 = vmatpush.bf16.msra.mxu0 %v7950_v31  ;;  %v3951_v30 = vperm.slane %v9836_v42, 6  ;;  %v7959_v31 = vld [vmem:[%s10114_s16 + $0x618] sm:$0xff] }
 0xc00   : > { %5480 = vmatpush.bf16.msrb.mxu2 %v7934_v35  ;;  %5493 = vmatpush.bf16.msrb.mxu3 %v7942_v36  ;;  %v7968_v35 = vld [vmem:[%s10114_s16 + $0x660] sm:$0xff] }
 0xc03   : > { %5468 = vmatpush.bf16.msrb.mxu1 %v7925_v8  ;;  %5507 = vmatpush.bf16.msra.mxu0 %v7949_v34 }
 0xc04   : > { %5481 = vmatpush.bf16.msrb.mxu2 %v7933_v20  ;;  %5494 = vmatpush.bf16.msrb.mxu3 %v7941_v39 }
 0xc07   : > { %5469 = vmatpush.bf16.msrb.mxu1 %v7924_v37  ;;  %5508 = vmatpush.bf16.msra.mxu0 %v7948_v38  ;;  %v7976_v38 = vld [vmem:[%s10114_s16 + $0x6a0] sm:$0xff] }
 0xc08   : > { %5482 = vmatpush.bf16.msrb.mxu2 %v7932_v40  ;;  %5495 = vmatpush.bf16.msrb.mxu3 %v7940_v41  ;;  %v7958_v40 = vld [vmem:[%s10114_s16 + $0x610] sm:$0xff] }
 0xc26   : > { %v4149_v45 = vpop.f32.mrf.mxu1 }
 0xc27   : > { %v4150_v46 = vadd.f32 %v4149_v45, %v3945_v43  ;;  %v4188_v47 = vpop.f32.mrf.mxu0  ;;  %v7982_v43 = vld [vmem:[%s10114_s16 + $0x6d0] sm:$0xff]  ;;  %v7967_v45 = vld [vmem:[%s10114_s16 + $0x658] sm:$0xff] }
 0xc28   : > { %v4189_v48 = vadd.f32 %v4188_v47, %v3948_v44 }
 0xc29   : > { %v4348_v49 = vmax.f32 %v4150_v46, 0.0  ;;  %v9912_v46 = vld [vmem:[%s10113_s15 + $0x18] sm:$0xff] }
 0xc2a   : > { %v4351_v52 = vmax.f32 %v4189_v48, 0.0  ;;  %v7975_v48 = vld [vmem:[%s10114_s16 + $0x698] sm:$0xff] }
 0xc2b   : > { %v4364_v3 = vpack.c.bf16 %v4348_v49, %v4348_v49 }
 0xc2c   : > { %v4367_v56 = vpack.c.bf16 %v4351_v52, %v4351_v52  ;;  %v4162_v51 = vpop.f32.mrf.mxu2  ;;  %v7981_v52 = vld [vmem:[%s10114_s16 + $0x6c8] sm:$0xff] }
 0xc2d   : > { %v4163_v58 = vadd.f32 %v4162_v51, %v3946_v50  ;;  %v4175_v59 = vpop.f32.mrf.mxu3  ;;  %5418 = vmatmul.bf16.vlgmr.msra.gmra.mxu1 %v4364_v3  ;;  %v7957_v50 = vld [vmem:[%s10114_s16 + $0x608] sm:$0xff]  ;;  %v3956_v3 = vperm.slane %v9912_v46, 3  ;;  %v7974_v51 = vld [vmem:[%s10114_s16 + $0x690] sm:$0xff] }
 0xc2e   : > { %v4176_v60 = vadd.f32 %v4175_v59, %v3947_v53  ;;  %5457 = vmatmul.bf16.vlgmr.msrb.gmra.mxu0 %v4367_v56  ;;  %5514 = vmatpush.bf16.msra.mxu1 %v7963_v54  ;;  %v4151_v62 = vpop.f32.mrf.mxu1  ;;  %v3953_v53 = vperm.slane %v9912_v46, 0  ;;  %v7956_v59 = vld [vmem:[%s10114_s16 + $0x600] sm:$0xff] }
 0xc2f   : > { %v4349_v61 = vmax.f32 %v4163_v58, 0.0  ;;  %5553 = vmatpush.bf16.msrb.mxu0 %v7987_v55  ;;  %v4190_v0 = vpop.f32.mrf.mxu0  ;;  %v7966_v55 = vld [vmem:[%s10114_s16 + $0x650] sm:$0xff] }
 0xc30   : > { %v4350_v2 = vmax.f32 %v4176_v60, 0.0 }
 0xc31   : > { %v4365_v5 = vpack.c.bf16 %v4349_v61, %v4349_v61  ;;  %v7995_v61 = vld [vmem:[%s10114_s16 + $0x738] sm:$0xff] }
 0xc32   : > { %v4366_v7 = vpack.c.bf16 %v4350_v2, %v4350_v2  ;;  %5515 = vmatpush.bf16.msra.mxu1 %v7962_v63  ;;  %v7980_v63 = vld [vmem:[%s10114_s16 + $0x6c0] sm:$0xff]  ;;  %v7965_v2 = vld [vmem:[%s10114_s16 + $0x648] sm:$0xff] }
 0xc33   : > { %5554 = vmatpush.bf16.msrb.mxu0 %v7986_v1  ;;  %5431 = vmatmul.bf16.vlgmr.msra.gmra.mxu2 %v4365_v5  ;;  %v8019_v1 = vld [vmem:[%s10114_s16 + $0x7f8] sm:$0xff]  ;;  %v7973_v5 = vld [vmem:[%s10114_s16 + $0x688] sm:$0xff] }
 0xc34   : > { %5444 = vmatmul.bf16.vlgmr.msra.gmra.mxu3 %v4366_v7  ;;  %5527 = vmatpush.bf16.msra.mxu2 %v7971_v4  ;;  %v4164_v13 = vpop.f32.mrf.mxu2 }
 0xc35   : > { %5540 = vmatpush.bf16.msra.mxu3 %v7979_v6  ;;  %v4177_v16 = vpop.f32.mrf.mxu3  ;;  %v3954_v6 = vperm.slane %v9912_v46, 1 }
 0xc36   : > { %5516 = vmatpush.bf16.msra.mxu1 %v7961_v9  ;;  %v4201_v18 = vpop.f32.mrf.mxu1  ;;  %v3955_v9 = vperm.slane %v9912_v46, 2  ;;  %v7964_v16 = vld [vmem:[%s10114_s16 + $0x640] sm:$0xff] }
 0xc37   : > { %5555 = vmatpush.bf16.msrb.mxu0 %v7985_v10  ;;  %v4202_v14 = vadd.f32 %v4201_v18, %v3949_v12  ;;  %v4240_v21 = vpop.f32.mrf.mxu0  ;;  %v7994_v12 = vld [vmem:[%s10114_s16 + $0x730] sm:$0xff] }
 0xc38   : > { %v4241_v23 = vadd.f32 %v4240_v21, %v3952_v25  ;;  %5528 = vmatpush.bf16.msra.mxu2 %v7970_v15  ;;  %v8018_v15 = vld [vmem:[%s10114_s16 + $0x7f0] sm:$0xff] }
 0xc39   : > { %v4352_v27 = vmax.f32 %v4202_v14, 0.0  ;;  %5541 = vmatpush.bf16.msra.mxu3 %v7978_v17  ;;  %v8003_v14 = vld [vmem:[%s10114_s16 + $0x778] sm:$0xff] }
 0xc3a   : > { %v4355_v29 = vmax.f32 %v4241_v23, 0.0  ;;  %5517 = vmatpush.bf16.msra.mxu1 %v7960_v19  ;;  %v7972_v19 = vld [vmem:[%s10114_s16 + $0x680] sm:$0xff]  ;;  %v8011_v23 = vld [vmem:[%s10114_s16 + $0x7b8] sm:$0xff] }
 0xc3b   : > { %v4368_v32 = vpack.c.bf16 %v4352_v27, %v4352_v27  ;;  %5556 = vmatpush.bf16.msrb.mxu0 %v7984_v22 }
 0xc3c   : > { %v4371_v8 = vpack.c.bf16 %v4355_v29, %v4355_v29  ;;  %5529 = vmatpush.bf16.msra.mxu2 %v7969_v26  ;;  %v4214_v34 = vpop.f32.mrf.mxu2  ;;  %v8017_v29 = vld [vmem:[%s10114_s16 + $0x7e8] sm:$0xff] }
 0xc3d   : > { %5542 = vmatpush.bf16.msra.mxu3 %v7977_v24  ;;  %v4215_v36 = vadd.f32 %v4214_v34, %v3950_v28  ;;  %v4227_v37 = vpop.f32.mrf.mxu3  ;;  %5470 = vmatmul.bf16.vlgmr.msrb.gmra.mxu1 %v4368_v32  ;;  %v7993_v24 = vld [vmem:[%s10114_s16 + $0x728] sm:$0xff] }
 0xc3e   : > { %v4228_v20 = vadd.f32 %v4227_v37, %v3951_v30  ;;  %5509 = vmatmul.bf16.vlgmr.msra.gmra.mxu0 %v4371_v8  ;;  %5518 = vmatpush.bf16.msra.mxu1 %v7959_v31  ;;  %v4203_v39 = vpop.f32.mrf.mxu1  ;;  %v8002_v31 = vld [vmem:[%s10114_s16 + $0x770] sm:$0xff]  ;;  %v7992_v8 = vld [vmem:[%s10114_s16 + $0x720] sm:$0xff]  ;;  %v8001_v37 = vld [vmem:[%s10114_s16 + $0x768] sm:$0xff] }
 0xc3f   : > { %v4353_v41 = vmax.f32 %v4215_v36, 0.0  ;;  %5557 = vmatpush.bf16.msrb.mxu0 %v7983_v33  ;;  %v4242_v42 = vpop.f32.mrf.mxu0  ;;  %v8010_v33 = vld [vmem:[%s10114_s16 + $0x7b0] sm:$0xff] }
 0xc40   : > { %v4354_v44 = vmax.f32 %v4228_v20, 0.0  ;;  %5530 = vmatpush.bf16.msra.mxu2 %v7968_v35  ;;  %v8016_v35 = vld [vmem:[%s10114_s16 + $0x7e0] sm:$0xff]  ;;  %v8009_v20 = vld [vmem:[%s10114_s16 + $0x7a8] sm:$0xff] }
 0xc41   : > { %v4369_v47 = vpack.c.bf16 %v4353_v41, %v4353_v41  ;;  %5543 = vmatpush.bf16.msra.mxu3 %v7976_v38  ;;  %v8015_v41 = vld [vmem:[%s10114_s16 + $0x7d8] sm:$0xff]  ;;  %v8000_v42 = vld [vmem:[%s10114_s16 + $0x760] sm:$0xff] }
 0xc42   : > { %v4370_v49 = vpack.c.bf16 %v4354_v44, %v4354_v44  ;;  %5519 = vmatpush.bf16.msra.mxu1 %v7958_v40  ;;  %v7991_v40 = vld [vmem:[%s10114_s16 + $0x718] sm:$0xff]  ;;  %v7990_v44 = vld [vmem:[%s10114_s16 + $0x710] sm:$0xff] }
 0xc43   : > { %5558 = vmatpush.bf16.msrb.mxu0 %v7982_v43  ;;  %5483 = vmatmul.bf16.vlgmr.msrb.gmra.mxu2 %v4369_v47  ;;  %v8008_v43 = vld [vmem:[%s10114_s16 + $0x7a0] sm:$0xff] }
 0xc44   : > { %5496 = vmatmul.bf16.vlgmr.msrb.gmra.mxu3 %v4370_v49  ;;  %5531 = vmatpush.bf16.msra.mxu2 %v7967_v45  ;;  %v4216_v54 = vpop.f32.mrf.mxu2  ;;  %v3957_v45 = vperm.slane %v9912_v46, 4  ;;  %v3960_v49 = vperm.slane %v9912_v46, 7 }
 0xc45   : > { %5544 = vmatpush.bf16.msra.mxu3 %v7975_v48  ;;  %v4229_v56 = vpop.f32.mrf.mxu3  ;;  %v8014_v48 = vld [vmem:[%s10114_s16 + $0x7d0] sm:$0xff]  ;;  %v8007_v54 = vld [vmem:[%s10114_s16 + $0x798] sm:$0xff] }
 0xc46   : > { %5520 = vmatpush.bf16.msra.mxu1 %v7957_v50  ;;  %v4253_v58 = vpop.f32.mrf.mxu1 }
 0xc47   : > { %5559 = vmatpush.bf16.msrb.mxu0 %v7981_v52  ;;  %v4254_v60 = vadd.f32 %v4253_v58, %v3953_v53  ;;  %v4292_v62 = vpop.f32.mrf.mxu0  ;;  %v7999_v52 = vld [vmem:[%s10114_s16 + $0x758] sm:$0xff] }
 0xc48   : > { %v4293_v0 = vadd.f32 %v4292_v62, %v3956_v3  ;;  %5532 = vmatpush.bf16.msra.mxu2 %v7966_v55  ;;  %v7989_v55 = vld [vmem:[%s10114_s16 + $0x708] sm:$0xff]  ;;  %v8006_v62 = vld [vmem:[%s10114_s16 + $0x790] sm:$0xff] }
 0xc49   : > { %v4356_v4 = vmax.f32 %v4254_v60, 0.0  ;;  %5545 = vmatpush.bf16.msra.mxu3 %v7974_v51  ;;  %v8013_v51 = vld [vmem:[%s10114_s16 + $0x7c8] sm:$0xff]  ;;  %v3958_v60 = vperm.slane %v9912_v46, 5 }
 0xc4a   : > { %v4359_v7 = vmax.f32 %v4293_v0, 0.0  ;;  %5521 = vmatpush.bf16.msra.mxu1 %v7956_v59  ;;  %v7998_v59 = vld [vmem:[%s10114_s16 + $0x750] sm:$0xff] }
 0xc4b   : > { %v4372_v10 = vpack.c.bf16 %v4356_v4, %v4356_v4  ;;  %5560 = vmatpush.bf16.msrb.mxu0 %v7980_v63  ;;  %v3959_v63 = vperm.slane %v9912_v46, 6 }
 0xc4c   : > { %v4375_v13 = vpack.c.bf16 %v4359_v7, %v4359_v7  ;;  %5533 = vmatpush.bf16.msra.mxu2 %v7965_v2  ;;  %v4266_v25 = vpop.f32.mrf.mxu2  ;;  %v8012_v2 = vld [vmem:[%s10114_s16 + $0x7c0] sm:$0xff]  ;;  %v8005_v7 = vld [vmem:[%s10114_s16 + $0x788] sm:$0xff] }
 0xc4d   : > { %5546 = vmatpush.bf16.msra.mxu3 %v7973_v5  ;;  %v4267_v17 = vadd.f32 %v4266_v25, %v3954_v6  ;;  %v4279_v18 = vpop.f32.mrf.mxu3  ;;  %5522 = vmatmul.bf16.vlgmr.msra.gmra.mxu1 %v4372_v10  ;;  %v7997_v6 = vld [vmem:[%s10114_s16 + $0x748] sm:$0xff] }
 0xc4e   : > { %5566 = vmatpush.bf16.msrb.mxu1 %v7995_v61  ;;  %v4280_v21 = vadd.f32 %v4279_v18, %v3955_v9  ;;  %5561 = vmatmul.bf16.vlgmr.msrb.gmra.mxu0 %v4375_v13  ;;  %v4255_v22 = vpop.f32.mrf.mxu1  ;;  %v7988_v61 = vld [vmem:[%s10114_s16 + $0x700] sm:$0xff] }
 0xc4f   : > { %5605 = vmatpush.bf16.msra.mxu0 %v8019_v1  ;;  %v4357_v26 = vmax.f32 %v4267_v17, 0.0  ;;  %v4294_v27 = vpop.f32.mrf.mxu0  ;;  %v7996_v13 = vld [vmem:[%s10114_s16 + $0x740] sm:$0xff] }
 0xc50   : > { %v4358_v28 = vmax.f32 %v4280_v21, 0.0  ;;  %5534 = vmatpush.bf16.msra.mxu2 %v7964_v16 }
 0xc51   : > { %v4373_v30 = vpack.c.bf16 %v4357_v26, %v4357_v26  ;;  %5547 = vmatpush.bf16.msra.mxu3 %v7972_v19 }
 0xc52   : > { %5567 = vmatpush.bf16.msrb.mxu1 %v7994_v12  ;;  %v4374_v32 = vpack.c.bf16 %v4358_v28, %v4358_v28 }
 0xc53   : > { %5606 = vmatpush.bf16.msra.mxu0 %v8018_v15  ;;  %5535 = vmatmul.bf16.vlgmr.msra.gmra.mxu2 %v4373_v30  ;;  %v8004_v15 = vld [vmem:[%s10114_s16 + $0x780] sm:$0xff] }
 0xc54   : > { %5579 = vmatpush.bf16.msrb.mxu2 %v8003_v14  ;;  %5548 = vmatmul.bf16.vlgmr.msra.gmra.mxu3 %v4374_v32  ;;  %v4268_v34 = vpop.f32.mrf.mxu2  ;;  %v8094_v32 = vld [vmem:[%s10115_s17 + $0x1] ss:$0 sm:$0xff] }
 0xc55   : > { %5592 = vmatpush.bf16.msrb.mxu3 %v8011_v23  ;;  %v4281_v36 = vpop.f32.mrf.mxu3 }
 0xc56   : > { %5568 = vmatpush.bf16.msrb.mxu1 %v7993_v24  ;;  %v4305_v38 = vpop.f32.mrf.mxu1 }
 0xc57   : > { %5607 = vmatpush.bf16.msra.mxu0 %v8017_v29  ;;  %v4344_v39 = vpop.f32.mrf.mxu0  ;;  %v4306_v56 = vadd.f32 %v4305_v38, %v3957_v45 }
 0xc58   : > { %5580 = vmatpush.bf16.msrb.mxu2 %v8002_v31  ;;  %v4345_v58 = vadd.f32 %v4344_v39, %v3960_v49 }
 0xc59   : > { %5593 = vmatpush.bf16.msrb.mxu3 %v8010_v33  ;;  %v4360_v0 = vmax.f32 %v4306_v56, 0.0 }
 0xc5a   : > { %5569 = vmatpush.bf16.msrb.mxu1 %v7992_v8  ;;  %v4363_v4 = vmax.f32 %v4345_v58, 0.0 }
 0xc5b   : > { %5608 = vmatpush.bf16.msra.mxu0 %v8016_v35  ;;  %v4376_v10 = vpack.c.bf16 %v4360_v0, %v4360_v0 }
 0xc5c   : > { %5581 = vmatpush.bf16.msrb.mxu2 %v8001_v37  ;;  %v4318_v47 = vpop.f32.mrf.mxu2  ;;  %v4379_v12 = vpack.c.bf16 %v4363_v4, %v4363_v4 }
 0xc5d   : > { %5594 = vmatpush.bf16.msrb.mxu3 %v8009_v20  ;;  %v4331_v50 = vpop.f32.mrf.mxu3  ;;  %v4319_v46 = vadd.f32 %v4318_v47, %v3958_v60 }
 0xc5e   : > { %5570 = vmatpush.bf16.msrb.mxu1 %v7991_v40  ;;  %v4307_v53 = vpop.f32.mrf.mxu1  ;;  %v4332_v9 = vadd.f32 %v4331_v50, %v3959_v63 }
 0xc5f   : > { %5609 = vmatpush.bf16.msra.mxu0 %v8015_v41  ;;  %v4346_v3 = vpop.f32.mrf.mxu0  ;;  %v4361_v25 = vmax.f32 %v4319_v46, 0.0 }
 0xc60   : > { %5582 = vmatpush.bf16.msrb.mxu2 %v8000_v42  ;;  %v4362_v16 = vmax.f32 %v4332_v9, 0.0 }
 0xc61   : > { %5595 = vmatpush.bf16.msrb.mxu3 %v8008_v43  ;;  %v4377_v17 = vpack.c.bf16 %v4361_v25, %v4361_v25 }
 0xc62   : > { %5571 = vmatpush.bf16.msrb.mxu1 %v7990_v44  ;;  %v4378_v18 = vpack.c.bf16 %v4362_v16, %v4362_v16 }
 0xc63   : > { %5610 = vmatpush.bf16.msra.mxu0 %v8014_v48 }
 0xc64   : > { %5583 = vmatpush.bf16.msrb.mxu2 %v7999_v52  ;;  %v4320_v1 = vpop.f32.mrf.mxu2 }
 0xc65   : > { %5596 = vmatpush.bf16.msrb.mxu3 %v8007_v54  ;;  %v4333_v5 = vpop.f32.mrf.mxu3 }
 0xc66   : > { %5572 = vmatpush.bf16.msrb.mxu1 %v7989_v55 }
 0xc67   : > { %5611 = vmatpush.bf16.msra.mxu0 %v8013_v51 }
 0xc68   : > { %5584 = vmatpush.bf16.msrb.mxu2 %v7998_v59 }
 0xc69   : > { %5597 = vmatpush.bf16.msrb.mxu3 %v8006_v62 }
 0xc6a   : > { %5573 = vmatpush.bf16.msrb.mxu1 %v7988_v61 }
 0xc6b   : > { %5612 = vmatpush.bf16.msra.mxu0 %v8012_v2 }
 0xc6c   : > { %5585 = vmatpush.bf16.msrb.mxu2 %v7997_v6 }
 0xc6d   : > { %5598 = vmatpush.bf16.msrb.mxu3 %v8005_v7  ;;  %5574 = vmatmul.bf16.vlgmr.msrb.gmra.mxu1 %v4376_v10 }
 0xc6e   : > { %5613 = vmatmul.bf16.vlgmr.msra.gmra.mxu0 %v4379_v12 }
 0xc70   : > { %5586 = vmatpush.bf16.msrb.mxu2 %v7996_v13 }
 0xc71   : > { %5599 = vmatpush.bf16.msrb.mxu3 %v8004_v15 }
 0xc73   : > { %5587 = vmatmul.bf16.vlgmr.msrb.gmra.mxu2 %v4377_v17 }
 0xc74   : > { %5600 = vmatmul.bf16.vlgmr.msrb.gmra.mxu3 %v4378_v18 }
 0xcaa   : > { %v5419_v19 = vpop.f32.mrf.mxu1 }
 0xcab   : > { %v5458_v14 = vpop.f32.mrf.mxu0  ;;  %v5420_v34 = vadd.f32 %v8094_v32, %v5419_v19 }
 0xcb2   : > { %v5421_v21 = vpop.f32.mrf.mxu1 }
 0xcb3   : > { %v5460_v22 = vpop.f32.mrf.mxu0  ;;  %v8095_v21 = vld [vmem:[%s10116_s18 + $0x1] ss:$0 sm:$0xff] }
 0xcb6   : > { %v5432_v23 = vpop.f32.mrf.mxu2 }
 0xcb7   : > { %v5445_v26 = vpop.f32.mrf.mxu3  ;;  %v5433_v37 = vadd.f32 %v5432_v23, %v5420_v34  ;;  %v8096_v23 = vld [vmem:[%s10117_s19 + $0x1] ss:$0 sm:$0xff] }
 0xcb9   : > { %v5446_v39 = vadd.f32 %v5445_v26, %v5433_v37 }
 0xcba   : > { %v5471_v27 = vpop.f32.mrf.mxu1 }
 0xcbb   : > { %v5510_v24 = vpop.f32.mrf.mxu0  ;;  %v5459_v42 = vadd.f32 %v5458_v14, %v5446_v39 }
 0xcbd   : > { %v5472_v45 = vadd.f32 %v5471_v27, %v5459_v42 }
 0xcbe   : > { %v5434_v28 = vpop.f32.mrf.mxu2 }
 0xcbf   : > { %v5447_v29 = vpop.f32.mrf.mxu3 }
 0xcc2   : > { %v5473_v30 = vpop.f32.mrf.mxu1 }
 0xcc3   : > { %v5512_v31 = vpop.f32.mrf.mxu0 }
 0xcc6   : > { %v5484_v33 = vpop.f32.mrf.mxu2 }
 0xcc7   : > { %v5497_v8 = vpop.f32.mrf.mxu3  ;;  %v5485_v47 = vadd.f32 %v5484_v33, %v5472_v45 }
 0xcc9   : > { %v5498_v48 = vadd.f32 %v5497_v8, %v5485_v47 }
 0xcca   : > { %v5523_v35 = vpop.f32.mrf.mxu1 }
 0xccb   : > { %v5562_v36 = vpop.f32.mrf.mxu0  ;;  %v5511_v52 = vadd.f32 %v5510_v24, %v5498_v48 }
 0xccd   : > { %v5524_v53 = vadd.f32 %v5523_v35, %v5511_v52 }
 0xcce   : > { %v5486_v38 = vpop.f32.mrf.mxu2 }
 0xccf   : > { %v5499_v20 = vpop.f32.mrf.mxu3 }
 0xcd2   : > { %v5525_v40 = vpop.f32.mrf.mxu1 }
 0xcd3   : > { %v5564_v41 = vpop.f32.mrf.mxu0 }
 0xcd6   : > { %v5536_v43 = vpop.f32.mrf.mxu2 }
 0xcd7   : > { %v5549_v44 = vpop.f32.mrf.mxu3  ;;  %v5537_v3 = vadd.f32 %v5536_v43, %v5524_v53 }
 0xcd9   : > { %v5550_v56 = vadd.f32 %v5549_v44, %v5537_v3 }
 0xcdb   : > { %v5563_v58 = vadd.f32 %v5562_v36, %v5550_v56 }
 0xcde   : > { %v5538_v49 = vpop.f32.mrf.mxu2 }
 0xcdf   : > { %v5551_v50 = vpop.f32.mrf.mxu3 }
 0xcea   : > { %v5575_v54 = vpop.f32.mrf.mxu1 }
 0xceb   : > { %v5614_v55 = vpop.f32.mrf.mxu0  ;;  %v5576_v60 = vadd.f32 %v5575_v54, %v5563_v58 }
 0xcf2   : > { %v5577_v51 = vpop.f32.mrf.mxu1 }
 0xcf3   : > { %v5616_v59 = vpop.f32.mrf.mxu0 }
 0xcf6   : > { %v5588_v62 = vpop.f32.mrf.mxu2 }
 0xcf7   : > { %v5589_v63 = vadd.f32 %v5588_v62, %v5576_v60  ;;  %v5601_v61 = vpop.f32.mrf.mxu3 }
 0xcf9   : > { %v5602_v0 = vadd.f32 %v5601_v61, %v5589_v63 }
 0xcfb   : > { %v5615_v1 = vadd.f32 %v5614_v55, %v5602_v0 }
 0xcfd   : > { %v5618_v2 = vadd.f32 %v5615_v1, %v9522_v57 }
 0xcfe   : > { %v5590_v4 = vpop.f32.mrf.mxu2 }
 0xcff   : > { %v5603_v5 = vpop.f32.mrf.mxu3  ;;  %v5623_v6 = vsel %vm702_vm2, %v5618_v2, 0.0 }
 0xd00   : > { %5624 = vadd.xlane.f32.xlu1 %v5623_v6 }
 0xd73   : > { %v5625_v46 = vpop.xlane.xlu1 %5624 }
 0xd74   : > { %v5626_v7 = vmul.f32 %v5625_v46, %v8550_v11 }
 0xd76   : > { %v5627_v9 = vsub.f32 %v5618_v2, %v5626_v7 }
 0xd78   : > { %v5628_v10 = vmul.f32 %v5627_v9, %v5627_v9 }
 0xd7a   : > { %v5629_v12 = vsel %vm702_vm2, %v5628_v10, 0.0 }
 0xd7b   : > { %5630 = vadd.xlane.f32.xlu2 %v5629_v12 }
 0xdee   : > { %v5631_v13 = vpop.xlane.xlu2 %5630 }
 0xdef   : > { %v5632_v25 = vmul.f32 %v5631_v13, %v8550_v11 }
 0xdf1   : > { %v5633_v15 = vadd.f32 1e-05, %v5632_v25 }
 0xdf3   : > { %8137 = vrsqrt.f32 %v5633_v15  ;;  %vm5640_vm14 = vweird.f32 %v5633_v15 }
 0xdf9   : > { %v8138_v57 = vpop.eup %8137 }
 0xdfa   : > { %v5635_v16 = vmul.f32 %v8138_v57, %v5633_v15  ;;  %vm5641_vm13 = vweird.f32 %v8138_v57 }
 0xdfb   : > { %vm5642_vm15 = vmor %vm5640_vm14, %vm5641_vm13 }
 0xdfc   : > { %v5636_v17 = vmul.f32 %v8138_v57, %v5635_v16 }
 0xdfe   : > { %v5637_v18 = vmul.f32 0.5, %v5636_v17 }
 0xe00   : > { %v5638_v19 = vsub.f32 1.5, %v5637_v18 }
 0xe02   : > { %v5639_v14 = vmul.f32 %v8138_v57, %v5638_v19 }
 0xe04   : > { %v5643_v11 = vsel %vm5642_vm15, %v8138_v57, %v5639_v14 }
 0xe05   : > { %v5644_v22 = vmul.f32 %v5643_v11, %v5627_v9 }
 0xe07   : > { %v5648_v26 = vmul.f32 %v8095_v21, %v5644_v22 }
 0xe09   : > { %v5652_v27 = vadd.f32 %v8096_v23, %v5648_v26 }
 0xe0b   : > { %5653 = vst.msk [vmem:[%s620_s30] sm:$0xff] %vm702_vm2, %v5652_v27 }
 0xe0c   : > { %8166 = shalt.err (!%p8163_p3)
}
 0xe0d   : > { %8020 = dma.vmem_to_hbm [thread:$0]  (%p8347_p5), %s5668_s2, 128, %s5670_s5, %s5655_s21  }
 0xe0e PF: > { %s10152_s24 = sld [smem:[#allocation7_spill]] }
 0xe0f   : > { %s10153_s1 = sld [smem:[#allocation5_spill]] }
 0xe14   : > { %p8026_p4 = scmp.ge.s32.totalorder %s10152_s24, 2 }
 0xe15   : > { %s5681_s6 = sand.u32 1, %s10153_s1  }
 0xe16   : > { %p8023_p7 = pnand %p8026_p4, %p8351_p6  ;;  %s5682_s28 = scalar_lea.sflag [#allocation3], %s5681_s6 }
 0xe18   : > { %p8024_p8 = pneg %p8023_p7 }
 0xe1a   : > { %8184 = dma.done.wait (%p8024_p8), %s5682_s28, 128  }
 0xe1b   : > { %8186 = vsyncadd (%p8024_p8), %s5682_s28, 4294967168  ;;  %s10155_s24 = sld [smem:[#allocation8_spill]]  ;;  %s10158_s1 = smov %s8193_s22 }
 0xe1c   : > { %s10156_s25 = sld [smem:[#allocation6_spill]] }
 0xe1d   : > { %s10157_s23 = sld [smem:[#allocation9_spill]] }
 0xe21   : > { %p30_p9 = scmp.ge.s32.totalorder %s10155_s24, 4  }
 0xe22   : > { %s10159_s22 = smov %s10156_s25 }
 0xe23   :  { %32 = sbr.rel (!%p30_p9) target bundleno = 11 (0xb), region = 151 }
 0xe28   :  { %5688 = vsyncpa [#allocation3], 1 }
 0xe29   :  { %5690 = vsyncpa [#allocation3 + $0x1], 1 }

</bundles_post_ra>
